<compile_context>
chip_gen: v7x
topology: tpu7x:2x2x1
jax: 0.10.0
libtpu: 0.0.40
codegen_flags: <defaults>
</compile_context>

<pallas_src>
import functools

import jax
import jax.numpy as jnp
from jax.experimental import pallas as pl
from jax.experimental.pallas import tpu as pltpu


def _layer_norm(x, g, b, eps=1e-5):
    mu = jnp.mean(x, axis=-1, keepdims=True)
    var = jnp.mean(jnp.square(x - mu), axis=-1, keepdims=True)
    return (x - mu) * jax.lax.rsqrt(var + eps) * g + b


def _block_kernel(x_ref, mask_ref,
                  ln1_g_ref, ln1_b_ref,
                  wqkv_ref, bqkv_ref, wo_ref, bo_ref,
                  ln2_g_ref, ln2_b_ref,
                  wfc_ref, bfc_ref, wpr_ref, bpr_ref,
                  out_ref, *, n_head, mlp_chunk):
    xb = x_ref[...]                               # (L, TB, D) seq-first slab
    L, TB, D = xb.shape
    H = n_head
    hd = D // H
    scale = 1.0 / float(hd) ** 0.5
    mm_dtype = wqkv_ref.dtype                     # f32, or bf16 if weights were pre-cast

    # One layout change to sequence-major; everything below works on (TB*L, D) rows.
    xt = pltpu.einshape("ltd->tld", xb)           # (TB, L, D)
    x2 = xt.reshape(TB * L, D).astype(jnp.float32)

    # ---- ln_1 + fused QKV projection over all TB*L tokens (large-M matmul) ----
    xn = _layer_norm(x2, ln1_g_ref[...], ln1_b_ref[...])
    qkv = jnp.dot(xn.astype(mm_dtype), wqkv_ref[...],
                  preferred_element_type=jnp.float32) + bqkv_ref[...]      # (TB*L, 3D)

    # Hoisted casts: q/k/v cast to the matmul dtype once (1/sqrt(hd) folded into q).
    q2 = (qkv[:, 0 * D:1 * D] * scale).astype(mm_dtype)
    k2 = qkv[:, 1 * D:2 * D].astype(mm_dtype)
    v2 = qkv[:, 2 * D:3 * D].astype(mm_dtype)

    mask = mask_ref[...]                          # (L, L) additive mask, shared by all heads

    # ---- attention: static loop over heads, all TB sequences batched per einsum ----
    heads = []
    for h in range(H):
        sl = slice(h * hd, (h + 1) * hd)
        qh = q2[:, sl].reshape(TB, L, hd)
        kh = k2[:, sl].reshape(TB, L, hd)
        vh = v2[:, sl].reshape(TB, L, hd)
        s = jnp.einsum('bqd,bkd->bqk', qh, kh,
                       preferred_element_type=jnp.float32) + mask          # (TB, L, L) f32
        s = s - jnp.max(s, axis=-1, keepdims=True)
        p = jnp.exp(s)
        p = p * pl.reciprocal(jnp.sum(p, axis=-1, keepdims=True), approx=True)
        heads.append(jnp.einsum('bqk,bkd->bqd', p.astype(mm_dtype), vh,
                                preferred_element_type=jnp.float32))       # (TB, L, hd)
    # Lane-dense (TB*L, D) attention output assembled in registers (no per-head stores).
    attn = jnp.concatenate(heads, axis=-1).reshape(TB * L, D)

    # ---- out_proj + residual ----
    x1 = x2 + (jnp.dot(attn.astype(mm_dtype), wo_ref[...],
                       preferred_element_type=jnp.float32) + bo_ref[...])

    # ---- ln_2 + MLP (c_fc -> QuickGELU -> c_proj), hidden dim processed in chunks ----
    x1n = _layer_norm(x1, ln2_g_ref[...], ln2_b_ref[...]).astype(mm_dtype)
    d_hidden = wfc_ref.shape[1]
    y = x1 + bpr_ref[...]
    start = 0
    while start < d_hidden:                       # static chunking caps the live f32 hidden
        c = min(mlp_chunk, d_hidden - start)
        hc = jnp.dot(x1n, wfc_ref[:, start:start + c],
                     preferred_element_type=jnp.float32) + bfc_ref[:, start:start + c]
        hc = hc * jax.nn.sigmoid(1.702 * hc)      # QuickGELU (f32: v5e VPU/EUP have no bf16)
        y = y + jnp.dot(hc.astype(mm_dtype), wpr_ref[start:start + c, :],
                        preferred_element_type=jnp.float32)
        start += c

    out_ref[...] = pltpu.einshape("tld->ltd", y.reshape(TB, L, D)).astype(out_ref.dtype)


def _working_set_bytes(L, tb, D, H, w_itemsize, mlp_chunk, d_hidden):
    """Rough per-grid-step VMEM working-set estimate (activations in f32)."""
    M = tb * L
    f32 = 4
    act = f32 * (4 * M * D              # x in/out slabs (double-buffered by the pipeline)
                 + 3 * M * D            # qkv
                 + 3 * M * D            # q/k/v copies in matmul dtype (f32 upper bound)
                 + 2 * tb * L * L       # one head's scores + probabilities
                 + M * D                # concatenated attention output
                 + 3 * M * D            # x1, x1n, y accumulator
                 + 2 * M * mlp_chunk)   # MLP hidden chunk + gelu
    weights = (w_itemsize * (D * (3 * D + D) + 2 * D * d_hidden)
               + f32 * (L * L + 8 * D + 2 * d_hidden))
    return act + weights


def _pick_block_bt(BT, L, D, H, w_itemsize, mlp_chunk, d_hidden, vmem_budget):
    """Largest sublane-aligned divisor of BT whose working set fits ~70% of the VMEM budget."""
    budget = 0.7 * vmem_budget
    cands = [c for c in (512, 256, 128, 64, 32, 16, 8) if c <= BT and BT % c == 0]
    if not cands:
        # BT not a multiple of 8: full-BT block is always legal (in-kernel reshapes may relayout).
        return BT
    for cand in cands:
        if _working_set_bytes(L, cand, D, H, w_itemsize, mlp_chunk, d_hidden) <= budget:
            if BT // cand == 1:
                # v7x has 2 TensorCores: prefer >=2 grid steps, but never drop below ~512 rows
                # per projection matmul just to manufacture a second step (MXU fill comes first).
                for smaller in cands:
                    if smaller < cand and BT // smaller >= 2 and smaller * L >= 512:
                        return smaller
            return cand
    return cands[-1]


def cast_matmul_weights(params, dtype=jnp.bfloat16):
    """One-time (load-time) cast of the projection weights for the bf16 MXU path (v6e/v7x).
    Do this once when importing the checkpoint, never per forward call."""
    (ln1_g, ln1_b, wqkv, bqkv, wo, bo, ln2_g, ln2_b, wfc, bfc, wpr, bpr) = params
    return (ln1_g, ln1_b, wqkv.astype(dtype), bqkv, wo.astype(dtype), bo,
            ln2_g, ln2_b, wfc.astype(dtype), bfc, wpr.astype(dtype), bpr)


def times_attention_block(x_lbd, attn_mask, params, n_head, *,
                          block_bt=None, mlp_chunk=None, vmem_limit_bytes=None):
    """x_lbd: (L, BT, D) seq-first activations (PyTorch layout). Returns same shape.

    params: projection weights stored PRE-TRANSPOSED as (in_features, out_features); when
    importing PyTorch weights, pass W.T once at load time.  For bf16 matmuls (v6e/v7x) cast
    the weights once with cast_matmul_weights(); the kernel follows the weights' dtype.
    vmem_limit_bytes: defaults to 48 MiB (safe on v7x); pass ~100 MiB on v5e/v6e for larger tiles.
    """
    L, BT, D = x_lbd.shape
    assert D % n_head == 0

    (ln1_g, ln1_b, wqkv_t, bqkv, wo_t, bo,
     ln2_g, ln2_b, wfc_t, bfc, wpr_t, bpr) = params
    weight_args = (ln1_g, ln1_b, wqkv_t, bqkv, wo_t, bo,
                   ln2_g, ln2_b, wfc_t, bfc, wpr_t, bpr)
    d_hidden = wfc_t.shape[1]

    if mlp_chunk is None:
        mlp_chunk = min(d_hidden, 1024)
    if vmem_limit_bytes is None:
        vmem_limit_bytes = 48 * 1024 * 1024
    w_itemsize = wqkv_t.dtype.itemsize
    if block_bt is None:
        block_bt = _pick_block_bt(BT, L, D, n_head, w_itemsize, mlp_chunk, d_hidden,
                                  vmem_limit_bytes)
    assert BT % block_bt == 0
    grid = (BT // block_bt,)

    # Whole-array VMEM operands: loaded once for the whole grid, single-buffered
    # (no 2x double-buffer copy of the weights).
    vmem_full = pl.BlockSpec(memory_space=pltpu.MemorySpace.VMEM)

    kernel = functools.partial(_block_kernel, n_head=n_head, mlp_chunk=mlp_chunk)

    param_bytes = int(sum(w.size * w.dtype.itemsize for w in weight_args)
                      + attn_mask.size * attn_mask.dtype.itemsize)
    cost = pl.CostEstimate(
        flops=int(24 * BT * L * D * D + 4 * BT * L * L * D),
        transcendentals=int(BT * n_head * L * L + 4 * BT * L * D),
        bytes_accessed=int(2 * BT * L * D * x_lbd.dtype.itemsize + param_bytes),
    )

    out = pl.pallas_call(
        kernel,
        out_shape=jax.ShapeDtypeStruct((L, BT, D), x_lbd.dtype),
        grid_spec=pltpu.PrefetchScalarGridSpec(
            num_scalar_prefetch=0,
            grid=grid,
            in_specs=[
                # x: (L, block_bt, D) slab — layout folded into the BlockSpec (no host transpose)
                pl.BlockSpec((L, block_bt, D), lambda i: (0, i, 0)),
                vmem_full,                       # attn_mask (L, L)
                vmem_full, vmem_full,            # ln_1 gamma / beta
                vmem_full, vmem_full,            # in_proj weight^T (D, 3D), bias (1, 3D)
                vmem_full, vmem_full,            # out_proj weight^T (D, D), bias (1, D)
                vmem_full, vmem_full,            # ln_2 gamma / beta
                vmem_full, vmem_full,            # c_fc weight^T (D, 4D), bias (1, 4D)
                vmem_full, vmem_full,            # c_proj weight^T (4D, D), bias (1, D)
            ],
            out_specs=pl.BlockSpec((L, block_bt, D), lambda i: (0, i, 0)),
        ),
        compiler_params=pltpu.CompilerParams(
            dimension_semantics=("parallel",),
            vmem_limit_bytes=int(vmem_limit_bytes),
        ),
        cost_estimate=cost,
    )(x_lbd, attn_mask, *weight_args)
    return out


def _init_params(key, d_model):
    ks = jax.random.split(key, 8)
    std = 0.02
    D = d_model
    ln1_g = jnp.ones((1, D), jnp.float32)
    ln1_b = jnp.zeros((1, D), jnp.float32)
    # Projection weights stored pre-transposed: (in_features, out_features).
    wqkv_t = jax.random.normal(ks[0], (D, 3 * D), jnp.float32) * std
    bqkv = jax.random.normal(ks[1], (1, 3 * D), jnp.float32) * std
    wo_t = jax.random.normal(ks[2], (D, D), jnp.float32) * std
    bo = jax.random.normal(ks[3], (1, D), jnp.float32) * std
    ln2_g = jnp.ones((1, D), jnp.float32)
    ln2_b = jnp.zeros((1, D), jnp.float32)
    wfc_t = jax.random.normal(ks[4], (D, 4 * D), jnp.float32) * std
    bfc = jax.random.normal(ks[5], (1, 4 * D), jnp.float32) * std
    wpr_t = jax.random.normal(ks[6], (4 * D, D), jnp.float32) * std
    bpr = jax.random.normal(ks[7], (1, D), jnp.float32) * std
    return (ln1_g, ln1_b, wqkv_t, bqkv, wo_t, bo, ln2_g, ln2_b, wfc_t, bfc, wpr_t, bpr)


def _reference(x_lbd, attn_mask, params, n_head):
    """Pure-JAX reference with identical semantics (for verification)."""
    (ln1_g, ln1_b, wqkv_t, bqkv, wo_t, bo, ln2_g, ln2_b, wfc_t, bfc, wpr_t, bpr) = params
    L, BT, D = x_lbd.shape
    hd = D // n_head

    def ln(x, g, b, eps=1e-5):
        mu = jnp.mean(x, -1, keepdims=True)
        var = jnp.mean((x - mu) ** 2, -1, keepdims=True)
        return (x - mu) / jnp.sqrt(var + eps) * g + b

    x = jnp.transpose(x_lbd, (1, 0, 2))               # (BT, L, D)
    xn = ln(x, ln1_g, ln1_b)
    qkv = xn @ wqkv_t + bqkv
    q, k, v = qkv[..., :D], qkv[..., D:2 * D], qkv[..., 2 * D:]

    def split(a):
        return a.reshape(BT, L, n_head, hd).transpose(0, 2, 1, 3)

    q, k, v = split(q), split(k), split(v)
    s = jnp.einsum('bhqd,bhkd->bhqk', q, k) / jnp.sqrt(hd) + attn_mask
    p = jax.nn.softmax(s, axis=-1)
    o = jnp.einsum('bhqk,bhkd->bhqd', p, v).transpose(0, 2, 1, 3).reshape(BT, L, D)
    x = x + (o @ wo_t + bo)
    xn2 = ln(x, ln2_g, ln2_b)
    h = xn2 @ wfc_t + bfc
    h = h * jax.nn.sigmoid(1.702 * h)
    x = x + (h @ wpr_t + bpr)
    return jnp.transpose(x, (1, 0, 2))


if __name__ == "__main__":
    # Small shapes consistent with forward(): x is (L, B*T, d_model), seq-first.
    d_model, n_head, T, B, L = 32, 4, 8, 2, 8
    BT = B * T                                   # 16 -> block_bt=16, grid=(1,)

    key = jax.random.PRNGKey(0)
    kx, km, kp = jax.random.split(key, 3)
    x = jax.random.normal(kx, (L, BT, d_model), jnp.float32)
    attn_mask = jax.random.normal(km, (L, L), jnp.float32) * 0.5   # additive attn_mask
    params = _init_params(kp, d_model)

    out = times_attention_block(x, attn_mask, params, n_head)
    out = jax.block_until_ready(out)
    assert out.shape == (L, BT, d_model)

    ref = _reference(x, attn_mask, params, n_head)
    max_err = float(jnp.max(jnp.abs(out - ref)))
    assert jnp.allclose(out, ref, atol=2e-2, rtol=2e-2), max_err
    print("KERNEL_OK")
</pallas_src>

<mosaic_0001>
module attributes {stable_mosaic.version = 11 : i64} {
  func.func @_block_kernel(%arg0: i32, %arg1: memref<8x16x32xf32, #tpu.memory_space<vmem>>, %arg2: memref<8x8xf32, #tpu.memory_space<vmem>>, %arg3: memref<1x32xf32, #tpu.memory_space<vmem>>, %arg4: memref<1x32xf32, #tpu.memory_space<vmem>>, %arg5: memref<32x96xf32, #tpu.memory_space<vmem>>, %arg6: memref<1x96xf32, #tpu.memory_space<vmem>>, %arg7: memref<32x32xf32, #tpu.memory_space<vmem>>, %arg8: memref<1x32xf32, #tpu.memory_space<vmem>>, %arg9: memref<1x32xf32, #tpu.memory_space<vmem>>, %arg10: memref<1x32xf32, #tpu.memory_space<vmem>>, %arg11: memref<32x128xf32, #tpu.memory_space<vmem>>, %arg12: memref<1x128xf32, #tpu.memory_space<vmem>>, %arg13: memref<128x32xf32, #tpu.memory_space<vmem>>, %arg14: memref<1x32xf32, #tpu.memory_space<vmem>>, %arg15: memref<8x16x32xf32, #tpu.memory_space<vmem>>) attributes {dimension_semantics = [#tpu.dimension_semantics<parallel>], iteration_bounds = array<i64: 1>, scalar_prefetch = 0 : i64, scratch_operands = 0 : i64, tpu.core_type = #tpu.core_type<tc>, window_params = [{transform_indices = @transform_0, window_bounds = array<i64: 8, 16, 32>}, {pipeline_mode = #tpu.pipeline_mode<synchronous>, transform_indices = @transform_1, window_bounds = array<i64: 8, 8>}, {pipeline_mode = #tpu.pipeline_mode<synchronous>, transform_indices = @transform_2, window_bounds = array<i64: 1, 32>}, {pipeline_mode = #tpu.pipeline_mode<synchronous>, transform_indices = @transform_3, window_bounds = array<i64: 1, 32>}, {pipeline_mode = #tpu.pipeline_mode<synchronous>, transform_indices = @transform_4, window_bounds = array<i64: 32, 96>}, {pipeline_mode = #tpu.pipeline_mode<synchronous>, transform_indices = @transform_5, window_bounds = array<i64: 1, 96>}, {pipeline_mode = #tpu.pipeline_mode<synchronous>, transform_indices = @transform_6, window_bounds = array<i64: 32, 32>}, {pipeline_mode = #tpu.pipeline_mode<synchronous>, transform_indices = @transform_7, window_bounds = array<i64: 1, 32>}, {pipeline_mode = #tpu.pipeline_mode<synchronous>, transform_indices = @transform_8, window_bounds = array<i64: 1, 32>}, {pipeline_mode = #tpu.pipeline_mode<synchronous>, transform_indices = @transform_9, window_bounds = array<i64: 1, 32>}, {pipeline_mode = #tpu.pipeline_mode<synchronous>, transform_indices = @transform_10, window_bounds = array<i64: 32, 128>}, {pipeline_mode = #tpu.pipeline_mode<synchronous>, transform_indices = @transform_11, window_bounds = array<i64: 1, 128>}, {pipeline_mode = #tpu.pipeline_mode<synchronous>, transform_indices = @transform_12, window_bounds = array<i64: 128, 32>}, {pipeline_mode = #tpu.pipeline_mode<synchronous>, transform_indices = @transform_13, window_bounds = array<i64: 1, 32>}, {transform_indices = @transform_14, window_bounds = array<i64: 8, 16, 32>}]} {
    %c0 = arith.constant 0 : index
    %c0_0 = arith.constant 0 : index
    %c0_1 = arith.constant 0 : index
    %0 = vector.load %arg1[%c0, %c0_0, %c0_1] : memref<8x16x32xf32, #tpu.memory_space<vmem>>, vector<8x16x32xf32>
    %1 = tpu.transpose %0, [1, 0, 2] : vector<8x16x32xf32> -> vector<16x8x32xf32>
    %2 = vector.shape_cast %1 : vector<16x8x32xf32> to vector<128x32xf32>
    %c0_2 = arith.constant 0 : index
    %c0_3 = arith.constant 0 : index
    %3 = vector.load %arg3[%c0_2, %c0_3] : memref<1x32xf32, #tpu.memory_space<vmem>>, vector<1x32xf32>
    %c0_4 = arith.constant 0 : index
    %c0_5 = arith.constant 0 : index
    %4 = vector.load %arg4[%c0_4, %c0_5] : memref<1x32xf32, #tpu.memory_space<vmem>>, vector<1x32xf32>
    %cst = arith.constant dense<0.000000e+00> : vector<128xf32>
    %5 = vector.multi_reduction <add>, %2, %cst [1] : vector<128x32xf32> to vector<128xf32>
    %6 = vector.shape_cast %5 : vector<128xf32> to vector<128x1xf32>
    %cst_6 = arith.constant 3.200000e+01 : f32
    %7 = vector.broadcast %cst_6 : f32 to vector<128x1xf32>
    %8 = arith.divf %6, %7 : vector<128x1xf32>
    %9 = vector.broadcast %8 : vector<128x1xf32> to vector<128x32xf32>
    %10 = arith.subf %2, %9 : vector<128x32xf32>
    %11 = arith.mulf %10, %10 : vector<128x32xf32>
    %cst_7 = arith.constant dense<0.000000e+00> : vector<128xf32>
    %12 = vector.multi_reduction <add>, %11, %cst_7 [1] : vector<128x32xf32> to vector<128xf32>
    %13 = vector.shape_cast %12 : vector<128xf32> to vector<128x1xf32>
    %cst_8 = arith.constant 3.200000e+01 : f32
    %14 = vector.broadcast %cst_8 : f32 to vector<128x1xf32>
    %15 = arith.divf %13, %14 : vector<128x1xf32>
    %16 = vector.broadcast %8 : vector<128x1xf32> to vector<128x32xf32>
    %17 = arith.subf %2, %16 : vector<128x32xf32>
    %cst_9 = arith.constant 9.99999974E-6 : f32
    %18 = vector.broadcast %cst_9 : f32 to vector<128x1xf32>
    %19 = arith.addf %15, %18 : vector<128x1xf32>
    %20 = math.rsqrt %19 : vector<128x1xf32>
    %21 = vector.broadcast %20 : vector<128x1xf32> to vector<128x32xf32>
    %22 = arith.mulf %17, %21 : vector<128x32xf32>
    %23 = vector.broadcast %3 : vector<1x32xf32> to vector<128x32xf32>
    %24 = arith.mulf %22, %23 : vector<128x32xf32>
    %25 = vector.broadcast %4 : vector<1x32xf32> to vector<128x32xf32>
    %26 = arith.addf %24, %25 : vector<128x32xf32>
    %c0_10 = arith.constant 0 : index
    %c0_11 = arith.constant 0 : index
    %27 = vector.load %arg5[%c0_10, %c0_11] : memref<32x96xf32, #tpu.memory_space<vmem>>, vector<32x96xf32>
    %cst_12 = arith.constant dense<0.000000e+00> : vector<128x96xf32>
    %28 = tpu.matmul %26, %27, %cst_12 {dimension_numbers = #tpu.dot_dimension_numbers<[1], [0], [0], [1], [0, 0, 1, 1], [], []>} : vector<128x32xf32>, vector<32x96xf32>, vector<128x96xf32> -> vector<128x96xf32>
    %c0_13 = arith.constant 0 : index
    %c0_14 = arith.constant 0 : index
    %29 = vector.load %arg6[%c0_13, %c0_14] : memref<1x96xf32, #tpu.memory_space<vmem>>, vector<1x96xf32>
    %30 = vector.broadcast %29 : vector<1x96xf32> to vector<128x96xf32>
    %31 = arith.addf %28, %30 : vector<128x96xf32>
    %32 = vector.extract_strided_slice %31 {offsets = [0, 0], sizes = [128, 32], strides = [1, 1]} : vector<128x96xf32> to vector<128x32xf32>
    %cst_15 = arith.constant 0.353553385 : f32
    %33 = vector.broadcast %cst_15 : f32 to vector<128x32xf32>
    %34 = arith.mulf %32, %33 : vector<128x32xf32>
    %35 = vector.extract_strided_slice %31 {offsets = [0, 32], sizes = [128, 32], strides = [1, 1]} : vector<128x96xf32> to vector<128x32xf32>
    %36 = vector.extract_strided_slice %31 {offsets = [0, 64], sizes = [128, 32], strides = [1, 1]} : vector<128x96xf32> to vector<128x32xf32>
    %c0_16 = arith.constant 0 : index
    %c0_17 = arith.constant 0 : index
    %37 = vector.load %arg2[%c0_16, %c0_17] : memref<8x8xf32, #tpu.memory_space<vmem>>, vector<8x8xf32>
    %38 = vector.extract_strided_slice %34 {offsets = [0, 0], sizes = [128, 8], strides = [1, 1]} : vector<128x32xf32> to vector<128x8xf32>
    %39 = vector.shape_cast %38 : vector<128x8xf32> to vector<16x8x8xf32>
    %40 = vector.extract_strided_slice %35 {offsets = [0, 0], sizes = [128, 8], strides = [1, 1]} : vector<128x32xf32> to vector<128x8xf32>
    %41 = vector.shape_cast %40 : vector<128x8xf32> to vector<16x8x8xf32>
    %42 = vector.extract_strided_slice %36 {offsets = [0, 0], sizes = [128, 8], strides = [1, 1]} : vector<128x32xf32> to vector<128x8xf32>
    %43 = vector.shape_cast %42 : vector<128x8xf32> to vector<16x8x8xf32>
    "tpu.trace_start"() <{level = 10 : i32, message = "bqd,bkd->bqk"}> : () -> ()
    %cst_18 = arith.constant dense<0.000000e+00> : vector<16x8x8xf32>
    %44 = tpu.matmul %39, %41, %cst_18 {dimension_numbers = #tpu.dot_dimension_numbers<[2], [2], [1], [1], [0, 0, 0, 1, 1, 1], [0], [0]>} : vector<16x8x8xf32>, vector<16x8x8xf32>, vector<16x8x8xf32> -> vector<16x8x8xf32>
    "tpu.trace_stop"() : () -> ()
    %45 = vector.shape_cast %37 : vector<8x8xf32> to vector<1x8x8xf32>
    %46 = vector.broadcast %45 : vector<1x8x8xf32> to vector<16x8x8xf32>
    %47 = arith.addf %44, %46 : vector<16x8x8xf32>
    %cst_19 = arith.constant dense<0xFF800000> : vector<16x8xf32>
    %48 = vector.multi_reduction <maximumf>, %47, %cst_19 [2] : vector<16x8x8xf32> to vector<16x8xf32>
    %49 = vector.shape_cast %48 : vector<16x8xf32> to vector<16x8x1xf32>
    %50 = vector.broadcast %49 : vector<16x8x1xf32> to vector<16x8x8xf32>
    %51 = arith.subf %47, %50 : vector<16x8x8xf32>
    %52 = math.exp %51 : vector<16x8x8xf32>
    %cst_20 = arith.constant dense<0.000000e+00> : vector<16x8xf32>
    %53 = vector.multi_reduction <add>, %52, %cst_20 [2] : vector<16x8x8xf32> to vector<16x8xf32>
    %54 = vector.shape_cast %53 : vector<16x8xf32> to vector<16x8x1xf32>
    %55 = tpu.reciprocal %54 {approx = true} : vector<16x8x1xf32> -> vector<16x8x1xf32>
    %56 = vector.broadcast %55 : vector<16x8x1xf32> to vector<16x8x8xf32>
    %57 = arith.mulf %52, %56 : vector<16x8x8xf32>
    "tpu.trace_start"() <{level = 10 : i32, message = "bqk,bkd->bqd"}> : () -> ()
    %cst_21 = arith.constant dense<0.000000e+00> : vector<16x8x8xf32>
    %58 = tpu.matmul %57, %43, %cst_21 {dimension_numbers = #tpu.dot_dimension_numbers<[2], [1], [1], [2], [0, 0, 0, 1, 1, 2], [0], [0]>} : vector<16x8x8xf32>, vector<16x8x8xf32>, vector<16x8x8xf32> -> vector<16x8x8xf32>
    "tpu.trace_stop"() : () -> ()
    %59 = vector.extract_strided_slice %34 {offsets = [0, 8], sizes = [128, 8], strides = [1, 1]} : vector<128x32xf32> to vector<128x8xf32>
    %60 = vector.shape_cast %59 : vector<128x8xf32> to vector<16x8x8xf32>
    %61 = vector.extract_strided_slice %35 {offsets = [0, 8], sizes = [128, 8], strides = [1, 1]} : vector<128x32xf32> to vector<128x8xf32>
    %62 = vector.shape_cast %61 : vector<128x8xf32> to vector<16x8x8xf32>
    %63 = vector.extract_strided_slice %36 {offsets = [0, 8], sizes = [128, 8], strides = [1, 1]} : vector<128x32xf32> to vector<128x8xf32>
    %64 = vector.shape_cast %63 : vector<128x8xf32> to vector<16x8x8xf32>
    "tpu.trace_start"() <{level = 10 : i32, message = "bqd,bkd->bqk"}> : () -> ()
    %cst_22 = arith.constant dense<0.000000e+00> : vector<16x8x8xf32>
    %65 = tpu.matmul %60, %62, %cst_22 {dimension_numbers = #tpu.dot_dimension_numbers<[2], [2], [1], [1], [0, 0, 0, 1, 1, 1], [0], [0]>} : vector<16x8x8xf32>, vector<16x8x8xf32>, vector<16x8x8xf32> -> vector<16x8x8xf32>
    "tpu.trace_stop"() : () -> ()
    %66 = vector.shape_cast %37 : vector<8x8xf32> to vector<1x8x8xf32>
    %67 = vector.broadcast %66 : vector<1x8x8xf32> to vector<16x8x8xf32>
    %68 = arith.addf %65, %67 : vector<16x8x8xf32>
    %cst_23 = arith.constant dense<0xFF800000> : vector<16x8xf32>
    %69 = vector.multi_reduction <maximumf>, %68, %cst_23 [2] : vector<16x8x8xf32> to vector<16x8xf32>
    %70 = vector.shape_cast %69 : vector<16x8xf32> to vector<16x8x1xf32>
    %71 = vector.broadcast %70 : vector<16x8x1xf32> to vector<16x8x8xf32>
    %72 = arith.subf %68, %71 : vector<16x8x8xf32>
    %73 = math.exp %72 : vector<16x8x8xf32>
    %cst_24 = arith.constant dense<0.000000e+00> : vector<16x8xf32>
    %74 = vector.multi_reduction <add>, %73, %cst_24 [2] : vector<16x8x8xf32> to vector<16x8xf32>
    %75 = vector.shape_cast %74 : vector<16x8xf32> to vector<16x8x1xf32>
    %76 = tpu.reciprocal %75 {approx = true} : vector<16x8x1xf32> -> vector<16x8x1xf32>
    %77 = vector.broadcast %76 : vector<16x8x1xf32> to vector<16x8x8xf32>
    %78 = arith.mulf %73, %77 : vector<16x8x8xf32>
    "tpu.trace_start"() <{level = 10 : i32, message = "bqk,bkd->bqd"}> : () -> ()
    %cst_25 = arith.constant dense<0.000000e+00> : vector<16x8x8xf32>
    %79 = tpu.matmul %78, %64, %cst_25 {dimension_numbers = #tpu.dot_dimension_numbers<[2], [1], [1], [2], [0, 0, 0, 1, 1, 2], [0], [0]>} : vector<16x8x8xf32>, vector<16x8x8xf32>, vector<16x8x8xf32> -> vector<16x8x8xf32>
    "tpu.trace_stop"() : () -> ()
    %80 = vector.extract_strided_slice %34 {offsets = [0, 16], sizes = [128, 8], strides = [1, 1]} : vector<128x32xf32> to vector<128x8xf32>
    %81 = vector.shape_cast %80 : vector<128x8xf32> to vector<16x8x8xf32>
    %82 = vector.extract_strided_slice %35 {offsets = [0, 16], sizes = [128, 8], strides = [1, 1]} : vector<128x32xf32> to vector<128x8xf32>
    %83 = vector.shape_cast %82 : vector<128x8xf32> to vector<16x8x8xf32>
    %84 = vector.extract_strided_slice %36 {offsets = [0, 16], sizes = [128, 8], strides = [1, 1]} : vector<128x32xf32> to vector<128x8xf32>
    %85 = vector.shape_cast %84 : vector<128x8xf32> to vector<16x8x8xf32>
    "tpu.trace_start"() <{level = 10 : i32, message = "bqd,bkd->bqk"}> : () -> ()
    %cst_26 = arith.constant dense<0.000000e+00> : vector<16x8x8xf32>
    %86 = tpu.matmul %81, %83, %cst_26 {dimension_numbers = #tpu.dot_dimension_numbers<[2], [2], [1], [1], [0, 0, 0, 1, 1, 1], [0], [0]>} : vector<16x8x8xf32>, vector<16x8x8xf32>, vector<16x8x8xf32> -> vector<16x8x8xf32>
    "tpu.trace_stop"() : () -> ()
    %87 = vector.shape_cast %37 : vector<8x8xf32> to vector<1x8x8xf32>
    %88 = vector.broadcast %87 : vector<1x8x8xf32> to vector<16x8x8xf32>
    %89 = arith.addf %86, %88 : vector<16x8x8xf32>
    %cst_27 = arith.constant dense<0xFF800000> : vector<16x8xf32>
    %90 = vector.multi_reduction <maximumf>, %89, %cst_27 [2] : vector<16x8x8xf32> to vector<16x8xf32>
    %91 = vector.shape_cast %90 : vector<16x8xf32> to vector<16x8x1xf32>
    %92 = vector.broadcast %91 : vector<16x8x1xf32> to vector<16x8x8xf32>
    %93 = arith.subf %89, %92 : vector<16x8x8xf32>
    %94 = math.exp %93 : vector<16x8x8xf32>
    %cst_28 = arith.constant dense<0.000000e+00> : vector<16x8xf32>
    %95 = vector.multi_reduction <add>, %94, %cst_28 [2] : vector<16x8x8xf32> to vector<16x8xf32>
    %96 = vector.shape_cast %95 : vector<16x8xf32> to vector<16x8x1xf32>
    %97 = tpu.reciprocal %96 {approx = true} : vector<16x8x1xf32> -> vector<16x8x1xf32>
    %98 = vector.broadcast %97 : vector<16x8x1xf32> to vector<16x8x8xf32>
    %99 = arith.mulf %94, %98 : vector<16x8x8xf32>
    "tpu.trace_start"() <{level = 10 : i32, message = "bqk,bkd->bqd"}> : () -> ()
    %cst_29 = arith.constant dense<0.000000e+00> : vector<16x8x8xf32>
    %100 = tpu.matmul %99, %85, %cst_29 {dimension_numbers = #tpu.dot_dimension_numbers<[2], [1], [1], [2], [0, 0, 0, 1, 1, 2], [0], [0]>} : vector<16x8x8xf32>, vector<16x8x8xf32>, vector<16x8x8xf32> -> vector<16x8x8xf32>
    "tpu.trace_stop"() : () -> ()
    %101 = vector.extract_strided_slice %34 {offsets = [0, 24], sizes = [128, 8], strides = [1, 1]} : vector<128x32xf32> to vector<128x8xf32>
    %102 = vector.shape_cast %101 : vector<128x8xf32> to vector<16x8x8xf32>
    %103 = vector.extract_strided_slice %35 {offsets = [0, 24], sizes = [128, 8], strides = [1, 1]} : vector<128x32xf32> to vector<128x8xf32>
    %104 = vector.shape_cast %103 : vector<128x8xf32> to vector<16x8x8xf32>
    %105 = vector.extract_strided_slice %36 {offsets = [0, 24], sizes = [128, 8], strides = [1, 1]} : vector<128x32xf32> to vector<128x8xf32>
    %106 = vector.shape_cast %105 : vector<128x8xf32> to vector<16x8x8xf32>
    "tpu.trace_start"() <{level = 10 : i32, message = "bqd,bkd->bqk"}> : () -> ()
    %cst_30 = arith.constant dense<0.000000e+00> : vector<16x8x8xf32>
    %107 = tpu.matmul %102, %104, %cst_30 {dimension_numbers = #tpu.dot_dimension_numbers<[2], [2], [1], [1], [0, 0, 0, 1, 1, 1], [0], [0]>} : vector<16x8x8xf32>, vector<16x8x8xf32>, vector<16x8x8xf32> -> vector<16x8x8xf32>
    "tpu.trace_stop"() : () -> ()
    %108 = vector.shape_cast %37 : vector<8x8xf32> to vector<1x8x8xf32>
    %109 = vector.broadcast %108 : vector<1x8x8xf32> to vector<16x8x8xf32>
    %110 = arith.addf %107, %109 : vector<16x8x8xf32>
    %cst_31 = arith.constant dense<0xFF800000> : vector<16x8xf32>
    %111 = vector.multi_reduction <maximumf>, %110, %cst_31 [2] : vector<16x8x8xf32> to vector<16x8xf32>
    %112 = vector.shape_cast %111 : vector<16x8xf32> to vector<16x8x1xf32>
    %113 = vector.broadcast %112 : vector<16x8x1xf32> to vector<16x8x8xf32>
    %114 = arith.subf %110, %113 : vector<16x8x8xf32>
    %115 = math.exp %114 : vector<16x8x8xf32>
    %cst_32 = arith.constant dense<0.000000e+00> : vector<16x8xf32>
    %116 = vector.multi_reduction <add>, %115, %cst_32 [2] : vector<16x8x8xf32> to vector<16x8xf32>
    %117 = vector.shape_cast %116 : vector<16x8xf32> to vector<16x8x1xf32>
    %118 = tpu.reciprocal %117 {approx = true} : vector<16x8x1xf32> -> vector<16x8x1xf32>
    %119 = vector.broadcast %118 : vector<16x8x1xf32> to vector<16x8x8xf32>
    %120 = arith.mulf %115, %119 : vector<16x8x8xf32>
    "tpu.trace_start"() <{level = 10 : i32, message = "bqk,bkd->bqd"}> : () -> ()
    %cst_33 = arith.constant dense<0.000000e+00> : vector<16x8x8xf32>
    %121 = tpu.matmul %120, %106, %cst_33 {dimension_numbers = #tpu.dot_dimension_numbers<[2], [1], [1], [2], [0, 0, 0, 1, 1, 2], [0], [0]>} : vector<16x8x8xf32>, vector<16x8x8xf32>, vector<16x8x8xf32> -> vector<16x8x8xf32>
    "tpu.trace_stop"() : () -> ()
    %122 = tpu.concatenate %58, %79, %100, %121 in 2 : vector<16x8x8xf32>, vector<16x8x8xf32>, vector<16x8x8xf32>, vector<16x8x8xf32> -> vector<16x8x32xf32>
    %123 = vector.shape_cast %122 : vector<16x8x32xf32> to vector<128x32xf32>
    %c0_34 = arith.constant 0 : index
    %c0_35 = arith.constant 0 : index
    %124 = vector.load %arg7[%c0_34, %c0_35] : memref<32x32xf32, #tpu.memory_space<vmem>>, vector<32x32xf32>
    %cst_36 = arith.constant dense<0.000000e+00> : vector<128x32xf32>
    %125 = tpu.matmul %123, %124, %cst_36 {dimension_numbers = #tpu.dot_dimension_numbers<[1], [0], [0], [1], [0, 0, 1, 1], [], []>} : vector<128x32xf32>, vector<32x32xf32>, vector<128x32xf32> -> vector<128x32xf32>
    %c0_37 = arith.constant 0 : index
    %c0_38 = arith.constant 0 : index
    %126 = vector.load %arg8[%c0_37, %c0_38] : memref<1x32xf32, #tpu.memory_space<vmem>>, vector<1x32xf32>
    %127 = vector.broadcast %126 : vector<1x32xf32> to vector<128x32xf32>
    %128 = arith.addf %125, %127 : vector<128x32xf32>
    %129 = arith.addf %2, %128 : vector<128x32xf32>
    %c0_39 = arith.constant 0 : index
    %c0_40 = arith.constant 0 : index
    %130 = vector.load %arg9[%c0_39, %c0_40] : memref<1x32xf32, #tpu.memory_space<vmem>>, vector<1x32xf32>
    %c0_41 = arith.constant 0 : index
    %c0_42 = arith.constant 0 : index
    %131 = vector.load %arg10[%c0_41, %c0_42] : memref<1x32xf32, #tpu.memory_space<vmem>>, vector<1x32xf32>
    %cst_43 = arith.constant dense<0.000000e+00> : vector<128xf32>
    %132 = vector.multi_reduction <add>, %129, %cst_43 [1] : vector<128x32xf32> to vector<128xf32>
    %133 = vector.shape_cast %132 : vector<128xf32> to vector<128x1xf32>
    %cst_44 = arith.constant 3.200000e+01 : f32
    %134 = vector.broadcast %cst_44 : f32 to vector<128x1xf32>
    %135 = arith.divf %133, %134 : vector<128x1xf32>
    %136 = vector.broadcast %135 : vector<128x1xf32> to vector<128x32xf32>
    %137 = arith.subf %129, %136 : vector<128x32xf32>
    %138 = arith.mulf %137, %137 : vector<128x32xf32>
    %cst_45 = arith.constant dense<0.000000e+00> : vector<128xf32>
    %139 = vector.multi_reduction <add>, %138, %cst_45 [1] : vector<128x32xf32> to vector<128xf32>
    %140 = vector.shape_cast %139 : vector<128xf32> to vector<128x1xf32>
    %cst_46 = arith.constant 3.200000e+01 : f32
    %141 = vector.broadcast %cst_46 : f32 to vector<128x1xf32>
    %142 = arith.divf %140, %141 : vector<128x1xf32>
    %143 = vector.broadcast %135 : vector<128x1xf32> to vector<128x32xf32>
    %144 = arith.subf %129, %143 : vector<128x32xf32>
    %cst_47 = arith.constant 9.99999974E-6 : f32
    %145 = vector.broadcast %cst_47 : f32 to vector<128x1xf32>
    %146 = arith.addf %142, %145 : vector<128x1xf32>
    %147 = math.rsqrt %146 : vector<128x1xf32>
    %148 = vector.broadcast %147 : vector<128x1xf32> to vector<128x32xf32>
    %149 = arith.mulf %144, %148 : vector<128x32xf32>
    %150 = vector.broadcast %130 : vector<1x32xf32> to vector<128x32xf32>
    %151 = arith.mulf %149, %150 : vector<128x32xf32>
    %152 = vector.broadcast %131 : vector<1x32xf32> to vector<128x32xf32>
    %153 = arith.addf %151, %152 : vector<128x32xf32>
    %c0_48 = arith.constant 0 : index
    %c0_49 = arith.constant 0 : index
    %154 = vector.load %arg14[%c0_48, %c0_49] : memref<1x32xf32, #tpu.memory_space<vmem>>, vector<1x32xf32>
    %155 = vector.broadcast %154 : vector<1x32xf32> to vector<128x32xf32>
    %156 = arith.addf %129, %155 : vector<128x32xf32>
    %c0_50 = arith.constant 0 : index
    %c0_51 = arith.constant 0 : index
    %157 = vector.load %arg11[%c0_50, %c0_51] : memref<32x128xf32, #tpu.memory_space<vmem>>, vector<32x128xf32>
    %cst_52 = arith.constant dense<0.000000e+00> : vector<128x128xf32>
    %158 = tpu.matmul %153, %157, %cst_52 {dimension_numbers = #tpu.dot_dimension_numbers<[1], [0], [0], [1], [0, 0, 1, 1], [], []>} : vector<128x32xf32>, vector<32x128xf32>, vector<128x128xf32> -> vector<128x128xf32>
    %c0_53 = arith.constant 0 : index
    %c0_54 = arith.constant 0 : index
    %159 = vector.load %arg12[%c0_53, %c0_54] : memref<1x128xf32, #tpu.memory_space<vmem>>, vector<1x128xf32>
    %160 = vector.broadcast %159 : vector<1x128xf32> to vector<128x128xf32>
    %161 = arith.addf %158, %160 : vector<128x128xf32>
    %cst_55 = arith.constant 1.702000e+00 : f32
    %162 = vector.broadcast %cst_55 : f32 to vector<128x128xf32>
    %163 = arith.mulf %162, %161 : vector<128x128xf32>
    %164 = arith.negf %163 : vector<128x128xf32>
    %165 = math.exp %164 : vector<128x128xf32>
    %cst_56 = arith.constant 1.000000e+00 : f32
    %166 = vector.broadcast %cst_56 : f32 to vector<128x128xf32>
    %167 = arith.addf %166, %165 : vector<128x128xf32>
    %168 = arith.divf %166, %167 : vector<128x128xf32>
    %169 = arith.mulf %161, %168 : vector<128x128xf32>
    %c0_57 = arith.constant 0 : index
    %c0_58 = arith.constant 0 : index
    %170 = vector.load %arg13[%c0_57, %c0_58] : memref<128x32xf32, #tpu.memory_space<vmem>>, vector<128x32xf32>
    %cst_59 = arith.constant dense<0.000000e+00> : vector<128x32xf32>
    %171 = tpu.matmul %169, %170, %cst_59 {dimension_numbers = #tpu.dot_dimension_numbers<[1], [0], [0], [1], [0, 0, 1, 1], [], []>} : vector<128x128xf32>, vector<128x32xf32>, vector<128x32xf32> -> vector<128x32xf32>
    %172 = arith.addf %156, %171 : vector<128x32xf32>
    %173 = vector.shape_cast %172 : vector<128x32xf32> to vector<16x8x32xf32>
    %174 = tpu.transpose %173, [1, 0, 2] : vector<16x8x32xf32> -> vector<8x16x32xf32>
    %c0_60 = arith.constant 0 : index
    %c0_61 = arith.constant 0 : index
    %c0_62 = arith.constant 0 : index
    %175 = vector.load %arg15[%c0_60, %c0_61, %c0_62] : memref<8x16x32xf32, #tpu.memory_space<vmem>>, vector<8x16x32xf32>
    tpu.vector_store %arg15[%c0_60, %c0_61, %c0_62], %174 {strides = array<i32>} : memref<8x16x32xf32, #tpu.memory_space<vmem>>, vector<8x16x32xf32>,
    return
  }
  func.func @transform_0(%arg0: i32) -> (i32, i32, i32) {
    %c0_i32 = arith.constant 0 : i32
    %c0_i32_0 = arith.constant 0 : i32
    %c0_i32_1 = arith.constant 0 : i32
    return %c0_i32, %arg0, %c0_i32_0 : i32, i32, i32
  }
  func.func @transform_1(%arg0: i32) -> (i32, i32) {
    %c0_i32 = arith.constant 0 : i32
    %c0_i32_0 = arith.constant 0 : i32
    %c0_i32_1 = arith.constant 0 : i32
    return %c0_i32, %c0_i32_0 : i32, i32
  }
  func.func @transform_2(%arg0: i32) -> (i32, i32) {
    %c0_i32 = arith.constant 0 : i32
    %c0_i32_0 = arith.constant 0 : i32
    %c0_i32_1 = arith.constant 0 : i32
    return %c0_i32, %c0_i32_0 : i32, i32
  }
  func.func @transform_3(%arg0: i32) -> (i32, i32) {
    %c0_i32 = arith.constant 0 : i32
    %c0_i32_0 = arith.constant 0 : i32
    %c0_i32_1 = arith.constant 0 : i32
    return %c0_i32, %c0_i32_0 : i32, i32
  }
  func.func @transform_4(%arg0: i32) -> (i32, i32) {
    %c0_i32 = arith.constant 0 : i32
    %c0_i32_0 = arith.constant 0 : i32
    %c0_i32_1 = arith.constant 0 : i32
    return %c0_i32, %c0_i32_0 : i32, i32
  }
  func.func @transform_5(%arg0: i32) -> (i32, i32) {
    %c0_i32 = arith.constant 0 : i32
    %c0_i32_0 = arith.constant 0 : i32
    %c0_i32_1 = arith.constant 0 : i32
    return %c0_i32, %c0_i32_0 : i32, i32
  }
  func.func @transform_6(%arg0: i32) -> (i32, i32) {
    %c0_i32 = arith.constant 0 : i32
    %c0_i32_0 = arith.constant 0 : i32
    %c0_i32_1 = arith.constant 0 : i32
    return %c0_i32, %c0_i32_0 : i32, i32
  }
  func.func @transform_7(%arg0: i32) -> (i32, i32) {
    %c0_i32 = arith.constant 0 : i32
    %c0_i32_0 = arith.constant 0 : i32
    %c0_i32_1 = arith.constant 0 : i32
    return %c0_i32, %c0_i32_0 : i32, i32
  }
  func.func @transform_8(%arg0: i32) -> (i32, i32) {
    %c0_i32 = arith.constant 0 : i32
    %c0_i32_0 = arith.constant 0 : i32
    %c0_i32_1 = arith.constant 0 : i32
    return %c0_i32, %c0_i32_0 : i32, i32
  }
  func.func @transform_9(%arg0: i32) -> (i32, i32) {
    %c0_i32 = arith.constant 0 : i32
    %c0_i32_0 = arith.constant 0 : i32
    %c0_i32_1 = arith.constant 0 : i32
    return %c0_i32, %c0_i32_0 : i32, i32
  }
  func.func @transform_10(%arg0: i32) -> (i32, i32) {
    %c0_i32 = arith.constant 0 : i32
    %c0_i32_0 = arith.constant 0 : i32
    %c0_i32_1 = arith.constant 0 : i32
    return %c0_i32, %c0_i32_0 : i32, i32
  }
  func.func @transform_11(%arg0: i32) -> (i32, i32) {
    %c0_i32 = arith.constant 0 : i32
    %c0_i32_0 = arith.constant 0 : i32
    %c0_i32_1 = arith.constant 0 : i32
    return %c0_i32, %c0_i32_0 : i32, i32
  }
  func.func @transform_12(%arg0: i32) -> (i32, i32) {
    %c0_i32 = arith.constant 0 : i32
    %c0_i32_0 = arith.constant 0 : i32
    %c0_i32_1 = arith.constant 0 : i32
    return %c0_i32, %c0_i32_0 : i32, i32
  }
  func.func @transform_13(%arg0: i32) -> (i32, i32) {
    %c0_i32 = arith.constant 0 : i32
    %c0_i32_0 = arith.constant 0 : i32
    %c0_i32_1 = arith.constant 0 : i32
    return %c0_i32, %c0_i32_0 : i32, i32
  }
  func.func @transform_14(%arg0: i32) -> (i32, i32, i32) {
    %c0_i32 = arith.constant 0 : i32
    %c0_i32_0 = arith.constant 0 : i32
    %c0_i32_1 = arith.constant 0 : i32
    return %c0_i32, %arg0, %c0_i32_0 : i32, i32, i32
  }
}

</mosaic_0001>

<bundles_post_ra>
// kernel: tpu_custom_call.1
= control target key start
LH: loop header
LB: loop body
LE: loop exit
PB: predicated region body
PF: predicated region fallthrough
CT: control target
= control target key end

     0   :  { %19 = vsyncpa [#allocation3], 0  ;;  %s18278_s0 = inlined_call_operand.vmem [shape: f32[8,16,32], index: 0, kind: input, shape index: {}]   ;;  %s18279_s1 = inlined_call_operand.hbm [shape: f32[8,8], index: 1, kind: input, shape index: {}]   ;;  %s18280_s2 = inlined_call_operand.vmem [shape: f32[1,32], index: 2, kind: input, shape index: {}]   ;;  %s18281_s3 = inlined_call_operand.vmem [shape: f32[1,32], index: 3, kind: input, shape index: {}]   ;;  %s18282_s4 = inlined_call_operand.vmem [shape: f32[32,96], index: 4, kind: input, shape index: {}]   ;;  %s18283_s5 = inlined_call_operand.vmem [shape: f32[1,96], index: 5, kind: input, shape index: {}]   ;;  %s18284_s6 = inlined_call_operand.hbm [shape: f32[32,32], index: 6, kind: input, shape index: {}]   ;;  %s18285_s7 = inlined_call_operand.vmem [shape: f32[1,32], index: 7, kind: input, shape index: {}]   ;;  %s18286_s8 = inlined_call_operand.vmem [shape: f32[1,32], index: 8, kind: input, shape index: {}]   ;;  %s18287_s9 = inlined_call_operand.vmem [shape: f32[1,32], index: 9, kind: input, shape index: {}]   ;;  %s18288_s10 = inlined_call_operand.hbm [shape: f32[32,128], index: 10, kind: input, shape index: {}]   ;;  %s18289_s11 = inlined_call_operand.vmem [shape: f32[1,128], index: 11, kind: input, shape index: {}]   ;;  %s18290_s12 = inlined_call_operand.vmem [shape: f32[128,32], index: 12, kind: input, shape index: {}]   ;;  %s18291_s13 = inlined_call_operand.vmem [shape: f32[1,32], index: 13, kind: input, shape index: {}]   ;;  %s18292_s14 = inlined_call_operand.hbm [shape: f32[8,16,32], index: 14, kind: output, shape index: {}]  }
   0x1   :  { %20 = vsyncpa [#allocation6], 0 }
   0x2   :  { %21 = vsyncpa [#allocation4], 0  ;;  %s14947_s29 = smov [#allocation5]   ;;  %s14853_s17 = scalar_lea.hbm %s18284_s6, 512 }
   0x3   :  { %s47_s30 = sshll.u32 %s14947_s29, 4  ;;  %p14854_p0 = scmp.ne.s32.totalorder %s18284_s6, %s14853_s17  ;;  %s48_s30 = int_to_ptr.vmem [resolvable:$true] %s47_s30 }
   0x4   :  { %p14857_p1 = scmp.lt.u32.totalorder %s14853_s17, %s18284_s6 }
   0x6   :  { %p14859_p2 = pnand %p14857_p1, %p14854_p0 }
   0x8   :  { %14862 = shalt.err (!%p14859_p2)
}
   0x9   :  { %s14863_s22 = scalar_lea.vmem %s48_s30, 512  ;;  %p14868_p4 = scmp.lt.s32.totalorder %s48_s30, %s48_s30 }
   0xa   :  { %p14864_p3 = scmp.ne.s32.totalorder %s48_s30, %s14863_s22  ;;  %p14869_p5 = scmp.lt.s32.totalorder %s14863_s22, %s14863_s22 }
   0xc   :  { %p14870_p6 = por %p14869_p5, %p14868_p4 }
   0xe   :  { %p14871_p7 = pnand %p14870_p6, %p14864_p3 }
  0x10   :  { %14874 = shalt.err (!%p14871_p7)
}
  0x11   :  { %s14948_s23 = smov 128   ;;  %s14949_s24 = smov 8  }
  0x12   :  { %53 = dma.hbm_to_vmem [thread:$0]  %s18284_s6, 512, %s48_s30, [#allocation6], %s14948_s23, %s14948_s23, %s14949_s24  }
  0x13   :  { %s14950_s27 = smov [#allocation2]   ;;  %s14951_s29 = smov [#allocation7]  }
  0x14   :  { %s30_s28 = sshll.u32 %s14950_s27, 4  ;;  %s65_s15 = sshll.u32 %s14951_s29, 4  ;;  %s31_s28 = int_to_ptr.vmem [resolvable:$true] %s30_s28  ;;  %s66_s15 = int_to_ptr.vmem [resolvable:$true] %s65_s15 }
  0x15   :  { %s14875_s18 = scalar_lea.hbm %s18279_s1, 128 }
  0x16   :  { %p14876_p8 = scmp.ne.s32.totalorder %s18279_s1, %s14875_s18  ;;  %p14879_p9 = scmp.lt.u32.totalorder %s14875_s18, %s18279_s1 }
  0x18   :  { %p14881_p10 = pnand %p14879_p9, %p14876_p8 }
  0x1a   :  { %14884 = shalt.err (!%p14881_p10)
}
  0x1b   :  { %s14885_s6 = scalar_lea.vmem %s31_s28, 128  ;;  %p14890_p12 = scmp.lt.s32.totalorder %s31_s28, %s31_s28 }
  0x1c   :  { %p14886_p11 = scmp.ne.s32.totalorder %s31_s28, %s14885_s6  ;;  %p14891_p13 = scmp.lt.s32.totalorder %s14885_s6, %s14885_s6 }
  0x1e   :  { %p14892_p0 = por %p14891_p13, %p14890_p12 }
  0x20   :  { %p14893_p1 = pnand %p14892_p0, %p14886_p11 }
  0x22   :  { %14896 = shalt.err (!%p14893_p1)
}
  0x23   :  { %33 = dma.hbm_to_vmem [thread:$0]  %s18279_s1, 128, %s31_s28, [#allocation3]  }
  0x24   :  { %s14897_s29 = scalar_lea.hbm %s18288_s10, 512 }
  0x25   :  { %p14898_p2 = scmp.ne.s32.totalorder %s18288_s10, %s14897_s29  ;;  %p14901_p3 = scmp.lt.u32.totalorder %s14897_s29, %s18288_s10 }
  0x27   :  { %p14903_p4 = pnand %p14901_p3, %p14898_p2 }
  0x29   :  { %14906 = shalt.err (!%p14903_p4)
}
  0x2a   :  { %s14907_s20 = scalar_lea.vmem %s66_s15, 512  ;;  %p14912_p6 = scmp.lt.s32.totalorder %s66_s15, %s66_s15 }
  0x2b   :  { %p14908_p5 = scmp.ne.s32.totalorder %s66_s15, %s14907_s20  ;;  %p14913_p7 = scmp.lt.s32.totalorder %s14907_s20, %s14907_s20 }
  0x2d   :  { %p14914_p8 = por %p14913_p7, %p14912_p6 }
  0x2f   :  { %p14915_p9 = pnand %p14914_p8, %p14908_p5 }
  0x31   :  { %14918 = shalt.err (!%p14915_p9)
}
  0x32   :  { %71 = dma.hbm_to_vmem [thread:$0]  %s18288_s10, 512, %s66_s15, [#allocation6], %s14948_s23, %s14948_s23, %s14949_s24  }
  0x33   :  { %14941 = dma.done.wait [#allocation3], 128  }
  0x34   :  { %14942 = vsyncadd [#allocation3], 4294967168 }
  0x35   :  { %14943 = dma.done.wait [#allocation6], 1024  }
  0x36   :  { %14944 = vsyncadd [#allocation6], 4294966272  ;;  %v108_v0 = vlaneseq  ;;  %v14952_v1 = vmov 1983009808   ;;  %v14953_v3 = vmov 1934713408  }
  0x37   :  { %v106_v2 = vunpack.c.l.s4 %v14952_v1  ;;  %v170_v4 = vunpack.c.l.s4 %v14953_v3  ;;  %v87_v9 = vld [vmem:[%s18278_s0] sm:$0xff]  ;;  %v89_v10 = vld [vmem:[%s18278_s0 + $0x10] sm:$0xff]  ;;  %vm377_vm0 = vcmask 261120   ;;  %v15118_v22 = vld [vmem:[%s18278_s0 + $0x8] sm:$0xff]  ;;  %vm14955_vm1 = vmmov 0   ;;  %s14956_s27 = smov 96  }
  0x38   :  { %v109_v5 = vshrl.u32 %v108_v0, 7  ;;  %v91_v11 = vld [vmem:[%s18278_s0 + $0x20] sm:$0xff]  ;;  %v93_v12 = vld [vmem:[%s18278_s0 + $0x30] sm:$0xff]  ;;  %v15125_v27 = vld [vmem:[%s18278_s0 + $0x18] sm:$0xff]  ;;  %s14958_s29 = smov 88   ;;  %s14959_s16 = smov 120  }
  0x39   :  { %v107_v6 = vunpack.c.0.s8 %v106_v2  ;;  %v171_v7 = vunpack.c.0.s8 %v170_v4  ;;  %v95_v13 = vld [vmem:[%s18278_s0 + $0x40] sm:$0xff]  ;;  %v97_v14 = vld [vmem:[%s18278_s0 + $0x50] sm:$0xff]  ;;  %v103_v15 = vcombine.low %v87_v9, %v91_v11  ;;  %v104_v16 = vcombine.high %v87_v9, %v91_v11  ;;  %v15130_v28 = vld [vmem:[%s18278_s0 + $0x28] sm:$0xff]  ;;  %s14960_s17 = smov 56   ;;  %s14961_s18 = smov 80  }
  0x3a   :  { %v99_v17 = vld [vmem:[%s18278_s0 + $0x60] sm:$0xff]  ;;  %v101_v18 = vld [vmem:[%s18278_s0 + $0x70] sm:$0xff]  ;;  %v119_v19 = vcombine.low %v89_v10, %v93_v12  ;;  %v120_v21 = vcombine.high %v89_v10, %v93_v12  ;;  %v15135_v29 = vld [vmem:[%s18278_s0 + $0x38] sm:$0xff]  ;;  %v239_v36 = vcombine.low %v15118_v22, %v15130_v28  ;;  %vm855_vm2 = vcmask 64512   ;;  %s14962_s19 = smov 112   ;;  %s14963_s20 = smov 48  }
  0x3b   :  { %v15087_v8 = vsub.s32 %v107_v6, %v109_v5  ;;  %v15113_v20 = vsub.s32 %v171_v7, %v109_v5  ;;  %v135_v24 = vcombine.low %v95_v13, %v99_v17  ;;  %v151_v25 = vcombine.low %v97_v14, %v101_v18  ;;  %v96_v62 = vld [vmem:[%s18278_s0 + $0x48] sm:$0xff]  ;;  %v98_v63 = vld [vmem:[%s18278_s0 + $0x58] sm:$0xff]  ;;  %s14965_s1 = smov 104   ;;  %s14966_s28 = smov 40  }
  0x3c   :  { %v136_v32 = vcombine.high %v95_v13, %v99_v17  ;;  %v152_v33 = vcombine.high %v97_v14, %v101_v18  ;;  %v255_v37 = vcombine.low %v15125_v27, %v15135_v29  ;;  %v100_v0 = vld [vmem:[%s18278_s0 + $0x68] sm:$0xff]  ;;  %v102_v1 = vld [vmem:[%s18278_s0 + $0x78] sm:$0xff]  ;;  %v240_v14 = vcombine.high %v15118_v22, %v15130_v28  ;;  %s14964_s0 = smov 72   ;;  %s14967_s21 = smov 16  }
  0x3d   :  { %18326 = vst [vmem:[#allocation12_spill] sm:$0xff] %v15087_v8  ;;  %18327 = vst [vmem:[#allocation13_spill] sm:$0xff] %v15113_v20  ;;  %v111_v23 = vrot.slane %v103_v15, %v15087_v8  ;;  %v118_v26 = vrot.slane %v104_v16, %v15087_v8  ;;  %v127_v30 = vrot.slane %v119_v19, %v15087_v8  ;;  %s14968_s22 = smov 24   ;;  %vm11638_vm3 = vcmask 195584  }
  0x3e   :  { %v134_v31 = vrot.slane %v120_v21, %v15087_v8  ;;  %v143_v34 = vrot.slane %v135_v24, %v15087_v8  ;;  %v159_v35 = vrot.slane %v151_v25, %v15087_v8  ;;  %v150_v40 = vrot.slane %v136_v32, %v15087_v8 }
  0x3f   :  { %v167_v38 = vcombine.low %v111_v23, %v127_v30  ;;  %v168_v39 = vcombine.high %v111_v23, %v127_v30  ;;  %v166_v41 = vrot.slane %v152_v33, %v15087_v8  ;;  %v247_v56 = vrot.slane %v239_v36, %v15087_v8 }
  0x40   :  { %v199_v42 = vcombine.low %v143_v34, %v159_v35  ;;  %v200_v43 = vcombine.high %v143_v34, %v159_v35  ;;  %v183_v44 = vcombine.low %v118_v26, %v134_v31  ;;  %v184_v45 = vcombine.high %v118_v26, %v134_v31 }
  0x41   :  { %v175_v46 = vrot.slane %v167_v38, %v15113_v20  ;;  %v182_v47 = vrot.slane %v168_v39, %v15113_v20  ;;  %v215_v48 = vcombine.low %v150_v40, %v166_v41  ;;  %v216_v49 = vcombine.high %v150_v40, %v166_v41 }
  0x42   :  { %v207_v50 = vrot.slane %v199_v42, %v15113_v20  ;;  %v214_v51 = vrot.slane %v200_v43, %v15113_v20  ;;  %v191_v52 = vrot.slane %v183_v44, %v15113_v20  ;;  %v198_v53 = vrot.slane %v184_v45, %v15113_v20 }
  0x43   :  { %v223_v54 = vrot.slane %v215_v48, %v15113_v20  ;;  %v230_v55 = vrot.slane %v216_v49, %v15113_v20  ;;  %v263_v57 = vrot.slane %v255_v37, %v15087_v8  ;;  %v271_v11 = vcombine.low %v96_v62, %v100_v0 }
  0x44   :  { %v15157_v58 = vcombine.low %v175_v46, %v207_v50  ;;  %v15159_v59 = vcombine.low %v182_v47, %v214_v51  ;;  %v15161_v60 = vcombine.high %v175_v46, %v207_v50  ;;  %v15163_v61 = vcombine.high %v182_v47, %v214_v51 }
  0x45   :  { %v15181_v4 = vcombine.low %v191_v52, %v223_v54  ;;  %v15185_v6 = vcombine.high %v191_v52, %v223_v54  ;;  %v15187_v7 = vcombine.low %v198_v53, %v230_v55  ;;  %v15189_v9 = vcombine.high %v198_v53, %v230_v55 }
  0x46   :  { %18328 = vst [vmem:[#allocation14_spill] sm:$0xff] %v15157_v58  ;;  %18329 = vst [vmem:[#allocation15_spill] sm:$0xff] %v15159_v59  ;;  %v378_v2 = vsel %vm377_vm0, %v15157_v58, 0.0  ;;  %v384_v3 = vsel %vm377_vm0, %v15159_v59, 0.0  ;;  %v381_v5 = vsel %vm377_vm0, %v15161_v60, 0.0  ;;  %v387_v10 = vsel %vm377_vm0, %v15163_v61, 0.0 }
  0x47   :  { %18330 = vst [vmem:[#allocation16_spill] sm:$0xff] %v15161_v60  ;;  %18331 = vst [vmem:[#allocation17_spill] sm:$0xff] %v15163_v61  ;;  %379 = vadd.xlane.f32.xlu0 %v378_v2  ;;  %385 = vadd.xlane.f32.xlu1 %v384_v3  ;;  %v287_v12 = vcombine.low %v98_v63, %v102_v1  ;;  %v303_v13 = vcombine.low %v247_v56, %v263_v57  ;;  %v390_v18 = vsel %vm377_vm0, %v15181_v4, 0.0  ;;  %vm11621_vm4 = vcmask 130048  }
  0x48   :  { %18332 = vst [vmem:[#allocation18_spill] sm:$0xff] %v15181_v4  ;;  %18333 = vst [vmem:[#allocation19_spill] sm:$0xff] %v15185_v6  ;;  %v256_v15 = vcombine.high %v15125_v27, %v15135_v29  ;;  %v272_v16 = vcombine.high %v96_v62, %v100_v0  ;;  %v288_v17 = vcombine.high %v98_v63, %v102_v1  ;;  %v393_v24 = vsel %vm377_vm0, %v15185_v6, 0.0 }
  0x49   :  { %18334 = vst [vmem:[#allocation20_spill] sm:$0xff] %v15187_v7  ;;  %18335 = vst [vmem:[#allocation21_spill] sm:$0xff] %v15189_v9  ;;  %v279_v19 = vrot.slane %v271_v11, %v15087_v8  ;;  %v295_v21 = vrot.slane %v287_v12, %v15087_v8  ;;  %v304_v23 = vcombine.high %v247_v56, %v263_v57  ;;  %v396_v32 = vsel %vm377_vm0, %v15187_v7, 0.0 }
  0x4a   :  { %v311_v22 = vrot.slane %v303_v13, %v15113_v20  ;;  %v254_v25 = vrot.slane %v240_v14, %v15087_v8  ;;  %v270_v26 = vrot.slane %v256_v15, %v15087_v8  ;;  %v286_v29 = vrot.slane %v272_v16, %v15087_v8 }
  0x4b   :  { %382 = vadd.xlane.f32.xlu0 %v381_v5  ;;  %388 = vadd.xlane.f32.xlu1 %v387_v10  ;;  %v335_v27 = vcombine.low %v279_v19, %v295_v21  ;;  %v336_v28 = vcombine.high %v279_v19, %v295_v21  ;;  %v302_v30 = vrot.slane %v288_v17, %v15087_v8  ;;  %v399_v36 = vsel %vm377_vm0, %v15189_v9, 0.0 }
  0x4c   :  { %v318_v33 = vrot.slane %v304_v23, %v15113_v20  ;;  %v319_v35 = vcombine.low %v254_v25, %v270_v26  ;;  %v320_v40 = vcombine.high %v254_v25, %v270_v26 }
  0x4d   :  { %v343_v31 = vrot.slane %v335_v27, %v15113_v20  ;;  %v350_v34 = vrot.slane %v336_v28, %v15113_v20  ;;  %v351_v39 = vcombine.low %v286_v29, %v302_v30  ;;  %v352_v43 = vcombine.high %v286_v29, %v302_v30 }
  0x4e   :  { %v327_v42 = vrot.slane %v319_v35, %v15113_v20  ;;  %v334_v48 = vrot.slane %v320_v40, %v15113_v20 }
  0x4f   :  { %391 = vadd.xlane.f32.xlu0 %v390_v18  ;;  %394 = vadd.xlane.f32.xlu1 %v393_v24  ;;  %v15215_v37 = vcombine.low %v311_v22, %v343_v31  ;;  %v15217_v38 = vcombine.high %v311_v22, %v343_v31  ;;  %v15219_v41 = vcombine.low %v318_v33, %v350_v34 }
  0x50   :  { %v15226_v46 = vcombine.high %v318_v33, %v350_v34  ;;  %v359_v47 = vrot.slane %v351_v39, %v15113_v20  ;;  %v366_v49 = vrot.slane %v352_v43, %v15113_v20 }
  0x51   :  { %18336 = vst [vmem:[#allocation22_spill] sm:$0xff] %v15215_v37  ;;  %18337 = vst [vmem:[#allocation23_spill] sm:$0xff] %v15217_v38  ;;  %v402_v44 = vsel %vm377_vm0, %v15215_v37, 0.0  ;;  %v405_v45 = vsel %vm377_vm0, %v15217_v38, 0.0  ;;  %v408_v50 = vsel %vm377_vm0, %v15219_v41, 0.0 }
  0x52   :  { %18338 = vst [vmem:[#allocation24_spill] sm:$0xff] %v15219_v41  ;;  %18339 = vst [vmem:[#allocation25_spill] sm:$0xff] %v15226_v46  ;;  %v411_v51 = vsel %vm377_vm0, %v15226_v46, 0.0  ;;  %v15235_v52 = vcombine.low %v327_v42, %v359_v47  ;;  %v15237_v53 = vcombine.high %v327_v42, %v359_v47  ;;  %v15243_v56 = vcombine.low %v334_v48, %v366_v49 }
  0x53   :  { %397 = vadd.xlane.f32.xlu0 %v396_v32  ;;  %400 = vadd.xlane.f32.xlu1 %v399_v36  ;;  %v15245_v57 = vcombine.high %v334_v48, %v366_v49 }
  0x54   :  { %18340 = vst [vmem:[#allocation26_spill] sm:$0xff] %v15235_v52  ;;  %18341 = vst [vmem:[#allocation27_spill] sm:$0xff] %v15237_v53  ;;  %v414_v54 = vsel %vm377_vm0, %v15235_v52, 0.0  ;;  %v417_v55 = vsel %vm377_vm0, %v15237_v53, 0.0  ;;  %v420_v62 = vsel %vm377_vm0, %v15243_v56, 0.0 }
  0x55   :  { %18342 = vst [vmem:[#allocation28_spill] sm:$0xff] %v15243_v56  ;;  %18343 = vst [vmem:[#allocation29_spill] sm:$0xff] %v15245_v57  ;;  %v423_v63 = vsel %vm377_vm0, %v15245_v57, 0.0 }
  0x57   :  { %403 = vadd.xlane.f32.xlu0 %v402_v44  ;;  %406 = vadd.xlane.f32.xlu1 %v405_v45 }
  0x5b   :  { %409 = vadd.xlane.f32.xlu0 %v408_v50  ;;  %412 = vadd.xlane.f32.xlu1 %v411_v51 }
  0x5f   :  { %415 = vadd.xlane.f32.xlu0 %v414_v54  ;;  %418 = vadd.xlane.f32.xlu1 %v417_v55 }
  0x63   :  { %421 = vadd.xlane.f32.xlu0 %v420_v62  ;;  %424 = vadd.xlane.f32.xlu1 %v423_v63 }
  0xd4   :  { %v380_v0 = vpop.xlane.xlu0 %379  ;;  %v386_v1 = vpop.xlane.xlu1 %385 }
  0xd5   :  { %v427_v2 = vmul.f32 0.03125, %v380_v0  ;;  %v429_v3 = vmul.f32 0.03125, %v386_v1 }
  0xd7   :  { %v15252_v5 = vsub.f32 %v15157_v58, %v427_v2  ;;  %v15255_v10 = vsub.f32 %v15159_v59, %v429_v3 }
  0xd8   :  { %v383_v11 = vpop.xlane.xlu0 %382  ;;  %v389_v12 = vpop.xlane.xlu1 %388 }
  0xd9   :  { %v428_v13 = vmul.f32 0.03125, %v383_v11  ;;  %v430_v14 = vmul.f32 0.03125, %v389_v12  ;;  %v459_v15 = vmul.f32 %v15252_v5, %v15252_v5  ;;  %v461_v16 = vmul.f32 %v15255_v10, %v15255_v10 }
  0xdb   :  { %v15262_v17 = vsub.f32 %v15161_v60, %v428_v13  ;;  %v15265_v18 = vsub.f32 %v15163_v61, %v430_v14  ;;  %v475_v19 = vsel %vm377_vm0, %v459_v15, 0.0  ;;  %v481_v24 = vsel %vm377_vm0, %v461_v16, 0.0 }
  0xdc   :  { %476 = vadd.xlane.f32.xlu0 %v475_v19  ;;  %v392_v21 = vpop.xlane.xlu0 %391  ;;  %v395_v23 = vpop.xlane.xlu1 %394 }
  0xdd   :  { %v431_v22 = vmul.f32 0.03125, %v392_v21  ;;  %v432_v25 = vmul.f32 0.03125, %v395_v23  ;;  %v460_v26 = vmul.f32 %v15262_v17, %v15262_v17  ;;  %v462_v27 = vmul.f32 %v15265_v18, %v15265_v18 }
  0xdf   :  { %v15274_v28 = vsub.f32 %v15181_v4, %v431_v22  ;;  %v15277_v29 = vsub.f32 %v15185_v6, %v432_v25  ;;  %v478_v30 = vsel %vm377_vm0, %v460_v26, 0.0  ;;  %v484_v33 = vsel %vm377_vm0, %v462_v27, 0.0 }
  0xe0   :  { %482 = vadd.xlane.f32.xlu0 %v481_v24  ;;  %479 = vadd.xlane.f32.xlu1 %v478_v30  ;;  %v398_v31 = vpop.xlane.xlu0 %397  ;;  %v401_v32 = vpop.xlane.xlu1 %400 }
  0xe1   :  { %v433_v34 = vmul.f32 0.03125, %v398_v31  ;;  %v434_v35 = vmul.f32 0.03125, %v401_v32  ;;  %v463_v36 = vmul.f32 %v15274_v28, %v15274_v28  ;;  %v464_v39 = vmul.f32 %v15277_v29, %v15277_v29 }
  0xe3   :  { %v15286_v40 = vsub.f32 %v15187_v7, %v433_v34  ;;  %v15289_v42 = vsub.f32 %v15189_v9, %v434_v35  ;;  %v487_v43 = vsel %vm377_vm0, %v463_v36, 0.0  ;;  %v490_v47 = vsel %vm377_vm0, %v464_v39, 0.0 }
  0xe4   :  { %485 = vadd.xlane.f32.xlu1 %v484_v33  ;;  %488 = vadd.xlane.f32.xlu0 %v487_v43  ;;  %v404_v44 = vpop.xlane.xlu0 %403  ;;  %v407_v45 = vpop.xlane.xlu1 %406 }
  0xe5   :  { %v435_v48 = vmul.f32 0.03125, %v404_v44  ;;  %v436_v49 = vmul.f32 0.03125, %v407_v45  ;;  %v465_v50 = vmul.f32 %v15286_v40, %v15286_v40  ;;  %v466_v51 = vmul.f32 %v15289_v42, %v15289_v42 }
  0xe7   :  { %v15298_v54 = vsub.f32 %v15215_v37, %v435_v48  ;;  %v15301_v55 = vsub.f32 %v15217_v38, %v436_v49  ;;  %v493_v62 = vsel %vm377_vm0, %v465_v50, 0.0  ;;  %v496_v1 = vsel %vm377_vm0, %v466_v51, 0.0 }
  0xe8   :  { %491 = vadd.xlane.f32.xlu1 %v490_v47  ;;  %494 = vadd.xlane.f32.xlu0 %v493_v62  ;;  %v410_v63 = vpop.xlane.xlu0 %409  ;;  %v413_v0 = vpop.xlane.xlu1 %412  ;;  %v631_v62 = vld [vmem:[%s18282_s4] sm:$0xff] }
  0xe9   :  { %v437_v2 = vmul.f32 0.03125, %v410_v63  ;;  %v438_v3 = vmul.f32 0.03125, %v413_v0  ;;  %v467_v11 = vmul.f32 %v15298_v54, %v15298_v54  ;;  %v468_v12 = vmul.f32 %v15301_v55, %v15301_v55  ;;  %v632_v63 = vld [vmem:[%s18282_s4 + $0x8] sm:$0xff] }
  0xea   :  { %v14371_v0 = vpack.c.bf16 %v632_v63, %v631_v62 }
  0xeb   :  { %v15310_v13 = vsub.f32 %v15219_v41, %v437_v2  ;;  %v15313_v14 = vsub.f32 %v15226_v46, %v438_v3  ;;  %v499_v15 = vsel %vm377_vm0, %v467_v11, 0.0  ;;  %v502_v21 = vsel %vm377_vm0, %v468_v12, 0.0  ;;  %v634_v2 = vld [vmem:[%s18282_s4 + $0x18] sm:$0xff] }
  0xec   :  { %497 = vadd.xlane.f32.xlu1 %v496_v1  ;;  %500 = vadd.xlane.f32.xlu0 %v499_v15  ;;  %v416_v16 = vpop.xlane.xlu0 %415  ;;  %v419_v19 = vpop.xlane.xlu1 %418  ;;  %v633_v1 = vld [vmem:[%s18282_s4 + $0x10] sm:$0xff] }
  0xed   :  { %v439_v23 = vmul.f32 0.03125, %v416_v16  ;;  %v440_v24 = vmul.f32 0.03125, %v419_v19  ;;  %v469_v22 = vmul.f32 %v15310_v13, %v15310_v13  ;;  %v470_v25 = vmul.f32 %v15313_v14, %v15313_v14  ;;  %14372 = vmatprep.subr.bf16.mxu0 %v14371_v0 }
  0xee   :  { %14374 = vmatpush3.bf16.msra.mxu0 %v14371_v0  ;;  %v14375_v3 = vpack.c.bf16 %v634_v2, %v633_v1  ;;  %v15368_v2 = vld [vmem:[%s18281_s3] ss:$0 sm:$0xff] }
  0xef   :  { %v15322_v26 = vsub.f32 %v15235_v52, %v439_v23  ;;  %v15325_v27 = vsub.f32 %v15237_v53, %v440_v24  ;;  %v505_v30 = vsel %vm377_vm0, %v469_v22, 0.0  ;;  %v508_v33 = vsel %vm377_vm0, %v470_v25, 0.0 }
  0xf0   :  { %503 = vadd.xlane.f32.xlu1 %v502_v21  ;;  %506 = vadd.xlane.f32.xlu0 %v505_v30  ;;  %v422_v31 = vpop.xlane.xlu0 %421  ;;  %v425_v32 = vpop.xlane.xlu1 %424 }
  0xf1   :  { %v441_v34 = vmul.f32 0.03125, %v422_v31  ;;  %v442_v35 = vmul.f32 0.03125, %v425_v32  ;;  %v471_v36 = vmul.f32 %v15322_v26, %v15322_v26  ;;  %v472_v39 = vmul.f32 %v15325_v27, %v15325_v27  ;;  %14376 = vmatprep.subr.bf16.mxu0 %v14375_v3 }
  0xf2   :  { %14378 = vmatpush3.bf16.msra.mxu0 %v14375_v3 }
  0xf3   :  { %v15334_v43 = vsub.f32 %v15243_v56, %v441_v34  ;;  %v15337_v44 = vsub.f32 %v15245_v57, %v442_v35  ;;  %v511_v45 = vsel %vm377_vm0, %v471_v36, 0.0  ;;  %v514_v47 = vsel %vm377_vm0, %v472_v39, 0.0 }
  0xf4   :  { %509 = vadd.xlane.f32.xlu1 %v508_v33  ;;  %512 = vadd.xlane.f32.xlu0 %v511_v45 }
  0xf5   :  { %v473_v48 = vmul.f32 %v15334_v43, %v15334_v43  ;;  %v474_v49 = vmul.f32 %v15337_v44, %v15337_v44 }
  0xf7   :  { %v517_v50 = vsel %vm377_vm0, %v473_v48, 0.0  ;;  %v520_v51 = vsel %vm377_vm0, %v474_v49, 0.0 }
  0xf8   :  { %515 = vadd.xlane.f32.xlu1 %v514_v47  ;;  %518 = vadd.xlane.f32.xlu0 %v517_v50  ;;  %v15362_v50 = vld [vmem:[%s18280_s2] ss:$0 sm:$0xff] }
  0xfc   :  { %521 = vadd.xlane.f32.xlu1 %v520_v51 }
 0x169   :  { %v477_v11 = vpop.xlane.xlu0 %476 }
 0x16a   :  { %v523_v12 = vmul.f32 0.03125, %v477_v11 }
 0x16c   :  { %v539_v15 = vadd.f32 1e-05, %v523_v12 }
 0x16d   :  { %v480_v16 = vpop.xlane.xlu1 %479  ;;  %v483_v19 = vpop.xlane.xlu0 %482 }
 0x16e   :  { %14466 = vrsqrt.f32 %v539_v15  ;;  %v524_v21 = vmul.f32 0.03125, %v480_v16  ;;  %v525_v23 = vmul.f32 0.03125, %v483_v19 }
 0x170   :  { %v540_v24 = vadd.f32 1e-05, %v524_v21  ;;  %v541_v22 = vadd.f32 1e-05, %v525_v23 }
 0x171   :  { %v486_v25 = vpop.xlane.xlu1 %485  ;;  %v489_v30 = vpop.xlane.xlu0 %488 }
 0x172   :  { %14468 = vrsqrt.f32 %v540_v24  ;;  %v526_v31 = vmul.f32 0.03125, %v486_v25  ;;  %v527_v32 = vmul.f32 0.03125, %v489_v30 }
 0x173   :  { %14470 = vrsqrt.f32 %v541_v22 }
 0x174   :  { %v542_v33 = vadd.f32 1e-05, %v526_v31  ;;  %v543_v34 = vadd.f32 1e-05, %v527_v32 }
 0x175   :  { %v492_v35 = vpop.xlane.xlu1 %491  ;;  %v495_v36 = vpop.xlane.xlu0 %494 }
 0x176   :  { %14472 = vrsqrt.f32 %v542_v33  ;;  %v528_v39 = vmul.f32 0.03125, %v492_v35  ;;  %v529_v45 = vmul.f32 0.03125, %v495_v36 }
 0x177   :  { %14474 = vrsqrt.f32 %v543_v34 }
 0x178   :  { %v14467_v47 = vpop.eup %14466  ;;  %v544_v48 = vadd.f32 1e-05, %v528_v39  ;;  %v545_v49 = vadd.f32 1e-05, %v529_v45 }
 0x179   :  { %v498_v51 = vpop.xlane.xlu1 %497  ;;  %v501_v62 = vpop.xlane.xlu0 %500  ;;  %v571_v63 = vmul.f32 %v14467_v47, %v15252_v5 }
 0x17a   :  { %14476 = vrsqrt.f32 %v544_v48  ;;  %v530_v0 = vmul.f32 0.03125, %v498_v51  ;;  %v531_v1 = vmul.f32 0.03125, %v501_v62 }
 0x17b   :  { %14478 = vrsqrt.f32 %v545_v49  ;;  %v593_v3 = vmul.f32 %v15362_v50, %v571_v63 }
 0x17c   :  { %v14469_v11 = vpop.eup %14468  ;;  %v546_v12 = vadd.f32 1e-05, %v530_v0  ;;  %v547_v15 = vadd.f32 1e-05, %v531_v1 }
 0x17d   :  { %v14471_v16 = vpop.eup %14470  ;;  %v504_v19 = vpop.xlane.xlu1 %503  ;;  %v615_v23 = vadd.f32 %v15368_v2, %v593_v3  ;;  %v572_v5 = vmul.f32 %v14469_v11, %v15262_v17 }
 0x17e   :  { %v507_v21 = vpop.xlane.xlu0 %506  ;;  %14480 = vrsqrt.f32 %v546_v12  ;;  %v532_v24 = vmul.f32 0.03125, %v504_v19  ;;  %v573_v25 = vmul.f32 %v14471_v16, %v15255_v10 }
 0x17f   :  { %v533_v22 = vmul.f32 0.03125, %v507_v21  ;;  %14482 = vrsqrt.f32 %v547_v15  ;;  %13587 = vmatprep.mubr.msk.f32.mxu0 %vm377_vm0, %v615_v23  ;;  %v594_v30 = vmul.f32 %v15362_v50, %v572_v5 }
 0x180   :  { %v14473_v31 = vpop.eup %14472  ;;  %v548_v32 = vadd.f32 1e-05, %v532_v24  ;;  %v595_v34 = vmul.f32 %v15362_v50, %v573_v25 }
 0x181   :  { %v549_v33 = vadd.f32 1e-05, %v533_v22  ;;  %v14475_v35 = vpop.eup %14474  ;;  %v510_v36 = vpop.xlane.xlu1 %509  ;;  %v616_v17 = vadd.f32 %v15368_v2, %v594_v30  ;;  %v574_v45 = vmul.f32 %v14473_v31, %v15265_v18 }
 0x182   :  { %v513_v39 = vpop.xlane.xlu0 %512  ;;  %14484 = vrsqrt.f32 %v548_v32  ;;  %v534_v47 = vmul.f32 0.03125, %v510_v36  ;;  %v617_v48 = vadd.f32 %v15368_v2, %v595_v34  ;;  %v575_v51 = vmul.f32 %v14475_v35, %v15274_v28 }
 0x183   :  { %v535_v10 = vmul.f32 0.03125, %v513_v39  ;;  %14486 = vrsqrt.f32 %v549_v33  ;;  %13588 = vmatmul.mubr.msk.f32.vlgmr.msra.gmra.mrb[0].mxu0 %vm377_vm0, %v616_v17  ;;  %v596_v49 = vmul.f32 %v15362_v50, %v574_v45 }
 0x184   :  { %v14477_v62 = vpop.eup %14476  ;;  %v550_v63 = vadd.f32 1e-05, %v534_v47  ;;  %13590 = vmatprep.mubr.msk.f32.mxu0 %vm377_vm0, %v617_v48  ;;  %v597_v12 = vmul.f32 %v15362_v50, %v575_v51 }
 0x185   :  { %v551_v0 = vadd.f32 1e-05, %v535_v10  ;;  %v14479_v1 = vpop.eup %14478  ;;  %v516_v3 = vpop.xlane.xlu1 %515  ;;  %v618_v11 = vadd.f32 %v15368_v2, %v596_v49  ;;  %v576_v15 = vmul.f32 %v14477_v62, %v15277_v29 }
 0x186   :  { %v519_v18 = vpop.xlane.xlu0 %518  ;;  %14488 = vrsqrt.f32 %v550_v63  ;;  %v536_v16 = vmul.f32 0.03125, %v516_v3  ;;  %v577_v21 = vmul.f32 %v14479_v1, %v15286_v40  ;;  %v619_v28 = vadd.f32 %v15368_v2, %v597_v12 }
 0x187   :  { %v537_v19 = vmul.f32 0.03125, %v519_v18  ;;  %14490 = vrsqrt.f32 %v551_v0  ;;  %13591 = vmatmul.mubr.msk.f32.gmra.mrb[2].mxu0 %vm377_vm0, %v618_v11  ;;  %v598_v23 = vmul.f32 %v15362_v50, %v576_v15 }
 0x188   :  { %v14481_v5 = vpop.eup %14480  ;;  %v552_v24 = vadd.f32 1e-05, %v536_v16  ;;  %v599_v25 = vmul.f32 %v15362_v50, %v577_v21  ;;  %13593 = vmatprep.mubr.msk.f32.mxu0 %vm377_vm0, %v619_v28 }
 0x189   :  { %v553_v22 = vadd.f32 1e-05, %v537_v19  ;;  %v14483_v30 = vpop.eup %14482  ;;  %v522_v29 = vpop.xlane.xlu1 %521  ;;  %v620_v31 = vadd.f32 %v15368_v2, %v598_v23  ;;  %v578_v40 = vmul.f32 %v14481_v5, %v15289_v42 }
 0x18a   :  { %14492 = vrsqrt.f32 %v552_v24  ;;  %v538_v32 = vmul.f32 0.03125, %v522_v29  ;;  %v621_v33 = vadd.f32 %v15368_v2, %v599_v25  ;;  %v579_v34 = vmul.f32 %v14483_v30, %v15298_v54 }
 0x18b   :  { %14494 = vrsqrt.f32 %v553_v22  ;;  %13594 = vmatmul.mubr.msk.f32.gmra.mrb[4].mxu0 %vm377_vm0, %v620_v31  ;;  %v600_v35 = vmul.f32 %v15362_v50, %v578_v40  ;;  %v18293_v24 = vmov 0.0  }
 0x18c   :  { %v14485_v36 = vpop.eup %14484  ;;  %v554_v39 = vadd.f32 1e-05, %v538_v32  ;;  %13596 = vmatprep.mubr.msk.f32.mxu0 %vm377_vm0, %v621_v33  ;;  %v601_v17 = vmul.f32 %v15362_v50, %v579_v34  ;;  %13611 = vmatprep.subr.mxu1 %v18293_v24 }
 0x18d   :  { %v14487_v45 = vpop.eup %14486  ;;  %v622_v42 = vadd.f32 %v15368_v2, %v600_v35  ;;  %v580_v47 = vmul.f32 %v14485_v36, %v15301_v55  ;;  %13656 = vmatprep.subr.mxu0 %v18293_v24  ;;  %13613 = vmatprep.mubr.msk.f32.mxu1 %vm14955_vm1, %v18293_v24 }
 0x18e   :  { %14496 = vrsqrt.f32 %v554_v39  ;;  %v623_v10 = vadd.f32 %v15368_v2, %v601_v17  ;;  %v581_v54 = vmul.f32 %v14487_v45, %v15310_v13 }
 0x18f   :  { %13597 = vmatmul.mubr.msk.f32.gmra.mrb[6].mxu0 %vm377_vm0, %v622_v42  ;;  %v602_v48 = vmul.f32 %v15362_v50, %v580_v47 }
 0x190   :  { %v14489_v49 = vpop.eup %14488  ;;  %13599 = vmatprep.mubr.msk.f32.mxu0 %vm377_vm0, %v623_v10  ;;  %v603_v51 = vmul.f32 %v15362_v50, %v581_v54 }
 0x191   :  { %v14491_v62 = vpop.eup %14490  ;;  %v624_v63 = vadd.f32 %v15368_v2, %v602_v48  ;;  %v582_v0 = vmul.f32 %v14489_v49, %v15313_v14 }
 0x192   :  { %v625_v55 = vadd.f32 %v15368_v2, %v603_v51  ;;  %v583_v1 = vmul.f32 %v14491_v62, %v15322_v26 }
 0x193   :  { %13600 = vmatmul.mubr.msk.f32.gmra.mrb[8].mxu0 %vm377_vm0, %v624_v63  ;;  %v604_v13 = vmul.f32 %v15362_v50, %v582_v0 }
 0x194   :  { %v14493_v3 = vpop.eup %14492  ;;  %13602 = vmatprep.mubr.msk.f32.mxu0 %vm377_vm0, %v625_v55  ;;  %v605_v18 = vmul.f32 %v15362_v50, %v583_v1 }
 0x195   :  { %v14495_v11 = vpop.eup %14494  ;;  %v626_v12 = vadd.f32 %v15368_v2, %v604_v13  ;;  %v584_v15 = vmul.f32 %v14493_v3, %v15325_v27 }
 0x196   :  { %v627_v14 = vadd.f32 %v15368_v2, %v605_v18  ;;  %v585_v16 = vmul.f32 %v14495_v11, %v15334_v43 }
 0x197   :  { %13603 = vmatmul.mubr.msk.f32.gmra.mrb[10].mxu0 %vm377_vm0, %v626_v12  ;;  %v606_v26 = vmul.f32 %v15362_v50, %v584_v15 }
 0x198   :  { %v14497_v19 = vpop.eup %14496  ;;  %13605 = vmatprep.mubr.msk.f32.mxu0 %vm377_vm0, %v627_v14  ;;  %v607_v21 = vmul.f32 %v15362_v50, %v585_v16 }
 0x199   :  { %v628_v28 = vadd.f32 %v15368_v2, %v606_v26  ;;  %v586_v23 = vmul.f32 %v14497_v19, %v15337_v44  ;;  %v12969_v44 = vld [vmem:[%s18283_s5] ss:$0 sm:$0xff]  ;;  %s14957_s5 = smov 64  }
 0x19a   :  { %v629_v5 = vadd.f32 %v15368_v2, %v607_v21 }
 0x19b   :  { %13606 = vmatmul.mubr.msk.f32.gmra.mrb[12].mxu0 %vm377_vm0, %v628_v28  ;;  %v608_v27 = vmul.f32 %v15362_v50, %v586_v23 }
 0x19c   :  { %13608 = vmatprep.mubr.msk.f32.mxu0 %vm377_vm0, %v629_v5 }
 0x19d   :  { %v630_v43 = vadd.f32 %v15368_v2, %v608_v27 }
 0x19f   :  { %13609 = vmatmul.mubr.msk.f32.gmra.mrb[14].mxu0 %vm377_vm0, %v630_v43 }
 0x1a0   :  { %13658 = vmatprep.mubr.msk.f32.mxu0 %vm14955_vm1, %v18293_v24 }
 0x256   :  { %v13589_v50 = vpop.f32.mrb[0].mxu0 }
 0x257   :  { %v15442_v2 = vadd.f32 %v13589_v50, %v12969_v44  ;;  %v756_v22 = vpop.f32.mrb[1].mxu0 }
 0x258   :  { %v15444_v25 = vadd.f32 %v12969_v44, %v756_v22 }
 0x259   :  { %932 = vrot.lane.b32.xlu1 %v15442_v2, %s14956_s27  ;;  %v15539_v14 = vmul.f32 0.35355338, %v15442_v2 }
 0x25a   :  { %853 = vrot.lane.b32.xlu0 %v15444_v25, %s14956_s27  ;;  %v13592_v30 = vpop.f32.mrb[2].mxu0  ;;  %v15521_v12 = vmul.f32 0.35355338, %v15444_v25 }
 0x25b   :  { %v766_v29 = vpop.f32.mrb[3].mxu0  ;;  %v15454_v33 = vadd.f32 %v13592_v30, %v12969_v44  ;;  %18345 = vst [vmem:[#allocation31_spill] sm:$0xff] %v15539_v14 }
 0x25c   :  { %v15450_v31 = vadd.f32 %v12969_v44, %v766_v29 }
 0x25d   :  { %v15546_v16 = vmul.f32 0.35355338, %v15454_v33 }
 0x25e   :  { %1010 = vrot.lane.b32.xlu1 %v15450_v31, %s14956_s27  ;;  %v13595_v40 = vpop.f32.mrb[4].mxu0  ;;  %v15530_v15 = vmul.f32 0.35355338, %v15450_v31 }
 0x25f   :  { %v776_v32 = vpop.f32.mrb[5].mxu0  ;;  %v15462_v39 = vadd.f32 %v13595_v40, %v12969_v44  ;;  %18346 = vst [vmem:[#allocation32_spill] sm:$0xff] %v15546_v16 }
 0x260   :  { %v15456_v34 = vadd.f32 %v12969_v44, %v776_v32  ;;  %18344 = vst [vmem:[#allocation30_spill] sm:$0xff] %v15530_v15 }
 0x261   :  { %v15587_v22 = vmul.f32 0.35355338, %v15462_v39 }
 0x262   :  { %1088 = vrot.lane.b32.xlu1 %v15454_v33, %s14956_s27  ;;  %1166 = vrot.lane.b32.xlu0 %v15456_v34, %s14956_s27  ;;  %v13598_v35 = vpop.f32.mrb[6].mxu0 }
 0x263   :  { %v786_v36 = vpop.f32.mrb[7].mxu0  ;;  %v15470_v47 = vadd.f32 %v13598_v35, %v12969_v44  ;;  %18348 = vst [vmem:[#allocation34_spill] sm:$0xff] %v15587_v22 }
 0x264   :  { %v15464_v17 = vadd.f32 %v12969_v44, %v786_v36 }
 0x266   :  { %1244 = vrot.lane.b32.xlu1 %v15462_v39, %s14956_s27  ;;  %1322 = vrot.lane.b32.xlu0 %v15464_v17, %s14956_s27  ;;  %v13601_v45 = vpop.f32.mrb[8].mxu0  ;;  %v15604_v32 = vmul.f32 0.35355338, %v15464_v17 }
 0x267   :  { %v796_v42 = vpop.f32.mrb[9].mxu0  ;;  %v15478_v49 = vadd.f32 %v13601_v45, %v12969_v44 }
 0x268   :  { %v15472_v10 = vadd.f32 %v12969_v44, %v796_v42 }
 0x269   :  { %v15590_v30 = vmul.f32 0.35355338, %v15478_v49 }
 0x26a   :  { %1400 = vrot.lane.b32.xlu1 %v15470_v47, %s14956_s27  ;;  %1478 = vrot.lane.b32.xlu0 %v15472_v10, %s14956_s27  ;;  %v13604_v54 = vpop.f32.mrb[10].mxu0 }
 0x26b   :  { %v806_v48 = vpop.f32.mrb[11].mxu0  ;;  %v15486_v0 = vadd.f32 %v13604_v54, %v12969_v44  ;;  %v15625_v54 = vmul.f32 0.35355338, %v15470_v47 }
 0x26c   :  { %v15480_v51 = vadd.f32 %v12969_v44, %v806_v48 }
 0x26d   :  { %v15607_v35 = vmul.f32 0.35355338, %v15486_v0 }
 0x26e   :  { %1556 = vrot.lane.b32.xlu1 %v15478_v49, %s14956_s27  ;;  %1634 = vrot.lane.b32.xlu0 %v15480_v51, %s14956_s27  ;;  %v13607_v62 = vpop.f32.mrb[12].mxu0 }
 0x26f   :  { %v816_v63 = vpop.f32.mrb[13].mxu0  ;;  %v15494_v3 = vadd.f32 %v13607_v62, %v12969_v44  ;;  %v15640_v62 = vmul.f32 0.35355338, %v15472_v10 }
 0x270   :  { %v15488_v55 = vadd.f32 %v12969_v44, %v816_v63 }
 0x271   :  { %v15622_v42 = vmul.f32 0.35355338, %v15494_v3 }
 0x272   :  { %1712 = vrot.lane.b32.xlu1 %v15486_v0, %s14956_s27  ;;  %1790 = vrot.lane.b32.xlu0 %v15488_v55, %s14956_s27  ;;  %v13610_v1 = vpop.f32.mrb[14].mxu0 }
 0x273   :  { %v826_v13 = vpop.f32.mrb[15].mxu0  ;;  %v15502_v11 = vadd.f32 %v13610_v1, %v12969_v44 }
 0x274   :  { %v15496_v18 = vadd.f32 %v12969_v44, %v826_v13  ;;  %v15576_v44 = vmul.f32 0.35355338, %v15456_v34 }
 0x275   :  { %v15643_v63 = vmul.f32 0.35355338, %v15502_v11 }
 0x276   :  { %1868 = vrot.lane.b32.xlu1 %v15494_v3, %s14956_s27  ;;  %1946 = vrot.lane.b32.xlu0 %v15496_v18, %s14956_s27  ;;  %18347 = vst [vmem:[#allocation33_spill] sm:$0xff] %v15576_v44 }
 0x27a   :  { %2024 = vrot.lane.b32.xlu1 %v15502_v11, %s14956_s27  ;;  %2277 = vrot.lane.b32.xlu0 %v15444_v25, %s14957_s5 }
 0x27e   :  { %2353 = vrot.lane.b32.xlu1 %v15442_v2, %s14957_s5  ;;  %2429 = vrot.lane.b32.xlu0 %v15450_v31, %s14957_s5 }
 0x282   :  { %2505 = vrot.lane.b32.xlu1 %v15454_v33, %s14957_s5  ;;  %2581 = vrot.lane.b32.xlu0 %v15456_v34, %s14957_s5 }
 0x286   :  { %2657 = vrot.lane.b32.xlu1 %v15462_v39, %s14957_s5  ;;  %2885 = vrot.lane.b32.xlu0 %v15472_v10, %s14957_s5 }
 0x28a   :  { %2733 = vrot.lane.b32.xlu1 %v15464_v17, %s14957_s5  ;;  %3037 = vrot.lane.b32.xlu0 %v15480_v51, %s14957_s5 }
 0x28e   :  { %2809 = vrot.lane.b32.xlu1 %v15470_v47, %s14957_s5  ;;  %3189 = vrot.lane.b32.xlu0 %v15488_v55, %s14957_s5 }
 0x292   :  { %2961 = vrot.lane.b32.xlu1 %v15478_v49, %s14957_s5  ;;  %3495 = vrot.lane.b32.xlu0 %v15444_v25, %s14958_s29 }
 0x296   :  { %3113 = vrot.lane.b32.xlu1 %v15486_v0, %s14957_s5  ;;  %3493 = vrot.lane.b32.xlu0 %v15521_v12, %s14959_s16 }
 0x29a   :  { %3265 = vrot.lane.b32.xlu1 %v15494_v3, %s14957_s5  ;;  %3651 = vrot.lane.b32.xlu0 %v15450_v31, %s14958_s29 }
 0x29e   :  { %3417 = vrot.lane.b32.xlu1 %v15502_v11, %s14957_s5  ;;  %3649 = vrot.lane.b32.xlu0 %v15530_v15, %s14959_s16 }
 0x2a2   :  { %3573 = vrot.lane.b32.xlu1 %v15442_v2, %s14958_s29  ;;  %3341 = vrot.lane.b32.xlu0 %v15496_v18, %s14957_s5 }
 0x2a6   :  { %3571 = vrot.lane.b32.xlu1 %v15539_v14, %s14959_s16 }
 0x2aa   :  { %3729 = vrot.lane.b32.xlu1 %v15454_v33, %s14958_s29 }
 0x2ae   :  { %3727 = vrot.lane.b32.xlu1 %v15546_v16, %s14959_s16 }
 0x2cb   :  { %v933_v26 = vpop.permute.xlu1 %932 }
 0x2cc   :  { %v854_v19 = vpop.permute.xlu0 %853 }
 0x2cd   :  { %13612 = vmatpush3.xpose.msk.msra.mxu1 %vm855_vm2, %v854_v19 }
 0x2ce   :  { %13616 = vmatprep.subr.mxu1 %v18293_v24 }
 0x2d0   :  { %v1011_v21 = vpop.permute.xlu1 %1010  ;;  %13614 = vmatmul.mubr.msk.f32.vlgmr.msra.gmra.mrb[0].mxu1 %vm855_vm2, %v15521_v12 }
 0x2d1   :  { %13617 = vmatpush3.xpose.msk.msra.mxu1 %vm855_vm2, %v933_v26  ;;  %13618 = vmatprep.mubr.msk.f32.mxu1 %vm14955_vm1, %v18293_v24  ;;  %v15655_v26 = vmul.f32 0.35355338, %v15480_v51 }
 0x2d2   :  { %13621 = vmatprep.subr.mxu1 %v18293_v24 }
 0x2d4   :  { %v1089_v28 = vpop.permute.xlu1 %1088  ;;  %13619 = vmatmul.mubr.msk.f32.vlgmr.msra.gmra.mrb[2].mxu1 %vm855_vm2, %v15539_v14  ;;  %v1167_v23 = vpop.permute.xlu0 %1166 }
 0x2d5   :  { %13622 = vmatpush3.xpose.msk.msra.mxu1 %vm855_vm2, %v1011_v21  ;;  %13623 = vmatprep.mubr.msk.f32.mxu1 %vm14955_vm1, %v18293_v24  ;;  %v15667_v21 = vmul.f32 0.35355338, %v15488_v55 }
 0x2d6   :  { %13626 = vmatprep.subr.mxu1 %v18293_v24 }
 0x2d8   :  { %v1245_v5 = vpop.permute.xlu1 %1244  ;;  %13624 = vmatmul.mubr.msk.f32.vlgmr.msra.gmra.mrb[4].mxu1 %vm855_vm2, %v15530_v15  ;;  %v1323_v43 = vpop.permute.xlu0 %1322 }
 0x2d9   :  { %13627 = vmatpush3.xpose.msk.msra.mxu1 %vm855_vm2, %v1089_v28  ;;  %13628 = vmatprep.mubr.msk.f32.mxu1 %vm14955_vm1, %v18293_v24  ;;  %v15676_v28 = vmul.f32 0.35355338, %v15496_v18 }
 0x2da   :  { %13631 = vmatprep.subr.mxu1 %v18293_v24 }
 0x2dc   :  { %v1401_v27 = vpop.permute.xlu1 %1400  ;;  %13629 = vmatmul.mubr.msk.f32.vlgmr.msra.gmra.mrb[6].mxu1 %vm855_vm2, %v15546_v16  ;;  %v1479_v29 = vpop.permute.xlu0 %1478 }
 0x2dd   :  { %13632 = vmatpush3.xpose.msk.msra.mxu1 %vm855_vm2, %v1167_v23  ;;  %13633 = vmatprep.mubr.msk.f32.mxu1 %vm14955_vm1, %v18293_v24 }
 0x2de   :  { %13636 = vmatprep.subr.mxu1 %v18293_v24 }
 0x2e0   :  { %v1557_v50 = vpop.permute.xlu1 %1556  ;;  %13634 = vmatmul.mubr.msk.f32.vlgmr.msra.gmra.mrb[8].mxu1 %vm855_vm2, %v15576_v44  ;;  %v1635_v45 = vpop.permute.xlu0 %1634 }
 0x2e1   :  { %13637 = vmatpush3.xpose.msk.msra.mxu1 %vm855_vm2, %v1245_v5  ;;  %13657 = vmatpush3.xpose.msk.msra.mxu0 %vm855_vm2, %v1557_v50  ;;  %v15684_v5 = vld [vmem:[#allocation2] sm:$0xff] }
 0x2e2   :  { %13638 = vmatprep.mubr.msk.f32.mxu1 %vm14955_vm1, %v18293_v24  ;;  %13666 = vmatprep.subr.mxu0 %v18293_v24 }
 0x2e3   :  { %13641 = vmatprep.subr.mxu1 %v18293_v24 }
 0x2e4   :  { %v1713_v40 = vpop.permute.xlu1 %1712  ;;  %13639 = vmatmul.mubr.msk.f32.vlgmr.msra.gmra.mrb[10].mxu1 %vm855_vm2, %v15587_v22  ;;  %13659 = vmatmul.mubr.msk.f32.vlgmr.msra.gmra.mrb[16].mxu0 %vm855_vm2, %v15590_v30  ;;  %v1791_v1 = vpop.permute.xlu0 %1790 }
 0x2e5   :  { %13642 = vmatpush3.xpose.msk.msra.mxu1 %vm855_vm2, %v1323_v43  ;;  %13667 = vmatpush3.xpose.msk.msra.mxu0 %vm855_vm2, %v1713_v40 }
 0x2e6   :  { %13643 = vmatprep.mubr.msk.f32.mxu1 %vm14955_vm1, %v18293_v24  ;;  %13668 = vmatprep.mubr.msk.f32.mxu0 %vm14955_vm1, %v18293_v24 }
 0x2e7   :  { %13646 = vmatprep.subr.mxu1 %v18293_v24  ;;  %13676 = vmatprep.subr.mxu0 %v18293_v24 }
 0x2e8   :  { %v1869_v36 = vpop.permute.xlu1 %1868  ;;  %13644 = vmatmul.mubr.msk.f32.vlgmr.msra.gmra.mrb[12].mxu1 %vm855_vm2, %v15604_v32  ;;  %13669 = vmatmul.mubr.msk.f32.vlgmr.msra.gmra.mrb[18].mxu0 %vm855_vm2, %v15607_v35  ;;  %v1947_v19 = vpop.permute.xlu0 %1946 }
 0x2e9   :  { %13647 = vmatpush3.xpose.msk.msra.mxu1 %vm855_vm2, %v1401_v27  ;;  %13677 = vmatpush3.xpose.msk.msra.mxu0 %vm855_vm2, %v1869_v36 }
 0x2ea   :  { %13648 = vmatprep.mubr.msk.f32.mxu1 %vm14955_vm1, %v18293_v24  ;;  %13678 = vmatprep.mubr.msk.f32.mxu0 %vm14955_vm1, %v18293_v24 }
 0x2eb   :  { %13686 = vmatprep.subr.mxu0 %v18293_v24  ;;  %13651 = vmatprep.subr.mxu1 %v18293_v24 }
 0x2ec   :  { %13679 = vmatmul.mubr.msk.f32.vlgmr.msra.gmra.mrb[20].mxu0 %vm855_vm2, %v15622_v42  ;;  %v2025_v48 = vpop.permute.xlu1 %2024  ;;  %13649 = vmatmul.mubr.msk.f32.vlgmr.msra.gmra.mrb[14].mxu1 %vm855_vm2, %v15625_v54  ;;  %v2278_v23 = vpop.permute.xlu0 %2277 }
 0x2ed   :  { %13652 = vmatpush3.xpose.msk.msra.mxu1 %vm855_vm2, %v1479_v29  ;;  %13687 = vmatpush3.xpose.msk.msra.mxu0 %vm855_vm2, %v2025_v48 }
 0x2ee   :  { %13653 = vmatprep.mubr.msk.f32.mxu1 %vm14955_vm1, %v18293_v24  ;;  %13688 = vmatprep.mubr.msk.f32.mxu0 %vm14955_vm1, %v18293_v24 }
 0x2ef   :  { %13696 = vmatprep.subr.mxu0 %v18293_v24  ;;  %13661 = vmatprep.subr.mxu1 %v18293_v24 }
 0x2f0   :  { %v2354_v13 = vpop.permute.xlu1 %2353  ;;  %13654 = vmatmul.mubr.msk.f32.vlgmr.msra.gmra.mrb[16].mxu1 %vm855_vm2, %v15640_v62  ;;  %13689 = vmatmul.mubr.msk.f32.vlgmr.msra.gmra.mrb[22].mxu0 %vm855_vm2, %v15643_v63 }
 0x2f1   :  { %13662 = vmatpush3.xpose.msk.msra.mxu1 %vm855_vm2, %v1635_v45  ;;  %13697 = vmatpush3.msra.mxu0 %v2354_v13 }
 0x2f2   :  { %13663 = vmatprep.mubr.msk.f32.mxu1 %vm14955_vm1, %v18293_v24  ;;  %13671 = vmatprep.subr.mxu1 %v18293_v24 }
 0x2f3   :  { %13698 = vmatprep.mubr.msk.f32.mxu0 %vm14955_vm1, %v18293_v24  ;;  %13706 = vmatprep.subr.mxu0 %v18293_v24 }
 0x2f4   :  { %13664 = vmatmul.mubr.msk.f32.vlgmr.msra.gmra.mrb[18].mxu1 %vm855_vm2, %v15655_v26 }
 0x2f5   :  { %13672 = vmatpush3.xpose.msk.msra.mxu1 %vm855_vm2, %v1791_v1  ;;  %13673 = vmatprep.mubr.msk.f32.mxu1 %vm14955_vm1, %v18293_v24 }
 0x2f6   :  { %13681 = vmatprep.subr.mxu1 %v18293_v24 }
 0x2f8   :  { %13674 = vmatmul.mubr.msk.f32.vlgmr.msra.gmra.mrb[20].mxu1 %vm855_vm2, %v15667_v21 }
 0x2f9   :  { %13682 = vmatpush3.xpose.msk.msra.mxu1 %vm855_vm2, %v1947_v19  ;;  %13683 = vmatprep.mubr.msk.f32.mxu1 %vm14955_vm1, %v18293_v24 }
 0x2fa   :  { %13691 = vmatprep.subr.mxu1 %v18293_v24 }
 0x2fc   :  { %13684 = vmatmul.mubr.msk.f32.vlgmr.msra.gmra.mrb[22].mxu1 %vm855_vm2, %v15676_v28 }
 0x2fd   :  { %13692 = vmatpush3.msra.mxu1 %v2278_v23  ;;  %13693 = vmatprep.mubr.msk.f32.mxu1 %vm14955_vm1, %v18293_v24 }
 0x2fe   :  { %13701 = vmatprep.subr.mxu1 %v18293_v24 }
 0x3a3   :  { %v927_v27 = vpop.f32.mrb[0].mxu1 }
 0x3a4   :  { %v15687_v43 = vadd.f32 %v927_v27, %v15684_v5  ;;  %v13615_v50 = vpop.f32.mrb[1].mxu1 }
 0x3a6   :  { %v2101_v29 = vsel %vm855_vm2, %v15687_v43, -inf }
 0x3a7   :  { %2102 = vmax.xlane.f32.xlu0 %v2101_v29  ;;  %v1005_v40 = vpop.f32.mrb[2].mxu1 }
 0x3a8   :  { %v15692_v36 = vadd.f32 %v1005_v40, %v15684_v5  ;;  %v13620_v45 = vpop.f32.mrb[3].mxu1 }
 0x3aa   :  { %v2104_v48 = vsel %vm855_vm2, %v15692_v36, -inf }
 0x3ab   :  { %2105 = vmax.xlane.f32.xlu1 %v2104_v48  ;;  %v1083_v1 = vpop.f32.mrb[4].mxu1 }
 0x3ac   :  { %v15697_v13 = vadd.f32 %v1083_v1, %v15684_v5  ;;  %v13625_v19 = vpop.f32.mrb[5].mxu1 }
 0x3ae   :  { %v2107_v23 = vsel %vm855_vm2, %v15697_v13, -inf }
 0x3af   :  { %2108 = vmax.xlane.f32.xlu0 %v2107_v23  ;;  %v1161_v27 = vpop.f32.mrb[6].mxu1 }
 0x3b0   :  { %v15702_v50 = vadd.f32 %v1161_v27, %v15684_v5  ;;  %v13630_v29 = vpop.f32.mrb[7].mxu1 }
 0x3b2   :  { %v2110_v40 = vsel %vm855_vm2, %v15702_v50, -inf }
 0x3b3   :  { %2111 = vmax.xlane.f32.xlu0 %v2110_v40  ;;  %v1239_v45 = vpop.f32.mrb[8].mxu1 }
 0x3b4   :  { %v15707_v48 = vadd.f32 %v1239_v45, %v15684_v5  ;;  %v13635_v1 = vpop.f32.mrb[9].mxu1 }
 0x3b6   :  { %v2113_v19 = vsel %vm855_vm2, %v15707_v48, -inf }
 0x3b7   :  { %v1629_v24 = vpop.f32.mrb[16].mxu0  ;;  %2114 = vmax.xlane.f32.xlu0 %v2113_v19  ;;  %v1317_v23 = vpop.f32.mrb[10].mxu1 }
 0x3b8   :  { %v15712_v20 = vadd.f32 %v1629_v24, %v15684_v5  ;;  %v13640_v27 = vpop.f32.mrb[11].mxu1  ;;  %v13660_v29 = vpop.f32.mrb[17].mxu0  ;;  %v15723_v52 = vadd.f32 %v1317_v23, %v15684_v5 }
 0x3ba   :  { %v2128_v8 = vsel %vm855_vm2, %v15712_v20, -inf }
 0x3bb   :  { %v1785_v40 = vpop.f32.mrb[18].mxu0  ;;  %2129 = vmax.xlane.f32.xlu1 %v2128_v8  ;;  %v1395_v56 = vpop.f32.mrb[12].mxu1 }
 0x3bc   :  { %v15717_v45 = vadd.f32 %v1785_v40, %v15684_v5  ;;  %v15720_v1 = vadd.f32 %v1395_v56, %v15684_v5  ;;  %v13645_v57 = vpop.f32.mrb[13].mxu1  ;;  %v13670_v19 = vpop.f32.mrb[19].mxu0 }
 0x3bd   :  { %v2116_v57 = vsel %vm855_vm2, %v15723_v52, -inf }
 0x3be   :  { %v2134_v24 = vsel %vm855_vm2, %v15717_v45, -inf  ;;  %v2119_v27 = vsel %vm855_vm2, %v15720_v1, -inf }
 0x3bf   :  { %v1941_v29 = vpop.f32.mrb[20].mxu0  ;;  %2135 = vmax.xlane.f32.xlu1 %v2134_v24  ;;  %2120 = vmax.xlane.f32.xlu0 %v2119_v27  ;;  %v1473_v8 = vpop.f32.mrb[14].mxu1 }
 0x3c0   :  { %v13650_v40 = vpop.f32.mrb[15].mxu1  ;;  %v13680_v53 = vpop.f32.mrb[21].mxu0  ;;  %v15730_v56 = vadd.f32 %v1941_v29, %v15684_v5 }
 0x3c2   :  { %v2140_v53 = vsel %vm855_vm2, %v15730_v56, -inf }
 0x3c3   :  { %v2097_v23 = vpop.f32.mrb[22].mxu0  ;;  %2117 = vmax.xlane.f32.xlu1 %v2116_v57  ;;  %v1551_v19 = vpop.f32.mrb[16].mxu1 }
 0x3c4   :  { %v15735_v41 = vadd.f32 %v1551_v19, %v15684_v5  ;;  %v13655_v46 = vpop.f32.mrb[17].mxu1  ;;  %v13690_v37 = vpop.f32.mrb[23].mxu0  ;;  %v15738_v24 = vadd.f32 %v2097_v23, %v15684_v5  ;;  %v15748_v19 = vadd.f32 %v1473_v8, %v15684_v5 }
 0x3c6   :  { %v2125_v27 = vsel %vm855_vm2, %v15735_v41, -inf  ;;  %v2146_v37 = vsel %vm855_vm2, %v15738_v24, -inf }
 0x3c7   :  { %2141 = vmax.xlane.f32.xlu1 %v2140_v53  ;;  %2126 = vmax.xlane.f32.xlu0 %v2125_v27  ;;  %v1707_v29 = vpop.f32.mrb[18].mxu1 }
 0x3c8   :  { %v15745_v40 = vadd.f32 %v1707_v29, %v15684_v5  ;;  %v13665_v57 = vpop.f32.mrb[19].mxu1  ;;  %v2122_v29 = vsel %vm855_vm2, %v15748_v19, -inf }
 0x3ca   :  { %v2131_v46 = vsel %vm855_vm2, %v15745_v40, -inf }
 0x3cb   :  { %2147 = vmax.xlane.f32.xlu1 %v2146_v37  ;;  %2132 = vmax.xlane.f32.xlu0 %v2131_v46  ;;  %v1863_v23 = vpop.f32.mrb[20].mxu1  ;;  %v15774_v46 = vpop.permute.xlu1 %2505 }
 0x3cc   :  { %v15755_v53 = vadd.f32 %v1863_v23, %v15684_v5  ;;  %v13675_v27 = vpop.f32.mrb[21].mxu1 }
 0x3ce   :  { %v2137_v8 = vsel %vm855_vm2, %v15755_v53, -inf }
 0x3cf   :  { %2123 = vmax.xlane.f32.xlu1 %v2122_v29  ;;  %2138 = vmax.xlane.f32.xlu0 %v2137_v8  ;;  %v2019_v57 = vpop.f32.mrb[22].mxu1 }
 0x3d0   :  { %v15762_v38 = vadd.f32 %v2019_v57, %v15684_v5  ;;  %v13685_v7 = vpop.f32.mrb[23].mxu1  ;;  %v15776_v5 = vpop.permute.xlu1 %2657 }
 0x3d1   :  { %v15778_v7 = vpop.permute.xlu0 %2429 }
 0x3d2   :  { %v2143_v37 = vsel %vm855_vm2, %v15762_v38, -inf }
 0x3d3   :  { %2144 = vmax.xlane.f32.xlu0 %v2143_v37 }
 0x3d4   :  { %v15780_v23 = vpop.permute.xlu1 %2733 }
 0x3d5   :  { %v15782_v27 = vpop.permute.xlu0 %2581 }
 0x3d8   :  { %v15784_v29 = vpop.permute.xlu1 %2809 }
 0x3d9   :  { %18349 = vst [vmem:[#allocation35_spill] sm:$0xff] %v15784_v29  ;;  %v15786_v8 = vpop.permute.xlu0 %2885 }
 0x3dc   :  { %v15788_v57 = vpop.permute.xlu1 %2961 }
 0x3dd   :  { %18350 = vst [vmem:[#allocation36_spill] sm:$0xff] %v15788_v57  ;;  %v15790_v37 = vpop.permute.xlu0 %3037 }
 0x3de   :  { %18351 = vst [vmem:[#allocation37_spill] sm:$0xff] %v15790_v37 }
 0x3e0   :  { %3885 = vrot.lane.b32.xlu1 %v15462_v39, %s14958_s29  ;;  %v15792_v9 = vpop.permute.xlu1 %3113 }
 0x3e1   :  { %18352 = vst [vmem:[#allocation38_spill] sm:$0xff] %v15792_v9  ;;  %v15794_v4 = vpop.permute.xlu0 %3189 }
 0x3e2   :  { %18353 = vst [vmem:[#allocation39_spill] sm:$0xff] %v15794_v4 }
 0x3e4   :  { %3883 = vrot.lane.b32.xlu1 %v15587_v22, %s14959_s16  ;;  %v15796_v6 = vpop.permute.xlu1 %3265 }
 0x3e5   :  { %18354 = vst [vmem:[#allocation40_spill] sm:$0xff] %v15796_v6  ;;  %v15798_v59 = vpop.permute.xlu0 %3495 }
 0x3e6   :  { %18355 = vst [vmem:[#allocation41_spill] sm:$0xff] %v15798_v59 }
 0x3e8   :  { %v15800_v61 = vpop.permute.xlu1 %3417 }
 0x3e9   :  { %3807 = vrot.lane.b32.xlu0 %v15456_v34, %s14958_s29  ;;  %18356 = vst [vmem:[#allocation42_spill] sm:$0xff] %v15800_v61  ;;  %v15802_v58 = vpop.permute.xlu0 %3493 }
 0x3ea   :  { %18357 = vst [vmem:[#allocation43_spill] sm:$0xff] %v15802_v58 }
 0x3ec   :  { %v15804_v60 = vpop.permute.xlu1 %3573 }
 0x3ed   :  { %3805 = vrot.lane.b32.xlu0 %v15576_v44, %s14959_s16  ;;  %18358 = vst [vmem:[#allocation44_spill] sm:$0xff] %v15804_v60  ;;  %v15806_v44 = vpop.permute.xlu0 %3651 }
 0x3ee   :  { %18359 = vst [vmem:[#allocation45_spill] sm:$0xff] %v15806_v44 }
 0x3f0   :  { %v15808_v22 = vpop.permute.xlu1 %3571 }
 0x3f1   :  { %18360 = vst [vmem:[#allocation46_spill] sm:$0xff] %v15808_v22  ;;  %v15810_v57 = vpop.permute.xlu0 %3649 }
 0x3f2   :  { %18361 = vst [vmem:[#allocation47_spill] sm:$0xff] %v15810_v57 }
 0x3f4   :  { %v15812_v37 = vpop.permute.xlu1 %3729 }
 0x3f5   :  { %18362 = vst [vmem:[#allocation48_spill] sm:$0xff] %v15812_v37  ;;  %v15814_v9 = vpop.permute.xlu0 %3341 }
 0x3f6   :  { %18363 = vst [vmem:[#allocation49_spill] sm:$0xff] %v15814_v9 }
 0x3f8   :  { %v15816_v4 = vpop.permute.xlu1 %3727 }
 0x3f9   :  { %18364 = vst [vmem:[#allocation50_spill] sm:$0xff] %v15816_v4 }
 0x434   :  { %v2103_v6 = vpop.xlane.xlu0 %2102 }
 0x435   :  { %v2149_v59 = vsub.f32 %v15687_v43, %v2103_v6 }
 0x437   :  { %v2165_v61 = vmul.f32 1.442695, %v2149_v59 }
 0x438   :  { %v2106_v16 = vpop.xlane.xlu1 %2105 }
 0x439   :  { %14498 = vpow2.f32 %v2165_v61  ;;  %v2150_v58 = vsub.f32 %v15692_v36, %v2106_v16 }
 0x43b   :  { %v2167_v60 = vmul.f32 1.442695, %v2150_v58 }
 0x43c   :  { %v2109_v44 = vpop.xlane.xlu0 %2108 }
 0x43d   :  { %14500 = vpow2.f32 %v2167_v60  ;;  %v2151_v22 = vsub.f32 %v15697_v13, %v2109_v44 }
 0x43f   :  { %v2169_v57 = vmul.f32 1.442695, %v2151_v22 }
 0x440   :  { %v2112_v14 = vpop.xlane.xlu0 %2111 }
 0x441   :  { %14502 = vpow2.f32 %v2169_v57  ;;  %v2152_v37 = vsub.f32 %v15702_v50, %v2112_v14 }
 0x443   :  { %v15822_v9 = vpop.eup %14498  ;;  %v2171_v4 = vmul.f32 1.442695, %v2152_v37 }
 0x444   :  { %v2115_v29 = vpop.xlane.xlu0 %2114  ;;  %v2197_v59 = vsel %vm855_vm2, %v15822_v9, 0.0 }
 0x445   :  { %14504 = vpow2.f32 %v2171_v4  ;;  %v2153_v61 = vsub.f32 %v15707_v48, %v2115_v29  ;;  %2198 = vadd.xlane.f32.xlu0 %v2197_v59 }
 0x447   :  { %v15827_v58 = vpop.eup %14500  ;;  %v2173_v60 = vmul.f32 1.442695, %v2153_v61 }
 0x448   :  { %v2130_v6 = vpop.xlane.xlu1 %2129  ;;  %v2200_v16 = vsel %vm855_vm2, %v15827_v58, 0.0 }
 0x449   :  { %14506 = vpow2.f32 %v2173_v60  ;;  %v2158_v14 = vsub.f32 %v15712_v20, %v2130_v6  ;;  %2201 = vadd.xlane.f32.xlu1 %v2200_v16 }
 0x44b   :  { %v15832_v44 = vpop.eup %14502  ;;  %v2183_v22 = vmul.f32 1.442695, %v2158_v14 }
 0x44c   :  { %v2136_v43 = vpop.xlane.xlu1 %2135  ;;  %v2121_v36 = vpop.xlane.xlu0 %2120  ;;  %v2203_v4 = vsel %vm855_vm2, %v15832_v44, 0.0 }
 0x44d   :  { %14508 = vpow2.f32 %v2183_v22  ;;  %v2160_v13 = vsub.f32 %v15717_v45, %v2136_v43  ;;  %v2155_v50 = vsub.f32 %v15720_v1, %v2121_v36  ;;  %2204 = vadd.xlane.f32.xlu0 %v2203_v4 }
 0x44f   :  { %v15838_v48 = vpop.eup %14504  ;;  %v2187_v29 = vmul.f32 1.442695, %v2160_v13  ;;  %v2177_v57 = vmul.f32 1.442695, %v2155_v50 }
 0x450   :  { %v2118_v20 = vpop.xlane.xlu1 %2117  ;;  %v2206_v37 = vsel %vm855_vm2, %v15838_v48, 0.0 }
 0x451   :  { %14510 = vpow2.f32 %v2187_v29  ;;  %v2154_v59 = vsub.f32 %v15723_v52, %v2118_v20  ;;  %2207 = vadd.xlane.f32.xlu1 %v2206_v37 }
 0x452   :  { %14512 = vpow2.f32 %v2177_v57 }
 0x453   :  { %v15843_v61 = vpop.eup %14506  ;;  %v2175_v60 = vmul.f32 1.442695, %v2154_v59 }
 0x454   :  { %v2142_v45 = vpop.xlane.xlu1 %2141  ;;  %v2127_v6 = vpop.xlane.xlu0 %2126  ;;  %v2209_v1 = vsel %vm855_vm2, %v15843_v61, 0.0 }
 0x455   :  { %14514 = vpow2.f32 %v2175_v60  ;;  %v2162_v16 = vsub.f32 %v15730_v56, %v2142_v45  ;;  %2210 = vadd.xlane.f32.xlu0 %v2209_v1  ;;  %v2157_v43 = vsub.f32 %v15735_v41, %v2127_v6 }
 0x457   :  { %v15848_v14 = vpop.eup %14508  ;;  %v2191_v22 = vmul.f32 1.442695, %v2162_v16  ;;  %v2181_v29 = vmul.f32 1.442695, %v2157_v43 }
 0x458   :  { %v2148_v52 = vpop.xlane.xlu1 %2147  ;;  %v2133_v36 = vpop.xlane.xlu0 %2132  ;;  %v2224_v4 = vsel %vm855_vm2, %v15848_v14, 0.0 }
 0x459   :  { %14516 = vpow2.f32 %v2191_v22  ;;  %v2164_v13 = vsub.f32 %v15738_v24, %v2148_v52  ;;  %2225 = vadd.xlane.f32.xlu1 %v2224_v4  ;;  %v2159_v56 = vsub.f32 %v15745_v40, %v2133_v36 }
 0x45b   :  { %v15854_v50 = vpop.eup %14510  ;;  %v2195_v57 = vmul.f32 1.442695, %v2164_v13  ;;  %v2185_v6 = vmul.f32 1.442695, %v2159_v56 }
 0x45c   :  { %v15857_v20 = vpop.eup %14512  ;;  %v2124_v37 = vpop.xlane.xlu1 %2123  ;;  %v2230_v41 = vsel %vm855_vm2, %v15854_v50, 0.0 }
 0x45d   :  { %v2139_v59 = vpop.xlane.xlu0 %2138  ;;  %14518 = vpow2.f32 %v2195_v57  ;;  %v2156_v60 = vsub.f32 %v15748_v19, %v2124_v37  ;;  %2231 = vadd.xlane.f32.xlu1 %v2230_v41  ;;  %v2215_v24 = vsel %vm855_vm2, %v15857_v20, 0.0 }
 0x45e   :  { %2216 = vadd.xlane.f32.xlu0 %v2215_v24  ;;  %14520 = vpow2.f32 %v2181_v29  ;;  %v2161_v1 = vsub.f32 %v15755_v53, %v2139_v59 }
 0x45f   :  { %v15864_v45 = vpop.eup %14514  ;;  %v2179_v40 = vmul.f32 1.442695, %v2156_v60 }
 0x460   :  { %v2212_v16 = vsel %vm855_vm2, %v15864_v45, 0.0  ;;  %v2189_v19 = vmul.f32 1.442695, %v2161_v1  ;;  %v15950_v1 = vpop.permute.xlu1 %3885 }
 0x461   :  { %14522 = vpow2.f32 %v2179_v40  ;;  %2213 = vadd.xlane.f32.xlu1 %v2212_v16  ;;  %v2145_v41 = vpop.xlane.xlu0 %2144 }
 0x462   :  { %14524 = vpow2.f32 %v2185_v6  ;;  %v2163_v60 = vsub.f32 %v15762_v38, %v2145_v41 }
 0x463   :  { %v15869_v22 = vpop.eup %14516  ;;  %14526 = vpow2.f32 %v2189_v19 }
 0x464   :  { %v2236_v43 = vsel %vm855_vm2, %v15869_v22, 0.0  ;;  %v2193_v24 = vmul.f32 1.442695, %v2163_v60  ;;  %v15958_v19 = vpop.permute.xlu1 %3883  ;;  %v18365_v60 = vmov 0.0  }
 0x465   :  { %2237 = vadd.xlane.f32.xlu1 %v2236_v43  ;;  %v15944_v40 = vpop.permute.xlu0 %3807 }
 0x466   :  { %14528 = vpow2.f32 %v2193_v24 }
 0x467   :  { %v15873_v52 = vpop.eup %14518 }
 0x468   :  { %v2242_v36 = vsel %vm855_vm2, %v15873_v52, 0.0  ;;  %v15877_v53 = vpop.eup %14520 }
 0x469   :  { %2243 = vadd.xlane.f32.xlu0 %v2242_v36  ;;  %v2221_v29 = vsel %vm855_vm2, %v15877_v53, 0.0  ;;  %v15952_v16 = vpop.permute.xlu0 %3805 }
 0x46b   :  { %v15879_v4 = vpop.eup %14522 }
 0x46c   :  { %v2218_v13 = vsel %vm855_vm2, %v15879_v4, 0.0  ;;  %v15885_v57 = vpop.eup %14524 }
 0x46d   :  { %2219 = vadd.xlane.f32.xlu1 %v2218_v13  ;;  %2222 = vadd.xlane.f32.xlu0 %v2221_v29  ;;  %v2227_v56 = vsel %vm855_vm2, %v15885_v57, 0.0  ;;  %v15889_v37 = vpop.eup %14526 }
 0x46e   :  { %v2233_v59 = vsel %vm855_vm2, %v15889_v37, 0.0 }
 0x470   :  { %v15910_v6 = vpop.eup %14528 }
 0x471   :  { %2228 = vadd.xlane.f32.xlu0 %v2227_v56  ;;  %v2239_v38 = vsel %vm855_vm2, %v15910_v6, 0.0 }
 0x475   :  { %2234 = vadd.xlane.f32.xlu0 %v2233_v59 }
 0x47e   :  { %4041 = vrot.lane.b32.xlu1 %v15470_v47, %s14958_s29 }
 0x482   :  { %4039 = vrot.lane.b32.xlu1 %v15625_v54, %s14959_s16 }
 0x48b   :  { %3963 = vrot.lane.b32.xlu0 %v15464_v17, %s14958_s29 }
 0x48f   :  { %3961 = vrot.lane.b32.xlu0 %v15604_v32, %s14959_s16 }
 0x493   :  { %4119 = vrot.lane.b32.xlu0 %v15472_v10, %s14958_s29 }
 0x497   :  { %4117 = vrot.lane.b32.xlu0 %v15640_v62, %s14959_s16 }
 0x49b   :  { %4275 = vrot.lane.b32.xlu0 %v15480_v51, %s14958_s29 }
 0x49f   :  { %4273 = vrot.lane.b32.xlu0 %v15655_v26, %s14959_s16 }
 0x4a3   :  { %4431 = vrot.lane.b32.xlu0 %v15488_v55, %s14958_s29 }
 0x4a6   :  { %2240 = vadd.xlane.f32.xlu1 %v2239_v38 }
 0x4a7   :  { %4429 = vrot.lane.b32.xlu0 %v15667_v21, %s14959_s16 }
 0x4ab   :  { %4587 = vrot.lane.b32.xlu0 %v15496_v18, %s14958_s29 }
 0x4af   :  { %4585 = vrot.lane.b32.xlu0 %v15676_v28, %s14959_s16 }
 0x4b3   :  { %4917 = vrot.lane.b32.xlu0 %v15444_v25, %s14960_s17 }
 0x4b7   :  { %5069 = vrot.lane.b32.xlu0 %v15450_v31, %s14960_s17  ;;  %4197 = vrot.lane.b32.xlu1 %v15478_v49, %s14958_s29 }
 0x4bb   :  { %5221 = vrot.lane.b32.xlu0 %v15456_v34, %s14960_s17  ;;  %4195 = vrot.lane.b32.xlu1 %v15590_v30, %s14959_s16 }
 0x4bf   :  { %5525 = vrot.lane.b32.xlu0 %v15472_v10, %s14960_s17  ;;  %4353 = vrot.lane.b32.xlu1 %v15486_v0, %s14958_s29 }
 0x4c3   :  { %5677 = vrot.lane.b32.xlu0 %v15480_v51, %s14960_s17  ;;  %4351 = vrot.lane.b32.xlu1 %v15607_v35, %s14959_s16 }
 0x4c7   :  { %5829 = vrot.lane.b32.xlu0 %v15488_v55, %s14960_s17  ;;  %4509 = vrot.lane.b32.xlu1 %v15494_v3, %s14958_s29 }
 0x4cb   :  { %5981 = vrot.lane.b32.xlu0 %v15496_v18, %s14960_s17  ;;  %4507 = vrot.lane.b32.xlu1 %v15622_v42, %s14959_s16 }
 0x4cf   :  { %6135 = vrot.lane.b32.xlu0 %v15444_v25, %s14961_s18  ;;  %4665 = vrot.lane.b32.xlu1 %v15502_v11, %s14958_s29 }
 0x4d2   :  { %v2199_v43 = vpop.xlane.xlu0 %2198 }
 0x4d3   :  { %14530 = vrcp.f32 %v2199_v43  ;;  %6133 = vrot.lane.b32.xlu0 %v15521_v12, %s14962_s19  ;;  %4663 = vrot.lane.b32.xlu1 %v15643_v63, %s14959_s16 }
 0x4d6   :  { %v2202_v36 = vpop.xlane.xlu1 %2201 }
 0x4d7   :  { %14532 = vrcp.f32 %v2202_v36  ;;  %6291 = vrot.lane.b32.xlu0 %v15450_v31, %s14961_s18  ;;  %4993 = vrot.lane.b32.xlu1 %v15442_v2, %s14960_s17 }
 0x4da   :  { %v2205_v13 = vpop.xlane.xlu0 %2204 }
 0x4db   :  { %14534 = vrcp.f32 %v2205_v13  ;;  %6289 = vrot.lane.b32.xlu0 %v15530_v15, %s14962_s19  ;;  %5145 = vrot.lane.b32.xlu1 %v15454_v33, %s14960_s17 }
 0x4dd   :  { %v14531_v29 = vpop.eup %14530 }
 0x4de   :  { %v2208_v56 = vpop.xlane.xlu1 %2207  ;;  %v2261_v59 = vmul.f32 %v14531_v29, %v15822_v9 }
 0x4df   :  { %14536 = vrcp.f32 %v2208_v56  ;;  %5297 = vrot.lane.b32.xlu1 %v15462_v39, %s14960_s17 }
 0x4e0   :  { %13694 = vmatmul.mubr.msk.f32.vlgmr.msra.gmra.mrb[24].mxu1 %vm855_vm2, %v2261_v59 }
 0x4e1   :  { %v14533_v41 = vpop.eup %14532  ;;  %13702 = vmatpush3.msra.mxu1 %v15778_v7  ;;  %13703 = vmatprep.mubr.msk.f32.mxu1 %vm14955_vm1, %v18365_v60 }
 0x4e2   :  { %v2211_v24 = vpop.xlane.xlu0 %2210  ;;  %v2262_v38 = vmul.f32 %v14533_v41, %v15827_v58  ;;  %13711 = vmatprep.subr.mxu1 %v18365_v60 }
 0x4e3   :  { %14538 = vrcp.f32 %v2211_v24  ;;  %5373 = vrot.lane.b32.xlu1 %v15464_v17, %s14960_s17 }
 0x4e4   :  { %13699 = vmatmul.mubr.msk.f32.vlgmr.msra.gmra.mrb[24].mxu0 %vm855_vm2, %v2262_v38 }
 0x4e5   :  { %v14535_v9 = vpop.eup %14534  ;;  %13707 = vmatpush3.msra.mxu0 %v15774_v46  ;;  %13708 = vmatprep.mubr.msk.f32.mxu0 %vm14955_vm1, %v18365_v60 }
 0x4e6   :  { %v2226_v7 = vpop.xlane.xlu1 %2225  ;;  %v2263_v43 = vmul.f32 %v14535_v9, %v15832_v44  ;;  %13716 = vmatprep.subr.mxu0 %v18365_v60 }
 0x4e7   :  { %5449 = vrot.lane.b32.xlu1 %v15470_v47, %s14960_s17 }
 0x4e8   :  { %13704 = vmatmul.mubr.msk.f32.vlgmr.msra.gmra.mrb[26].mxu1 %vm855_vm2, %v2263_v43 }
 0x4e9   :  { %v14537_v58 = vpop.eup %14536  ;;  %13712 = vmatpush3.msra.mxu1 %v15782_v27  ;;  %13713 = vmatprep.mubr.msk.f32.mxu1 %vm14955_vm1, %v18365_v60 }
 0x4ea   :  { %v2232_v46 = vpop.xlane.xlu1 %2231  ;;  %v2264_v36 = vmul.f32 %v14537_v58, %v15838_v48  ;;  %13721 = vmatprep.subr.mxu1 %v18365_v60 }
 0x4eb   :  { %v2217_v13 = vpop.xlane.xlu0 %2216  ;;  %5601 = vrot.lane.b32.xlu1 %v15478_v49, %s14960_s17 }
 0x4ec   :  { %14540 = vrcp.f32 %v2217_v13  ;;  %13709 = vmatmul.mubr.msk.f32.vlgmr.msra.gmra.mrb[26].mxu0 %vm855_vm2, %v2264_v36  ;;  %v18368_v36 = vld [vmem:[#allocation32_spill] sm:$0xff] }
 0x4ed   :  { %v14539_v44 = vpop.eup %14538  ;;  %13717 = vmatpush3.msra.mxu0 %v15776_v5  ;;  %13718 = vmatprep.mubr.msk.f32.mxu0 %vm14955_vm1, %v18365_v60 }
 0x4ee   :  { %v2214_v27 = vpop.xlane.xlu1 %2213  ;;  %v2265_v29 = vmul.f32 %v14539_v44, %v15843_v61  ;;  %13726 = vmatprep.subr.mxu0 %v18365_v60 }
 0x4ef   :  { %14542 = vrcp.f32 %v2214_v27  ;;  %5753 = vrot.lane.b32.xlu1 %v15486_v0, %s14960_s17  ;;  %v18370_v27 = vld [vmem:[#allocation37_spill] sm:$0xff] }
 0x4f0   :  { %13714 = vmatmul.mubr.msk.f32.vlgmr.msra.gmra.mrb[28].mxu1 %vm855_vm2, %v2265_v29 }
 0x4f1   :  { %13722 = vmatpush3.msra.mxu1 %v15780_v23  ;;  %13723 = vmatprep.mubr.msk.f32.mxu1 %vm14955_vm1, %v18365_v60 }
 0x4f2   :  { %13731 = vmatprep.subr.mxu1 %v18365_v60  ;;  %v2238_v48 = vpop.xlane.xlu1 %2237 }
 0x4f3   :  { %5905 = vrot.lane.b32.xlu1 %v15494_v3, %s14960_s17 }
 0x4f6   :  { %v14541_v5 = vpop.eup %14540  ;;  %v2244_v61 = vpop.xlane.xlu0 %2243 }
 0x4f7   :  { %6057 = vrot.lane.b32.xlu1 %v15502_v11, %s14960_s17  ;;  %v2267_v56 = vmul.f32 %v14541_v5, %v15857_v20  ;;  %v18366_v20 = vld [vmem:[#allocation35_spill] sm:$0xff] }
 0x4f9   :  { %v14543_v59 = vpop.eup %14542  ;;  %13724 = vmatmul.mubr.msk.f32.vlgmr.msra.gmra.mrb[30].mxu1 %vm855_vm2, %v2267_v56 }
 0x4fa   :  { %13732 = vmatpush3.msra.mxu1 %v15786_v8  ;;  %v2220_v23 = vpop.xlane.xlu1 %2219  ;;  %v2223_v41 = vpop.xlane.xlu0 %2222  ;;  %v2266_v24 = vmul.f32 %v14543_v59, %v15864_v45  ;;  %13733 = vmatprep.mubr.msk.f32.mxu1 %vm14955_vm1, %v18365_v60  ;;  %v18367_v45 = vld [vmem:[#allocation31_spill] sm:$0xff]  ;;  %v18373_v59 = vld [vmem:[#allocation40_spill] sm:$0xff] }
 0x4fb   :  { %14544 = vrcp.f32 %v2220_v23  ;;  %6213 = vrot.lane.b32.xlu1 %v15442_v2, %s14961_s18  ;;  %13741 = vmatprep.subr.mxu1 %v18365_v60  ;;  %v18374_v23 = vld [vmem:[#allocation49_spill] sm:$0xff] }
 0x4fc   :  { %14546 = vrcp.f32 %v2223_v41  ;;  %13719 = vmatmul.mubr.msk.f32.vlgmr.msra.gmra.mrb[28].mxu0 %vm855_vm2, %v2266_v24  ;;  %v18375_v41 = vld [vmem:[#allocation42_spill] sm:$0xff] }
 0x4fd   :  { %14548 = vrcp.f32 %v2226_v7  ;;  %13727 = vmatpush3.msra.mxu0 %v18366_v20  ;;  %13728 = vmatprep.mubr.msk.f32.mxu0 %vm14955_vm1, %v18365_v60  ;;  %v18377_v20 = vld [vmem:[#allocation46_spill] sm:$0xff] }
 0x4fe   :  { %v2229_v8 = vpop.xlane.xlu0 %2228  ;;  %13736 = vmatprep.subr.mxu0 %v18365_v60 }
 0x4ff   :  { %14550 = vrcp.f32 %v2229_v8  ;;  %6211 = vrot.lane.b32.xlu1 %v18367_v45, %s14962_s19  ;;  %v18378_v8 = vld [vmem:[#allocation48_spill] sm:$0xff] }
 0x500   :  { %14552 = vrcp.f32 %v2232_v46  ;;  %v18369_v46 = vld [vmem:[#allocation36_spill] sm:$0xff] }
 0x502   :  { %v2235_v38 = vpop.xlane.xlu0 %2234 }
 0x503   :  { %14554 = vrcp.f32 %v2235_v38  ;;  %6369 = vrot.lane.b32.xlu1 %v15454_v33, %s14961_s18  ;;  %v4042_v38 = vpop.permute.xlu1 %4041 }
 0x504   :  { %14556 = vrcp.f32 %v2238_v48  ;;  %v18371_v48 = vld [vmem:[#allocation38_spill] sm:$0xff] }
 0x505   :  { %v14545_v9 = vpop.eup %14544  ;;  %14558 = vrcp.f32 %v2244_v61  ;;  %v18372_v61 = vld [vmem:[#allocation39_spill] sm:$0xff] }
 0x506   :  { %v14547_v7 = vpop.eup %14546  ;;  %v2268_v43 = vmul.f32 %v14545_v9, %v15879_v4  ;;  %v3964_v9 = vpop.permute.xlu0 %3963 }
 0x507   :  { %v14549_v58 = vpop.eup %14548  ;;  %6367 = vrot.lane.b32.xlu1 %v18368_v36, %s14962_s19  ;;  %v2269_v13 = vmul.f32 %v14547_v7, %v15877_v53  ;;  %v4040_v7 = vpop.permute.xlu1 %4039 }
 0x508   :  { %13729 = vmatmul.mubr.msk.f32.vlgmr.msra.gmra.mrb[30].mxu0 %vm855_vm2, %v2268_v43  ;;  %v2270_v4 = vmul.f32 %v14549_v58, %v15848_v14 }
 0x509   :  { %v14551_v44 = vpop.eup %14550  ;;  %13734 = vmatmul.mubr.msk.f32.vlgmr.msra.gmra.mrb[32].mxu1 %vm855_vm2, %v2269_v13  ;;  %13737 = vmatpush3.msra.mxu0 %v18369_v46 }
 0x50a   :  { %13742 = vmatpush3.msra.mxu1 %v18370_v27  ;;  %13738 = vmatprep.mubr.msk.f32.mxu0 %vm14955_vm1, %v18365_v60  ;;  %v2271_v29 = vmul.f32 %v14551_v44, %v15885_v57  ;;  %v14553_v5 = vpop.eup %14552  ;;  %v3962_v43 = vpop.permute.xlu0 %3961 }
 0x50b   :  { %13743 = vmatprep.mubr.msk.f32.mxu1 %vm14955_vm1, %v18365_v60  ;;  %13746 = vmatprep.subr.mxu0 %v18365_v60  ;;  %v2272_v14 = vmul.f32 %v14553_v5, %v15854_v50  ;;  %v18380_v5 = vld [vmem:[#allocation41_spill] sm:$0xff] }
 0x50c   :  { %13751 = vmatprep.subr.mxu1 %v18365_v60  ;;  %13739 = vmatmul.mubr.msk.f32.vlgmr.msra.gmra.mrb[32].mxu0 %vm855_vm2, %v2270_v4 }
 0x50d   :  { %v14555_v53 = vpop.eup %14554  ;;  %13744 = vmatmul.mubr.msk.f32.vlgmr.msra.gmra.mrb[34].mxu1 %vm855_vm2, %v2271_v29  ;;  %13747 = vmatpush3.msra.mxu0 %v18371_v48 }
 0x50e   :  { %13752 = vmatpush3.msra.mxu1 %v18372_v61  ;;  %13748 = vmatprep.mubr.msk.f32.mxu0 %vm14955_vm1, %v18365_v60  ;;  %v2273_v57 = vmul.f32 %v14555_v53, %v15889_v37  ;;  %v14557_v56 = vpop.eup %14556  ;;  %v18381_v61 = vld [vmem:[#allocation43_spill] sm:$0xff] }
 0x50f   :  { %13753 = vmatprep.mubr.msk.f32.mxu1 %vm14955_vm1, %v18365_v60  ;;  %13756 = vmatprep.subr.mxu0 %v18365_v60  ;;  %v2274_v50 = vmul.f32 %v14557_v56, %v15869_v22  ;;  %v14559_v37 = vpop.eup %14558  ;;  %v18376_v22 = vld [vmem:[#allocation44_spill] sm:$0xff]  ;;  %v18383_v56 = vld [vmem:[#allocation47_spill] sm:$0xff] }
 0x510   :  { %13761 = vmatprep.subr.mxu1 %v18365_v60  ;;  %13749 = vmatmul.mubr.msk.f32.vlgmr.msra.gmra.mrb[34].mxu0 %vm855_vm2, %v2272_v14  ;;  %v2276_v24 = vmul.f32 %v14559_v37, %v15873_v52  ;;  %v18379_v52 = vld [vmem:[#allocation50_spill] sm:$0xff] }
 0x511   :  { %13754 = vmatmul.mubr.msk.f32.vlgmr.msra.gmra.mrb[36].mxu1 %vm855_vm2, %v2273_v57  ;;  %13757 = vmatpush3.msra.mxu0 %v18373_v59 }
 0x512   :  { %13762 = vmatpush3.msra.mxu1 %v18374_v23  ;;  %13758 = vmatprep.mubr.msk.f32.mxu0 %vm14955_vm1, %v18365_v60 }
 0x513   :  { %13766 = vmatprep.subr.mxu0 %v18365_v60  ;;  %13763 = vmatprep.mubr.msk.f32.mxu1 %vm14955_vm1, %v18365_v60 }
 0x514   :  { %13759 = vmatmul.mubr.msk.f32.vlgmr.msra.gmra.mrb[36].mxu0 %vm855_vm2, %v2274_v50  ;;  %13771 = vmatprep.subr.mxu1 %v18365_v60 }
 0x515   :  { %13767 = vmatpush3.msra.mxu0 %v18375_v41  ;;  %13768 = vmatprep.mubr.msk.f32.mxu0 %vm14955_vm1, %v18365_v60 }
 0x516   :  { %13776 = vmatprep.subr.mxu0 %v18365_v60 }
 0x518   :  { %13769 = vmatmul.mubr.msk.f32.vlgmr.msra.gmra.mrb[38].mxu0 %vm855_vm2, %v2276_v24 }
 0x519   :  { %13778 = vmatprep.mubr.msk.f32.mxu0 %vm14955_vm1, %v18365_v60 }
 0x51c   :  { %13777 = vmatpush3.xpose.msk.msra.mxu0 %vm855_vm2, %v18376_v22 }
 0x51d   :  { %13786 = vmatprep.subr.mxu0 %v18365_v60 }
 0x51f   :  { %13779 = vmatmul.mubr.msk.f32.vlgmr.msra.gmra.mrb[40].mxu0 %vm855_vm2, %v18377_v20 }
 0x520   :  { %13787 = vmatpush3.xpose.msk.msra.mxu0 %vm855_vm2, %v18378_v8  ;;  %13788 = vmatprep.mubr.msk.f32.mxu0 %vm14955_vm1, %v18365_v60 }
 0x521   :  { %13796 = vmatprep.subr.mxu0 %v18365_v60 }
 0x523   :  { %13789 = vmatmul.mubr.msk.f32.vlgmr.msra.gmra.mrb[42].mxu0 %vm855_vm2, %v18379_v52 }
 0x524   :  { %13797 = vmatpush3.xpose.msk.msra.mxu0 %vm855_vm2, %v15950_v1  ;;  %13798 = vmatprep.mubr.msk.f32.mxu0 %vm14955_vm1, %v18365_v60  ;;  %v4120_v1 = vpop.permute.xlu0 %4119 }
 0x525   :  { %13806 = vmatprep.subr.mxu0 %v18365_v60 }
 0x527   :  { %13799 = vmatmul.mubr.msk.f32.vlgmr.msra.gmra.mrb[44].mxu0 %vm855_vm2, %v15958_v19 }
 0x528   :  { %13807 = vmatpush3.xpose.msk.msra.mxu0 %vm855_vm2, %v4042_v38  ;;  %13808 = vmatprep.mubr.msk.f32.mxu0 %vm14955_vm1, %v18365_v60  ;;  %v4118_v13 = vpop.permute.xlu0 %4117 }
 0x529   :  { %13816 = vmatprep.subr.mxu0 %v18365_v60 }
 0x52b   :  { %13809 = vmatmul.mubr.msk.f32.vlgmr.msra.gmra.mrb[46].mxu0 %vm855_vm2, %v4040_v7 }
 0x52c   :  { %13818 = vmatprep.mubr.msk.f32.mxu0 %vm14955_vm1, %v18365_v60  ;;  %v4276_v46 = vpop.permute.xlu0 %4275 }
 0x530   :  { %v4274_v53 = vpop.permute.xlu0 %4273 }
 0x533   :  { %v2241_v58 = vpop.xlane.xlu1 %2240 }
 0x534   :  { %14560 = vrcp.f32 %v2241_v58  ;;  %v4432_v57 = vpop.permute.xlu0 %4431 }
 0x537   :  { %v4198_v44 = vpop.permute.xlu1 %4197 }
 0x538   :  { %13817 = vmatpush3.xpose.msk.msra.mxu0 %vm855_vm2, %v4198_v44 }
 0x539   :  { %13826 = vmatprep.subr.mxu0 %v18365_v60 }
 0x53b   :  { %v4196_v19 = vpop.permute.xlu1 %4195 }
 0x53c   :  { %13819 = vmatmul.mubr.msk.f32.vlgmr.msra.gmra.mrb[48].mxu0 %vm855_vm2, %v4196_v19 }
 0x53d   :  { %13828 = vmatprep.mubr.msk.f32.mxu0 %vm14955_vm1, %v18365_v60 }
 0x53e   :  { %v14561_v27 = vpop.eup %14560 }
 0x53f   :  { %v4354_v4 = vpop.permute.xlu1 %4353  ;;  %v2275_v29 = vmul.f32 %v14561_v27, %v15910_v6  ;;  %v18382_v6 = vld [vmem:[#allocation45_spill] sm:$0xff] }
 0x540   :  { %13827 = vmatpush3.xpose.msk.msra.mxu0 %vm855_vm2, %v4354_v4 }
 0x541   :  { %13764 = vmatmul.mubr.msk.f32.vlgmr.msra.gmra.mrb[38].mxu1 %vm855_vm2, %v2275_v29  ;;  %13836 = vmatprep.subr.mxu0 %v18365_v60 }
 0x542   :  { %13772 = vmatpush3.xpose.msk.msra.mxu1 %vm855_vm2, %v18380_v5  ;;  %13773 = vmatprep.mubr.msk.f32.mxu1 %vm14955_vm1, %v18365_v60 }
 0x543   :  { %v4352_v48 = vpop.permute.xlu1 %4351  ;;  %13781 = vmatprep.subr.mxu1 %v18365_v60 }
 0x544   :  { %13829 = vmatmul.mubr.msk.f32.vlgmr.msra.gmra.mrb[50].mxu0 %vm855_vm2, %v4352_v48 }
 0x545   :  { %13774 = vmatmul.mubr.msk.f32.vlgmr.msra.gmra.mrb[40].mxu1 %vm855_vm2, %v18381_v61  ;;  %13838 = vmatprep.mubr.msk.f32.mxu0 %vm14955_vm1, %v18365_v60 }
 0x546   :  { %13782 = vmatpush3.xpose.msk.msra.mxu1 %vm855_vm2, %v18382_v6  ;;  %13783 = vmatprep.mubr.msk.f32.mxu1 %vm14955_vm1, %v18365_v60 }
 0x547   :  { %v4510_v14 = vpop.permute.xlu1 %4509  ;;  %13791 = vmatprep.subr.mxu1 %v18365_v60 }
 0x548   :  { %13837 = vmatpush3.xpose.msk.msra.mxu0 %vm855_vm2, %v4510_v14 }
 0x549   :  { %13784 = vmatmul.mubr.msk.f32.vlgmr.msra.gmra.mrb[42].mxu1 %vm855_vm2, %v18383_v56  ;;  %13846 = vmatprep.subr.mxu0 %v18365_v60 }
 0x54a   :  { %13792 = vmatpush3.xpose.msk.msra.mxu1 %vm855_vm2, %v15944_v40  ;;  %13793 = vmatprep.mubr.msk.f32.mxu1 %vm14955_vm1, %v18365_v60  ;;  %v4430_v40 = vpop.permute.xlu0 %4429 }
 0x54b   :  { %v4508_v59 = vpop.permute.xlu1 %4507  ;;  %13801 = vmatprep.subr.mxu1 %v18365_v60 }
 0x54c   :  { %13839 = vmatmul.mubr.msk.f32.vlgmr.msra.gmra.mrb[52].mxu0 %vm855_vm2, %v4508_v59 }
 0x54d   :  { %13794 = vmatmul.mubr.msk.f32.vlgmr.msra.gmra.mrb[44].mxu1 %vm855_vm2, %v15952_v16  ;;  %13848 = vmatprep.mubr.msk.f32.mxu0 %vm14955_vm1, %v18365_v60 }
 0x54e   :  { %13802 = vmatpush3.xpose.msk.msra.mxu1 %vm855_vm2, %v3964_v9  ;;  %13803 = vmatprep.mubr.msk.f32.mxu1 %vm14955_vm1, %v18365_v60  ;;  %v4588_v50 = vpop.permute.xlu0 %4587 }
 0x54f   :  { %v4666_v23 = vpop.permute.xlu1 %4665  ;;  %13811 = vmatprep.subr.mxu1 %v18365_v60 }
 0x550   :  { %13847 = vmatpush3.xpose.msk.msra.mxu0 %vm855_vm2, %v4666_v23 }
 0x551   :  { %13804 = vmatmul.mubr.msk.f32.vlgmr.msra.gmra.mrb[46].mxu1 %vm855_vm2, %v3962_v43  ;;  %13856 = vmatprep.subr.mxu0 %v18365_v60 }
 0x552   :  { %13812 = vmatpush3.xpose.msk.msra.mxu1 %vm855_vm2, %v4120_v1  ;;  %13813 = vmatprep.mubr.msk.f32.mxu1 %vm14955_vm1, %v18365_v60  ;;  %v4586_v41 = vpop.permute.xlu0 %4585 }
 0x553   :  { %v4664_v16 = vpop.permute.xlu1 %4663  ;;  %13821 = vmatprep.subr.mxu1 %v18365_v60 }
 0x554   :  { %13849 = vmatmul.mubr.msk.f32.vlgmr.msra.gmra.mrb[54].mxu0 %vm855_vm2, %v4664_v16 }
 0x555   :  { %13814 = vmatmul.mubr.msk.f32.vlgmr.msra.gmra.mrb[48].mxu1 %vm855_vm2, %v4118_v13  ;;  %13858 = vmatprep.mubr.msk.f32.mxu0 %vm14955_vm1, %v18365_v60 }
 0x556   :  { %13822 = vmatpush3.xpose.msk.msra.mxu1 %vm855_vm2, %v4276_v46  ;;  %13823 = vmatprep.mubr.msk.f32.mxu1 %vm14955_vm1, %v18365_v60  ;;  %v4918_v24 = vpop.permute.xlu0 %4917 }
 0x557   :  { %v4994_v37 = vpop.permute.xlu1 %4993  ;;  %13831 = vmatprep.subr.mxu1 %v18365_v60 }
 0x558   :  { %13857 = vmatpush3.msra.mxu0 %v4994_v37 }
 0x559   :  { %13824 = vmatmul.mubr.msk.f32.vlgmr.msra.gmra.mrb[50].mxu1 %vm855_vm2, %v4274_v53  ;;  %13866 = vmatprep.subr.mxu0 %v18365_v60 }
 0x55a   :  { %13832 = vmatpush3.xpose.msk.msra.mxu1 %vm855_vm2, %v4432_v57  ;;  %13833 = vmatprep.mubr.msk.f32.mxu1 %vm14955_vm1, %v18365_v60 }
 0x55b   :  { %13841 = vmatprep.subr.mxu1 %v18365_v60 }
 0x55d   :  { %13834 = vmatmul.mubr.msk.f32.vlgmr.msra.gmra.mrb[52].mxu1 %vm855_vm2, %v4430_v40 }
 0x55e   :  { %13842 = vmatpush3.xpose.msk.msra.mxu1 %vm855_vm2, %v4588_v50  ;;  %13843 = vmatprep.mubr.msk.f32.mxu1 %vm14955_vm1, %v18365_v60 }
 0x55f   :  { %13851 = vmatprep.subr.mxu1 %v18365_v60 }
 0x561   :  { %13844 = vmatmul.mubr.msk.f32.vlgmr.msra.gmra.mrb[54].mxu1 %vm855_vm2, %v4586_v41  ;;  %v16210_v41 = vld [vmem:[#allocation2] sm:$0xff] }
 0x562   :  { %13852 = vmatpush3.msra.mxu1 %v4918_v24  ;;  %13853 = vmatprep.mubr.msk.f32.mxu1 %vm14955_vm1, %v18365_v60 }
 0x563   :  { %13861 = vmatprep.subr.mxu1 %v18365_v60 }
 0x5b3   :  { %v16180_v22 = vpop.f32.mrb[24].mxu1 }
 0x5b4   :  { %18384 = vst [vmem:[#allocation35_spill] sm:$0xff] %v16180_v22  ;;  %v13695_v20 = vpop.f32.mrb[25].mxu1 }
 0x5b7   :  { %v16182_v8 = vpop.f32.mrb[24].mxu0 }
 0x5b8   :  { %18385 = vst [vmem:[#allocation31_spill] sm:$0xff] %v16182_v8  ;;  %v13700_v52 = vpop.f32.mrb[25].mxu0 }
 0x5bb   :  { %v16184_v38 = vpop.f32.mrb[26].mxu1 }
 0x5bc   :  { %18386 = vst [vmem:[#allocation32_spill] sm:$0xff] %v16184_v38  ;;  %v13705_v9 = vpop.f32.mrb[27].mxu1 }
 0x5bf   :  { %v16186_v7 = vpop.f32.mrb[26].mxu0 }
 0x5c0   :  { %18387 = vst [vmem:[#allocation36_spill] sm:$0xff] %v16186_v7  ;;  %v13710_v43 = vpop.f32.mrb[27].mxu0 }
 0x5c3   :  { %v16188_v1 = vpop.f32.mrb[28].mxu1 }
 0x5c4   :  { %18388 = vst [vmem:[#allocation37_spill] sm:$0xff] %v16188_v1  ;;  %v13715_v58 = vpop.f32.mrb[29].mxu1  ;;  %v18405_v1 = vld [vmem:[#allocation33_spill] sm:$0xff] }
 0x5cc   :  { %v16190_v13 = vpop.f32.mrb[30].mxu1 }
 0x5cd   :  { %18389 = vst [vmem:[#allocation38_spill] sm:$0xff] %v16190_v13  ;;  %v13725_v44 = vpop.f32.mrb[31].mxu1  ;;  %v16293_v13 = vpop.permute.xlu1 %5145 }
 0x5cf   :  { %v16192_v19 = vpop.f32.mrb[28].mxu0 }
 0x5d0   :  { %18390 = vst [vmem:[#allocation39_spill] sm:$0xff] %v16192_v19  ;;  %v13720_v46 = vpop.f32.mrb[29].mxu0 }
 0x5db   :  { %v16194_v27 = vpop.f32.mrb[30].mxu0 }
 0x5dc   :  { %18391 = vst [vmem:[#allocation40_spill] sm:$0xff] %v16194_v27  ;;  %v16196_v4 = vpop.f32.mrb[32].mxu1  ;;  %v13730_v29 = vpop.f32.mrb[31].mxu0 }
 0x5dd   :  { %18392 = vst [vmem:[#allocation49_spill] sm:$0xff] %v16196_v4  ;;  %v13735_v5 = vpop.f32.mrb[33].mxu1  ;;  %v16295_v27 = vpop.permute.xlu1 %5297 }
 0x5de   :  { %18401 = vst [vmem:[#allocation45_spill] sm:$0xff] %v16295_v27 }
 0x5df   :  { %v16198_v53 = vpop.f32.mrb[32].mxu0 }
 0x5e0   :  { %18393 = vst [vmem:[#allocation42_spill] sm:$0xff] %v16198_v53  ;;  %v16200_v48 = vpop.f32.mrb[34].mxu1  ;;  %v13740_v61 = vpop.f32.mrb[33].mxu0 }
 0x5e1   :  { %18394 = vst [vmem:[#allocation44_spill] sm:$0xff] %v16200_v48  ;;  %v13745_v6 = vpop.f32.mrb[35].mxu1 }
 0x5e3   :  { %v16202_v14 = vpop.f32.mrb[34].mxu0 }
 0x5e4   :  { %18395 = vst [vmem:[#allocation46_spill] sm:$0xff] %v16202_v14  ;;  %v16204_v57 = vpop.f32.mrb[36].mxu1  ;;  %v13750_v56 = vpop.f32.mrb[35].mxu0 }
 0x5e5   :  { %18396 = vst [vmem:[#allocation48_spill] sm:$0xff] %v16204_v57  ;;  %v13755_v59 = vpop.f32.mrb[37].mxu1 }
 0x5e7   :  { %v16206_v40 = vpop.f32.mrb[36].mxu0 }
 0x5e8   :  { %18397 = vst [vmem:[#allocation50_spill] sm:$0xff] %v16206_v40  ;;  %v13760_v23 = vpop.f32.mrb[37].mxu0 }
 0x5eb   :  { %v16208_v16 = vpop.f32.mrb[38].mxu0 }
 0x5ec   :  { %18398 = vst [vmem:[#allocation41_spill] sm:$0xff] %v16208_v16  ;;  %v13770_v50 = vpop.f32.mrb[39].mxu0 }
 0x5f2   :  { %v3645_v37 = vpop.f32.mrb[40].mxu0 }
 0x5f3   :  { %v16213_v24 = vadd.f32 %v16210_v41, %v3645_v37  ;;  %v13780_v20 = vpop.f32.mrb[41].mxu0 }
 0x5f5   :  { %v4744_v52 = vsel %vm855_vm2, %v16213_v24, -inf }
 0x5f6   :  { %4745 = vmax.xlane.f32.xlu1 %v4744_v52  ;;  %v3801_v9 = vpop.f32.mrb[42].mxu0 }
 0x5f7   :  { %v13790_v43 = vpop.f32.mrb[43].mxu0 }
 0x5fa   :  { %v3957_v58 = vpop.f32.mrb[44].mxu0 }
 0x5fb   :  { %v16218_v44 = vadd.f32 %v16210_v41, %v3957_v58  ;;  %v13800_v46 = vpop.f32.mrb[45].mxu0 }
 0x5fd   :  { %v4756_v29 = vsel %vm855_vm2, %v16218_v44, -inf }
 0x5fe   :  { %4757 = vmax.xlane.f32.xlu1 %v4756_v29  ;;  %v4113_v5 = vpop.f32.mrb[46].mxu0 }
 0x5ff   :  { %v16223_v61 = vadd.f32 %v16210_v41, %v4113_v5  ;;  %v13810_v6 = vpop.f32.mrb[47].mxu0 }
 0x601   :  { %v4762_v56 = vsel %vm855_vm2, %v16223_v61, -inf }
 0x602   :  { %4763 = vmax.xlane.f32.xlu1 %v4762_v56 }
 0x60f   :  { %v4269_v59 = vpop.f32.mrb[48].mxu0 }
 0x610   :  { %v16228_v23 = vadd.f32 %v16210_v41, %v4269_v59  ;;  %v13820_v50 = vpop.f32.mrb[49].mxu0 }
 0x612   :  { %v4768_v37 = vsel %vm855_vm2, %v16228_v23, -inf }
 0x613   :  { %4769 = vmax.xlane.f32.xlu1 %v4768_v37 }
 0x614   :  { %v16232_v20 = vpop.f32.mrb[38].mxu1 }
 0x615   :  { %18399 = vst [vmem:[#allocation43_spill] sm:$0xff] %v16232_v20  ;;  %v13765_v52 = vpop.f32.mrb[39].mxu1 }
 0x617   :  { %v4425_v43 = vpop.f32.mrb[50].mxu0 }
 0x618   :  { %v16235_v58 = vadd.f32 %v16210_v41, %v4425_v43  ;;  %v3567_v46 = vpop.f32.mrb[40].mxu1  ;;  %v13830_v29 = vpop.f32.mrb[51].mxu0  ;;  %v16248_v43 = vadd.f32 %v16210_v41, %v3801_v9 }
 0x619   :  { %v16238_v5 = vadd.f32 %v16210_v41, %v3567_v46  ;;  %v13775_v6 = vpop.f32.mrb[41].mxu1 }
 0x61a   :  { %v4774_v56 = vsel %vm855_vm2, %v16235_v58, -inf  ;;  %v4750_v9 = vsel %vm855_vm2, %v16248_v43, -inf }
 0x61b   :  { %4775 = vmax.xlane.f32.xlu1 %v4774_v56  ;;  %v4741_v59 = vsel %vm855_vm2, %v16238_v5, -inf }
 0x61c   :  { %4742 = vmax.xlane.f32.xlu0 %v4741_v59  ;;  %v3723_v50 = vpop.f32.mrb[42].mxu1 }
 0x61d   :  { %v16245_v37 = vadd.f32 %v16210_v41, %v3723_v50  ;;  %v13785_v52 = vpop.f32.mrb[43].mxu1 }
 0x61f   :  { %v4581_v29 = vpop.f32.mrb[52].mxu0  ;;  %v4747_v46 = vsel %vm855_vm2, %v16245_v37, -inf }
 0x620   :  { %v16253_v6 = vadd.f32 %v16210_v41, %v4581_v29  ;;  %v13840_v56 = vpop.f32.mrb[53].mxu0  ;;  %4748 = vmax.xlane.f32.xlu0 %v4747_v46  ;;  %v3879_v57 = vpop.f32.mrb[44].mxu1 }
 0x621   :  { %v13795_v40 = vpop.f32.mrb[45].mxu1  ;;  %v16258_v50 = vadd.f32 %v16210_v41, %v3879_v57 }
 0x622   :  { %v4780_v59 = vsel %vm855_vm2, %v16253_v6, -inf }
 0x623   :  { %4781 = vmax.xlane.f32.xlu1 %v4780_v59  ;;  %v4753_v40 = vsel %vm855_vm2, %v16258_v50, -inf }
 0x624   :  { %4751 = vmax.xlane.f32.xlu0 %v4750_v9  ;;  %v4035_v52 = vpop.f32.mrb[46].mxu1 }
 0x625   :  { %v13805_v48 = vpop.f32.mrb[47].mxu1  ;;  %v16263_v29 = vadd.f32 %v16210_v41, %v4035_v52 }
 0x627   :  { %v4737_v56 = vpop.f32.mrb[54].mxu0  ;;  %v4759_v59 = vsel %vm855_vm2, %v16263_v29, -inf }
 0x628   :  { %v13850_v46 = vpop.f32.mrb[55].mxu0  ;;  %4754 = vmax.xlane.f32.xlu0 %v4753_v40  ;;  %v4191_v14 = vpop.f32.mrb[48].mxu1 }
 0x629   :  { %v13815_v4 = vpop.f32.mrb[49].mxu1  ;;  %v16268_v57 = vadd.f32 %v16210_v41, %v4191_v14 }
 0x62b   :  { %v4765_v53 = vsel %vm855_vm2, %v16268_v57, -inf }
 0x62c   :  { %4760 = vmax.xlane.f32.xlu0 %v4759_v59  ;;  %v4347_v9 = vpop.f32.mrb[50].mxu1 }
 0x62d   :  { %v13825_v48 = vpop.f32.mrb[51].mxu1  ;;  %v16273_v52 = vadd.f32 %v16210_v41, %v4347_v9 }
 0x62f   :  { %v4771_v14 = vsel %vm855_vm2, %v16273_v52, -inf }
 0x630   :  { %4766 = vmax.xlane.f32.xlu0 %v4765_v53  ;;  %v4503_v46 = vpop.f32.mrb[52].mxu1 }
 0x631   :  { %v13835_v40 = vpop.f32.mrb[53].mxu1  ;;  %v16278_v4 = vadd.f32 %v16210_v41, %v4503_v46 }
 0x632   :  { %v18400_v40 = vld [vmem:[#allocation34_spill] sm:$0xff] }
 0x633   :  { %v4777_v53 = vsel %vm855_vm2, %v16278_v4, -inf }
 0x634   :  { %6525 = vrot.lane.b32.xlu1 %v15462_v39, %s14961_s18  ;;  %4772 = vmax.xlane.f32.xlu0 %v4771_v14  ;;  %v4659_v59 = vpop.f32.mrb[54].mxu1  ;;  %v16297_v14 = vpop.permute.xlu1 %5373 }
 0x635   :  { %v13845_v48 = vpop.f32.mrb[55].mxu1  ;;  %v16285_v9 = vadd.f32 %v16210_v41, %v4659_v59  ;;  %18402 = vst [vmem:[#allocation47_spill] sm:$0xff] %v16297_v14 }
 0x637   :  { %v4783_v46 = vsel %vm855_vm2, %v16285_v9, -inf }
 0x638   :  { %6523 = vrot.lane.b32.xlu1 %v18400_v40, %s14962_s19  ;;  %4778 = vmax.xlane.f32.xlu0 %v4777_v53  ;;  %v16299_v48 = vpop.permute.xlu1 %5449  ;;  %v16308_v53 = vadd.f32 %v16210_v41, %v4737_v56  ;;  %v16324_v41 = vpop.permute.xlu0 %5069 }
 0x639   :  { %18403 = vst [vmem:[#allocation34_spill] sm:$0xff] %v16299_v48 }
 0x63a   :  { %v4786_v19 = vsel %vm855_vm2, %v16308_v53, -inf }
 0x63c   :  { %4784 = vmax.xlane.f32.xlu0 %v4783_v46  ;;  %v16303_v59 = vpop.permute.xlu1 %5601  ;;  %v16328_v22 = vpop.permute.xlu0 %5221 }
 0x63d   :  { %18404 = vst [vmem:[#allocation51_spill] sm:$0xff] %v16303_v59  ;;  %18411 = vst [vmem:[#allocation57_spill] sm:$0xff] %v16328_v22 }
 0x640   :  { %v16312_v46 = vpop.permute.xlu1 %5753  ;;  %v16332_v16 = vpop.permute.xlu0 %5525 }
 0x641   :  { %18406 = vst [vmem:[#allocation52_spill] sm:$0xff] %v16312_v46  ;;  %18413 = vst [vmem:[#allocation59_spill] sm:$0xff] %v16332_v16 }
 0x644   :  { %v16316_v7 = vpop.permute.xlu1 %5905 }
 0x645   :  { %18407 = vst [vmem:[#allocation53_spill] sm:$0xff] %v16316_v7  ;;  %v16336_v7 = vpop.permute.xlu0 %5677 }
 0x646   :  { %18415 = vst [vmem:[#allocation61_spill] sm:$0xff] %v16336_v7 }
 0x648   :  { %v16318_v38 = vpop.permute.xlu1 %6057 }
 0x649   :  { %18408 = vst [vmem:[#allocation54_spill] sm:$0xff] %v16318_v38  ;;  %v16339_v59 = vpop.permute.xlu0 %5829 }
 0x64a   :  { %18416 = vst [vmem:[#allocation62_spill] sm:$0xff] %v16339_v59 }
 0x64c   :  { %v16320_v8 = vpop.permute.xlu1 %6213 }
 0x64d   :  { %18409 = vst [vmem:[#allocation55_spill] sm:$0xff] %v16320_v8 }
 0x650   :  { %v16326_v56 = vpop.permute.xlu1 %6211 }
 0x651   :  { %18410 = vst [vmem:[#allocation56_spill] sm:$0xff] %v16326_v56 }
 0x652   :  { %6447 = vrot.lane.b32.xlu0 %v15456_v34, %s14961_s18 }
 0x654   :  { %v16330_v20 = vpop.permute.xlu1 %6369 }
 0x655   :  { %18412 = vst [vmem:[#allocation58_spill] sm:$0xff] %v16330_v20 }
 0x656   :  { %6445 = vrot.lane.b32.xlu0 %v18405_v1, %s14962_s19  ;;  %v16341_v1 = vpop.permute.xlu0 %5981 }
 0x657   :  { %18417 = vst [vmem:[#allocation63_spill] sm:$0xff] %v16341_v1 }
 0x65a   :  { %6603 = vrot.lane.b32.xlu0 %v15464_v17, %s14961_s18  ;;  %v16345_v14 = vpop.permute.xlu0 %6135 }
 0x65b   :  { %18418 = vst [vmem:[#allocation64_spill] sm:$0xff] %v16345_v14 }
 0x65c   :  { %4787 = vmax.xlane.f32.xlu1 %v4786_v19  ;;  %v16334_v19 = vpop.permute.xlu1 %6367 }
 0x65d   :  { %18414 = vst [vmem:[#allocation60_spill] sm:$0xff] %v16334_v19 }
 0x65e   :  { %v16349_v19 = vpop.permute.xlu0 %6133 }
 0x65f   :  { %18419 = vst [vmem:[#allocation65_spill] sm:$0xff] %v16349_v19 }
 0x662   :  { %v16351_v7 = vpop.permute.xlu0 %6291 }
 0x663   :  { %18420 = vst [vmem:[#allocation66_spill] sm:$0xff] %v16351_v7 }
 0x666   :  { %v16353_v16 = vpop.permute.xlu0 %6289 }
 0x667   :  { %18421 = vst [vmem:[#allocation67_spill] sm:$0xff] %v16353_v16 }
 0x66d   :  { %6681 = vrot.lane.b32.xlu1 %v15470_v47, %s14961_s18 }
 0x683   :  { %v4746_v38 = vpop.xlane.xlu1 %4745 }
 0x684   :  { %v4790_v8 = vsub.f32 %v16213_v24, %v4746_v38 }
 0x686   :  { %v4807_v46 = vmul.f32 1.442695, %v4790_v8 }
 0x688   :  { %14562 = vpow2.f32 %v4807_v46 }
 0x68b   :  { %v4758_v24 = vpop.xlane.xlu1 %4757 }
 0x68c   :  { %v4794_v14 = vsub.f32 %v16218_v44, %v4758_v24 }
 0x68e   :  { %v4815_v7 = vmul.f32 1.442695, %v4794_v14 }
 0x68f   :  { %v4764_v27 = vpop.xlane.xlu1 %4763 }
 0x690   :  { %v4796_v16 = vsub.f32 %v16223_v61, %v4764_v27 }
 0x692   :  { %v16343_v56 = vpop.eup %14562 }
 0x693   :  { %v4840_v20 = vsel %vm855_vm2, %v16343_v56, 0.0 }
 0x694   :  { %4841 = vadd.xlane.f32.xlu1 %v4840_v20 }
 0x6a0   :  { %v4770_v22 = vpop.xlane.xlu1 %4769 }
 0x6a1   :  { %v4798_v44 = vsub.f32 %v16228_v23, %v4770_v22 }
 0x6a9   :  { %v4743_v8 = vpop.xlane.xlu0 %4742 }
 0x6aa   :  { %v4789_v38 = vsub.f32 %v16238_v5, %v4743_v8 }
 0x6ac   :  { %v4805_v46 = vmul.f32 1.442695, %v4789_v38 }
 0x6ad   :  { %v4749_v1 = vpop.xlane.xlu0 %4748 }
 0x6ae   :  { %14564 = vpow2.f32 %v4805_v46  ;;  %v4791_v59 = vsub.f32 %v16245_v37, %v4749_v1  ;;  %v4819_v1 = vmul.f32 1.442695, %v4796_v16 }
 0x6b0   :  { %v4809_v48 = vmul.f32 1.442695, %v4791_v59  ;;  %v4776_v59 = vpop.xlane.xlu1 %4775 }
 0x6b1   :  { %v4752_v20 = vpop.xlane.xlu0 %4751 }
 0x6b2   :  { %14566 = vpow2.f32 %v4809_v48  ;;  %v4792_v19 = vsub.f32 %v16248_v43, %v4752_v20 }
 0x6b4   :  { %v4811_v15 = vmul.f32 1.442695, %v4792_v19  ;;  %v4782_v16 = vpop.xlane.xlu1 %4781 }
 0x6b5   :  { %v4755_v5 = vpop.xlane.xlu0 %4754  ;;  %v4802_v24 = vsub.f32 %v16253_v6, %v4782_v16 }
 0x6b6   :  { %14568 = vpow2.f32 %v4811_v15  ;;  %v4793_v8 = vsub.f32 %v16258_v50, %v4755_v5  ;;  %v4823_v15 = vmul.f32 1.442695, %v4798_v44  ;;  %v4800_v50 = vsub.f32 %v16235_v58, %v4776_v59 }
 0x6b7   :  { %14570 = vpow2.f32 %v4815_v7 }
 0x6b8   :  { %v16361_v38 = vpop.eup %14564  ;;  %v4813_v37 = vmul.f32 1.442695, %v4793_v8 }
 0x6b9   :  { %v4761_v48 = vpop.xlane.xlu0 %4760  ;;  %v4837_v43 = vsel %vm855_vm2, %v16361_v38, 0.0 }
 0x6ba   :  { %14572 = vpow2.f32 %v4813_v37  ;;  %v4795_v27 = vsub.f32 %v16263_v29, %v4761_v48  ;;  %4838 = vadd.xlane.f32.xlu0 %v4837_v43  ;;  %v4827_v29 = vmul.f32 1.442695, %v4800_v50 }
 0x6bb   :  { %14574 = vpow2.f32 %v4819_v1 }
 0x6bc   :  { %v16367_v61 = vpop.eup %14566  ;;  %v4817_v7 = vmul.f32 1.442695, %v4795_v27 }
 0x6bd   :  { %v4767_v14 = vpop.xlane.xlu0 %4766  ;;  %v4843_v22 = vsel %vm855_vm2, %v16367_v61, 0.0 }
 0x6be   :  { %14576 = vpow2.f32 %v4817_v7  ;;  %v4797_v23 = vsub.f32 %v16268_v57, %v4767_v14  ;;  %4844 = vadd.xlane.f32.xlu0 %v4843_v22  ;;  %v4831_v57 = vmul.f32 1.442695, %v4802_v24 }
 0x6bf   :  { %14578 = vpow2.f32 %v4823_v15 }
 0x6c0   :  { %v16373_v19 = vpop.eup %14568  ;;  %v4821_v46 = vmul.f32 1.442695, %v4797_v23 }
 0x6c1   :  { %v4773_v20 = vpop.xlane.xlu0 %4772  ;;  %v4846_v58 = vsel %vm855_vm2, %v16373_v19, 0.0  ;;  %v16378_v5 = vpop.eup %14570 }
 0x6c2   :  { %14580 = vpow2.f32 %v4821_v46  ;;  %v4799_v8 = vsub.f32 %v16273_v52, %v4773_v20  ;;  %4847 = vadd.xlane.f32.xlu1 %v4846_v58  ;;  %v4852_v6 = vsel %vm855_vm2, %v16378_v5, 0.0 }
 0x6c3   :  { %14582 = vpow2.f32 %v4827_v29 }
 0x6c4   :  { %v16381_v1 = vpop.eup %14572  ;;  %v4825_v44 = vmul.f32 1.442695, %v4799_v8 }
 0x6c5   :  { %v4779_v37 = vpop.xlane.xlu0 %4778  ;;  %v4849_v59 = vsel %vm855_vm2, %v16381_v1, 0.0  ;;  %v16387_v48 = vpop.eup %14574 }
 0x6c6   :  { %14584 = vpow2.f32 %v4825_v44  ;;  %v4801_v43 = vsub.f32 %v16278_v4, %v4779_v37  ;;  %4853 = vadd.xlane.f32.xlu1 %v4852_v6  ;;  %4850 = vadd.xlane.f32.xlu0 %v4849_v59  ;;  %v4858_v50 = vsel %vm855_vm2, %v16387_v48, 0.0  ;;  %v16425_v59 = vpop.permute.xlu1 %6525 }
 0x6c7   :  { %14586 = vpow2.f32 %v4831_v57 }
 0x6c8   :  { %v16390_v52 = vpop.eup %14576  ;;  %v4829_v27 = vmul.f32 1.442695, %v4801_v43 }
 0x6c9   :  { %v4785_v15 = vpop.xlane.xlu0 %4784  ;;  %v4855_v7 = vsel %vm855_vm2, %v16390_v52, 0.0  ;;  %v16396_v16 = vpop.eup %14578 }
 0x6ca   :  { %14588 = vpow2.f32 %v4829_v27  ;;  %v4803_v14 = vsub.f32 %v16285_v9, %v4785_v15  ;;  %4859 = vadd.xlane.f32.xlu1 %v4858_v50  ;;  %4856 = vadd.xlane.f32.xlu0 %v4855_v7  ;;  %v4864_v23 = vsel %vm855_vm2, %v16396_v16, 0.0  ;;  %v16427_v43 = vpop.permute.xlu1 %6523 }
 0x6cc   :  { %v16399_v4 = vpop.eup %14580  ;;  %v4833_v22 = vmul.f32 1.442695, %v4803_v14 }
 0x6cd   :  { %v4861_v29 = vsel %vm855_vm2, %v16399_v4, 0.0  ;;  %v16405_v24 = vpop.eup %14582 }
 0x6ce   :  { %14590 = vpow2.f32 %v4833_v22  ;;  %4865 = vadd.xlane.f32.xlu1 %v4864_v23  ;;  %4862 = vadd.xlane.f32.xlu0 %v4861_v29  ;;  %v4870_v9 = vsel %vm855_vm2, %v16405_v24, 0.0 }
 0x6d0   :  { %v16407_v46 = vpop.eup %14584 }
 0x6d1   :  { %v4867_v20 = vsel %vm855_vm2, %v16407_v46, 0.0  ;;  %v16413_v58 = vpop.eup %14586 }
 0x6d2   :  { %4871 = vadd.xlane.f32.xlu1 %v4870_v9  ;;  %4868 = vadd.xlane.f32.xlu0 %v4867_v20  ;;  %v4876_v57 = vsel %vm855_vm2, %v16413_v58, 0.0 }
 0x6d4   :  { %v16415_v8 = vpop.eup %14588 }
 0x6d5   :  { %v4873_v44 = vsel %vm855_vm2, %v16415_v8, 0.0 }
 0x6d6   :  { %4877 = vadd.xlane.f32.xlu1 %v4876_v57  ;;  %4874 = vadd.xlane.f32.xlu0 %v4873_v44 }
 0x6d8   :  { %v16421_v37 = vpop.eup %14590 }
 0x6d9   :  { %v4879_v6 = vsel %vm855_vm2, %v16421_v37, 0.0 }
 0x6da   :  { %4880 = vadd.xlane.f32.xlu1 %v4879_v6 }
 0x6e9   :  { %v4788_v27 = vpop.xlane.xlu1 %4787 }
 0x6ea   :  { %v4804_v15 = vsub.f32 %v16308_v53, %v4788_v27 }
 0x6eb   :  { %6679 = vrot.lane.b32.xlu1 %v15625_v54, %s14962_s19 }
 0x6ec   :  { %v4835_v50 = vmul.f32 1.442695, %v4804_v15 }
 0x6ed   :  { %v16468_v53 = vpop.permute.xlu1 %6681 }
 0x6ee   :  { %14592 = vpow2.f32 %v4835_v50 }
 0x6ef   :  { %6837 = vrot.lane.b32.xlu1 %v15478_v49, %s14961_s18 }
 0x6f3   :  { %6835 = vrot.lane.b32.xlu1 %v15590_v30, %s14962_s19 }
 0x6f7   :  { %6993 = vrot.lane.b32.xlu1 %v15486_v0, %s14961_s18 }
 0x6f8   :  { %v16438_v7 = vpop.eup %14592 }
 0x6f9   :  { %v4882_v14 = vsel %vm855_vm2, %v16438_v7, 0.0 }
 0x6fa   :  { %4883 = vadd.xlane.f32.xlu0 %v4882_v14 }
 0x6fb   :  { %6991 = vrot.lane.b32.xlu1 %v15607_v35, %s14962_s19 }
 0x6ff   :  { %7149 = vrot.lane.b32.xlu1 %v15494_v3, %s14961_s18 }
 0x703   :  { %7147 = vrot.lane.b32.xlu1 %v15622_v42, %s14962_s19 }
 0x707   :  { %7305 = vrot.lane.b32.xlu1 %v15502_v11, %s14961_s18 }
 0x70b   :  { %7303 = vrot.lane.b32.xlu1 %v15643_v63, %s14962_s19 }
 0x70f   :  { %7633 = vrot.lane.b32.xlu1 %v15442_v2, %s14963_s20 }
 0x710   :  { %6601 = vrot.lane.b32.xlu0 %v15604_v32, %s14962_s19 }
 0x713   :  { %7785 = vrot.lane.b32.xlu1 %v15454_v33, %s14963_s20 }
 0x714   :  { %6759 = vrot.lane.b32.xlu0 %v15472_v10, %s14961_s18 }
 0x717   :  { %7937 = vrot.lane.b32.xlu1 %v15462_v39, %s14963_s20 }
 0x718   :  { %6757 = vrot.lane.b32.xlu0 %v15640_v62, %s14962_s19 }
 0x71b   :  { %8013 = vrot.lane.b32.xlu1 %v15464_v17, %s14963_s20 }
 0x71c   :  { %6915 = vrot.lane.b32.xlu0 %v15480_v51, %s14961_s18 }
 0x71f   :  { %8089 = vrot.lane.b32.xlu1 %v15470_v47, %s14963_s20 }
 0x720   :  { %6913 = vrot.lane.b32.xlu0 %v15655_v26, %s14962_s19 }
 0x721   :  { %v4842_v22 = vpop.xlane.xlu1 %4841 }
 0x722   :  { %14594 = vrcp.f32 %v4842_v22 }
 0x723   :  { %8241 = vrot.lane.b32.xlu1 %v15478_v49, %s14963_s20 }
 0x724   :  { %7071 = vrot.lane.b32.xlu0 %v15488_v55, %s14961_s18 }
 0x727   :  { %8393 = vrot.lane.b32.xlu1 %v15486_v0, %s14963_s20 }
 0x728   :  { %7069 = vrot.lane.b32.xlu0 %v15667_v21, %s14962_s19 }
 0x72b   :  { %8545 = vrot.lane.b32.xlu1 %v15494_v3, %s14963_s20 }
 0x72c   :  { %v14595_v23 = vpop.eup %14594  ;;  %7227 = vrot.lane.b32.xlu0 %v15496_v18, %s14961_s18 }
 0x72d   :  { %v4902_v29 = vmul.f32 %v14595_v23, %v16343_v56  ;;  %v16500_v56 = vpop.permute.xlu0 %6447 }
 0x72f   :  { %13859 = vmatmul.mubr.msk.f32.vlgmr.msra.gmra.mrb[56].mxu0 %vm855_vm2, %v4902_v29  ;;  %8697 = vrot.lane.b32.xlu1 %v15502_v11, %s14963_s20 }
 0x730   :  { %13867 = vmatpush3.msra.mxu0 %v16293_v13  ;;  %7225 = vrot.lane.b32.xlu0 %v15676_v28, %s14962_s19 }
 0x731   :  { %13868 = vmatprep.mubr.msk.f32.mxu0 %vm14955_vm1, %v18365_v60  ;;  %13876 = vmatprep.subr.mxu0 %v18365_v60  ;;  %v16510_v13 = vpop.permute.xlu0 %6445 }
 0x733   :  { %8853 = vrot.lane.b32.xlu1 %v15442_v2, %s14964_s0 }
 0x734   :  { %7557 = vrot.lane.b32.xlu0 %v15444_v25, %s14963_s20 }
 0x735   :  { %v16516_v9 = vpop.permute.xlu0 %6603 }
 0x737   :  { %8851 = vrot.lane.b32.xlu1 %v18367_v45, %s14965_s1 }
 0x738   :  { %7709 = vrot.lane.b32.xlu0 %v15450_v31, %s14963_s20 }
 0x73b   :  { %9009 = vrot.lane.b32.xlu1 %v15454_v33, %s14964_s0 }
 0x73c   :  { %7861 = vrot.lane.b32.xlu0 %v15456_v34, %s14963_s20 }
 0x73f   :  { %9007 = vrot.lane.b32.xlu1 %v18368_v36, %s14965_s1 }
 0x740   :  { %8165 = vrot.lane.b32.xlu0 %v15472_v10, %s14963_s20 }
 0x743   :  { %9165 = vrot.lane.b32.xlu1 %v15462_v39, %s14964_s0 }
 0x744   :  { %8317 = vrot.lane.b32.xlu0 %v15480_v51, %s14963_s20 }
 0x747   :  { %9163 = vrot.lane.b32.xlu1 %v18400_v40, %s14965_s1  ;;  %v4839_v45 = vpop.xlane.xlu0 %4838 }
 0x748   :  { %14596 = vrcp.f32 %v4839_v45  ;;  %8469 = vrot.lane.b32.xlu0 %v15488_v55, %s14963_s20  ;;  %v18424_v45 = vld [vmem:[#allocation45_spill] sm:$0xff] }
 0x74b   :  { %v4845_v36 = vpop.xlane.xlu0 %4844 }
 0x74c   :  { %14598 = vrcp.f32 %v4845_v36  ;;  %8621 = vrot.lane.b32.xlu0 %v15496_v18, %s14963_s20 }
 0x74f   :  { %v4848_v20 = vpop.xlane.xlu1 %4847 }
 0x750   :  { %14600 = vrcp.f32 %v4848_v20  ;;  %8775 = vrot.lane.b32.xlu0 %v15444_v25, %s14964_s0 }
 0x752   :  { %v14597_v57 = vpop.eup %14596 }
 0x753   :  { %v4854_v44 = vpop.xlane.xlu1 %4853  ;;  %v4851_v6 = vpop.xlane.xlu0 %4850  ;;  %v4901_v40 = vmul.f32 %v14597_v57, %v16361_v38  ;;  %v18422_v38 = vld [vmem:[#allocation57_spill] sm:$0xff] }
 0x754   :  { %14602 = vrcp.f32 %v4854_v44  ;;  %8773 = vrot.lane.b32.xlu0 %v15521_v12, %s14965_s1 }
 0x755   :  { %14604 = vrcp.f32 %v4851_v6  ;;  %13854 = vmatmul.mubr.msk.f32.vlgmr.msra.gmra.mrb[56].mxu1 %vm855_vm2, %v4901_v40  ;;  %v18425_v40 = vld [vmem:[#allocation34_spill] sm:$0xff] }
 0x756   :  { %v14599_v27 = vpop.eup %14598  ;;  %13862 = vmatpush3.msra.mxu1 %v16324_v41  ;;  %13863 = vmatprep.mubr.msk.f32.mxu1 %vm14955_vm1, %v18365_v60 }
 0x757   :  { %v4860_v15 = vpop.xlane.xlu1 %4859  ;;  %v4857_v50 = vpop.xlane.xlu0 %4856  ;;  %13871 = vmatprep.subr.mxu1 %v18365_v60  ;;  %v4903_v14 = vmul.f32 %v14599_v27, %v16367_v61  ;;  %v18423_v61 = vld [vmem:[#allocation30_spill] sm:$0xff] }
 0x758   :  { %14606 = vrcp.f32 %v4860_v15  ;;  %8931 = vrot.lane.b32.xlu0 %v15450_v31, %s14964_s0  ;;  %v18426_v15 = vld [vmem:[#allocation47_spill] sm:$0xff] }
 0x759   :  { %14608 = vrcp.f32 %v4857_v50  ;;  %13864 = vmatmul.mubr.msk.f32.vlgmr.msra.gmra.mrb[58].mxu1 %vm855_vm2, %v4903_v14 }
 0x75a   :  { %v14601_v12 = vpop.eup %14600  ;;  %13872 = vmatpush3.msra.mxu1 %v18422_v38  ;;  %13873 = vmatprep.mubr.msk.f32.mxu1 %vm14955_vm1, %v18365_v60 }
 0x75b   :  { %v4866_v41 = vpop.xlane.xlu1 %4865  ;;  %v4863_v22 = vpop.xlane.xlu0 %4862  ;;  %v4904_v23 = vmul.f32 %v14601_v12, %v16373_v19  ;;  %13881 = vmatprep.subr.mxu1 %v18365_v60 }
 0x75c   :  { %14610 = vrcp.f32 %v4866_v41  ;;  %8929 = vrot.lane.b32.xlu0 %v18423_v61, %s14965_s1  ;;  %v18428_v41 = vld [vmem:[#allocation59_spill] sm:$0xff] }
 0x75d   :  { %14612 = vrcp.f32 %v4863_v22  ;;  %13869 = vmatmul.mubr.msk.f32.vlgmr.msra.gmra.mrb[58].mxu0 %vm855_vm2, %v4904_v23  ;;  %v18429_v22 = vld [vmem:[#allocation51_spill] sm:$0xff] }
 0x75e   :  { %v14603_v29 = vpop.eup %14602  ;;  %13877 = vmatpush3.msra.mxu0 %v18424_v45  ;;  %13878 = vmatprep.mubr.msk.f32.mxu0 %vm14955_vm1, %v18365_v60 }
 0x75f   :  { %v14605_v36 = vpop.eup %14604  ;;  %v4872_v20 = vpop.xlane.xlu1 %4871  ;;  %13886 = vmatprep.subr.mxu0 %v18365_v60  ;;  %v4906_v19 = vmul.f32 %v14603_v29, %v16378_v5 }
 0x760   :  { %v4869_v57 = vpop.xlane.xlu0 %4868  ;;  %14614 = vrcp.f32 %v4872_v20  ;;  %9087 = vrot.lane.b32.xlu0 %v15456_v34, %s14964_s0  ;;  %v4905_v44 = vmul.f32 %v14605_v36, %v16381_v1  ;;  %v18427_v1 = vld [vmem:[#allocation33_spill] sm:$0xff]  ;;  %v18431_v36 = vld [vmem:[#allocation52_spill] sm:$0xff] }
 0x761   :  { %14616 = vrcp.f32 %v4869_v57  ;;  %13879 = vmatmul.mubr.msk.f32.vlgmr.msra.gmra.mrb[60].mxu0 %vm855_vm2, %v4906_v19 }
 0x762   :  { %v14607_v6 = vpop.eup %14606  ;;  %13874 = vmatmul.mubr.msk.f32.vlgmr.msra.gmra.mrb[60].mxu1 %vm855_vm2, %v4905_v44  ;;  %13887 = vmatpush3.msra.mxu0 %v18425_v40  ;;  %v18432_v44 = vld [vmem:[#allocation62_spill] sm:$0xff] }
 0x763   :  { %v14609_v27 = vpop.eup %14608  ;;  %13882 = vmatpush3.msra.mxu1 %v18426_v15  ;;  %v4878_v50 = vpop.xlane.xlu1 %4877  ;;  %13888 = vmatprep.mubr.msk.f32.mxu0 %vm14955_vm1, %v18365_v60  ;;  %v4908_v5 = vmul.f32 %v14607_v6, %v16387_v48 }
 0x764   :  { %v4875_v14 = vpop.xlane.xlu0 %4874  ;;  %14618 = vrcp.f32 %v4878_v50  ;;  %13896 = vmatprep.subr.mxu0 %v18365_v60  ;;  %9085 = vrot.lane.b32.xlu0 %v18427_v1, %s14965_s1  ;;  %v4907_v12 = vmul.f32 %v14609_v27, %v16390_v52  ;;  %v18434_v27 = vld [vmem:[#allocation63_spill] sm:$0xff]  ;;  %v18438_v50 = vld [vmem:[#allocation66_spill] sm:$0xff] }
 0x765   :  { %14620 = vrcp.f32 %v4875_v14  ;;  %13883 = vmatprep.mubr.msk.f32.mxu1 %vm14955_vm1, %v18365_v60  ;;  %13891 = vmatprep.subr.mxu1 %v18365_v60 }
 0x766   :  { %v14611_v38 = vpop.eup %14610  ;;  %13884 = vmatmul.mubr.msk.f32.vlgmr.msra.gmra.mrb[62].mxu1 %vm855_vm2, %v4907_v12  ;;  %13889 = vmatmul.mubr.msk.f32.vlgmr.msra.gmra.mrb[62].mxu0 %vm855_vm2, %v4908_v5  ;;  %v18439_v5 = vld [vmem:[#allocation67_spill] sm:$0xff] }
 0x767   :  { %v14613_v48 = vpop.eup %14612  ;;  %13892 = vmatpush3.msra.mxu1 %v18428_v41  ;;  %13897 = vmatpush3.msra.mxu0 %v18429_v22  ;;  %v4881_v23 = vpop.xlane.xlu1 %4880  ;;  %v4910_v61 = vmul.f32 %v14611_v38, %v16396_v16  ;;  %v18430_v16 = vld [vmem:[#allocation61_spill] sm:$0xff] }
 0x768   :  { %14622 = vrcp.f32 %v4881_v23  ;;  %13893 = vmatprep.mubr.msk.f32.mxu1 %vm14955_vm1, %v18365_v60  ;;  %13898 = vmatprep.mubr.msk.f32.mxu0 %vm14955_vm1, %v18365_v60  ;;  %v4909_v52 = vmul.f32 %v14613_v48, %v16399_v4  ;;  %v18440_v23 = vld [vmem:[#allocation55_spill] sm:$0xff] }
 0x769   :  { %13901 = vmatprep.subr.mxu1 %v18365_v60  ;;  %13906 = vmatprep.subr.mxu0 %v18365_v60 }
 0x76a   :  { %v14615_v29 = vpop.eup %14614  ;;  %13894 = vmatmul.mubr.msk.f32.vlgmr.msra.gmra.mrb[64].mxu1 %vm855_vm2, %v4909_v52  ;;  %13899 = vmatmul.mubr.msk.f32.vlgmr.msra.gmra.mrb[64].mxu0 %vm855_vm2, %v4910_v61 }
 0x76b   :  { %v14617_v45 = vpop.eup %14616  ;;  %13902 = vmatpush3.msra.mxu1 %v18430_v16  ;;  %13907 = vmatpush3.msra.mxu0 %v18431_v36  ;;  %v4912_v20 = vmul.f32 %v14615_v29, %v16405_v24  ;;  %v18433_v24 = vld [vmem:[#allocation53_spill] sm:$0xff]  ;;  %v6680_v14 = vpop.permute.xlu1 %6679  ;;  %v18442_v29 = vld [vmem:[#allocation58_spill] sm:$0xff]  ;;  %v18443_v36 = vld [vmem:[#allocation60_spill] sm:$0xff] }
 0x76c   :  { %13903 = vmatprep.mubr.msk.f32.mxu1 %vm14955_vm1, %v18365_v60  ;;  %13908 = vmatprep.mubr.msk.f32.mxu0 %vm14955_vm1, %v18365_v60  ;;  %v4911_v4 = vmul.f32 %v14617_v45, %v16407_v46 }
 0x76d   :  { %13911 = vmatprep.subr.mxu1 %v18365_v60  ;;  %13916 = vmatprep.subr.mxu0 %v18365_v60 }
 0x76e   :  { %v14619_v57 = vpop.eup %14618  ;;  %13904 = vmatmul.mubr.msk.f32.vlgmr.msra.gmra.mrb[66].mxu1 %vm855_vm2, %v4911_v4  ;;  %13909 = vmatmul.mubr.msk.f32.vlgmr.msra.gmra.mrb[66].mxu0 %vm855_vm2, %v4912_v20 }
 0x76f   :  { %v14621_v19 = vpop.eup %14620  ;;  %13912 = vmatpush3.msra.mxu1 %v18432_v44  ;;  %13917 = vmatpush3.msra.mxu0 %v18433_v24  ;;  %v4914_v6 = vmul.f32 %v14619_v57, %v16413_v58  ;;  %v18435_v58 = vld [vmem:[#allocation54_spill] sm:$0xff]  ;;  %v6838_v1 = vpop.permute.xlu1 %6837 }
 0x770   :  { %13913 = vmatprep.mubr.msk.f32.mxu1 %vm14955_vm1, %v18365_v60  ;;  %13918 = vmatprep.mubr.msk.f32.mxu0 %vm14955_vm1, %v18365_v60  ;;  %v4913_v46 = vmul.f32 %v14621_v19, %v16415_v8  ;;  %v18436_v8 = vld [vmem:[#allocation64_spill] sm:$0xff] }
 0x771   :  { %13921 = vmatprep.subr.mxu1 %v18365_v60  ;;  %13926 = vmatprep.subr.mxu0 %v18365_v60 }
 0x772   :  { %v14623_v40 = vpop.eup %14622  ;;  %13914 = vmatmul.mubr.msk.f32.vlgmr.msra.gmra.mrb[68].mxu1 %vm855_vm2, %v4913_v46  ;;  %13919 = vmatmul.mubr.msk.f32.vlgmr.msra.gmra.mrb[68].mxu0 %vm855_vm2, %v4914_v6 }
 0x773   :  { %13922 = vmatpush3.msra.mxu1 %v18434_v27  ;;  %13927 = vmatpush3.msra.mxu0 %v18435_v58  ;;  %v4915_v15 = vmul.f32 %v14623_v40, %v16421_v37  ;;  %v18437_v37 = vld [vmem:[#allocation65_spill] sm:$0xff] }
 0x774   :  { %13923 = vmatprep.mubr.msk.f32.mxu1 %vm14955_vm1, %v18365_v60  ;;  %13931 = vmatprep.subr.mxu1 %v18365_v60 }
 0x775   :  { %13928 = vmatprep.mubr.msk.f32.mxu0 %vm14955_vm1, %v18365_v60  ;;  %13936 = vmatprep.subr.mxu0 %v18365_v60 }
 0x776   :  { %13924 = vmatmul.mubr.msk.f32.vlgmr.msra.gmra.mrb[70].mxu1 %vm855_vm2, %v4915_v15 }
 0x777   :  { %13933 = vmatprep.mubr.msk.f32.mxu1 %vm14955_vm1, %v18365_v60 }
 0x77a   :  { %13932 = vmatpush3.xpose.msk.msra.mxu1 %vm855_vm2, %v18436_v8 }
 0x77b   :  { %13941 = vmatprep.subr.mxu1 %v18365_v60 }
 0x77d   :  { %13934 = vmatmul.mubr.msk.f32.vlgmr.msra.gmra.mrb[72].mxu1 %vm855_vm2, %v18437_v37 }
 0x77e   :  { %13942 = vmatpush3.xpose.msk.msra.mxu1 %vm855_vm2, %v18438_v50  ;;  %13943 = vmatprep.mubr.msk.f32.mxu1 %vm14955_vm1, %v18365_v60 }
 0x77f   :  { %13951 = vmatprep.subr.mxu1 %v18365_v60 }
 0x781   :  { %13944 = vmatmul.mubr.msk.f32.vlgmr.msra.gmra.mrb[74].mxu1 %vm855_vm2, %v18439_v5 }
 0x782   :  { %13952 = vmatpush3.xpose.msk.msra.mxu1 %vm855_vm2, %v16500_v56  ;;  %13953 = vmatprep.mubr.msk.f32.mxu1 %vm14955_vm1, %v18365_v60  ;;  %v6836_v56 = vpop.permute.xlu1 %6835 }
 0x783   :  { %13961 = vmatprep.subr.mxu1 %v18365_v60 }
 0x785   :  { %13954 = vmatmul.mubr.msk.f32.vlgmr.msra.gmra.mrb[76].mxu1 %vm855_vm2, %v16510_v13 }
 0x786   :  { %13962 = vmatpush3.xpose.msk.msra.mxu1 %vm855_vm2, %v16516_v9  ;;  %13963 = vmatprep.mubr.msk.f32.mxu1 %vm14955_vm1, %v18365_v60  ;;  %v6994_v13 = vpop.permute.xlu1 %6993 }
 0x787   :  { %v4884_v12 = vpop.xlane.xlu0 %4883  ;;  %13971 = vmatprep.subr.mxu1 %v18365_v60 }
 0x788   :  { %14624 = vrcp.f32 %v4884_v12 }
 0x78a   :  { %v6992_v61 = vpop.permute.xlu1 %6991 }
 0x78b   :  { %v6602_v38 = vpop.permute.xlu0 %6601 }
 0x78c   :  { %13964 = vmatmul.mubr.msk.f32.vlgmr.msra.gmra.mrb[78].mxu1 %vm855_vm2, %v6602_v38 }
 0x78d   :  { %13973 = vmatprep.mubr.msk.f32.mxu1 %vm14955_vm1, %v18365_v60 }
 0x78e   :  { %v7150_v16 = vpop.permute.xlu1 %7149 }
 0x78f   :  { %v6760_v48 = vpop.permute.xlu0 %6759 }
 0x790   :  { %13972 = vmatpush3.xpose.msk.msra.mxu1 %vm855_vm2, %v6760_v48 }
 0x791   :  { %13981 = vmatprep.subr.mxu1 %v18365_v60 }
 0x792   :  { %v14625_v9 = vpop.eup %14624 }
 0x793   :  { %v6758_v41 = vpop.permute.xlu0 %6757  ;;  %v4916_v22 = vmul.f32 %v14625_v9, %v16438_v7  ;;  %v18441_v7 = vld [vmem:[#allocation56_spill] sm:$0xff] }
 0x794   :  { %13974 = vmatmul.mubr.msk.f32.vlgmr.msra.gmra.mrb[80].mxu1 %vm855_vm2, %v6758_v41 }
 0x795   :  { %13929 = vmatmul.mubr.msk.f32.vlgmr.msra.gmra.mrb[70].mxu0 %vm855_vm2, %v4916_v22  ;;  %13983 = vmatprep.mubr.msk.f32.mxu1 %vm14955_vm1, %v18365_v60 }
 0x796   :  { %13937 = vmatpush3.xpose.msk.msra.mxu0 %vm855_vm2, %v18440_v23  ;;  %13938 = vmatprep.mubr.msk.f32.mxu0 %vm14955_vm1, %v18365_v60 }
 0x797   :  { %v6916_v52 = vpop.permute.xlu0 %6915  ;;  %13946 = vmatprep.subr.mxu0 %v18365_v60 }
 0x798   :  { %13982 = vmatpush3.xpose.msk.msra.mxu1 %vm855_vm2, %v6916_v52 }
 0x799   :  { %13939 = vmatmul.mubr.msk.f32.vlgmr.msra.gmra.mrb[72].mxu0 %vm855_vm2, %v18441_v7  ;;  %13991 = vmatprep.subr.mxu1 %v18365_v60 }
 0x79a   :  { %13947 = vmatpush3.xpose.msk.msra.mxu0 %vm855_vm2, %v18442_v29  ;;  %13948 = vmatprep.mubr.msk.f32.mxu0 %vm14955_vm1, %v18365_v60 }
 0x79b   :  { %v6914_v45 = vpop.permute.xlu0 %6913  ;;  %13956 = vmatprep.subr.mxu0 %v18365_v60 }
 0x79c   :  { %13984 = vmatmul.mubr.msk.f32.vlgmr.msra.gmra.mrb[82].mxu1 %vm855_vm2, %v6914_v45 }
 0x79d   :  { %13949 = vmatmul.mubr.msk.f32.vlgmr.msra.gmra.mrb[74].mxu0 %vm855_vm2, %v18443_v36  ;;  %13993 = vmatprep.mubr.msk.f32.mxu1 %vm14955_vm1, %v18365_v60 }
 0x79e   :  { %13957 = vmatpush3.xpose.msk.msra.mxu0 %vm855_vm2, %v16425_v59  ;;  %13958 = vmatprep.mubr.msk.f32.mxu0 %vm14955_vm1, %v18365_v60  ;;  %v7148_v59 = vpop.permute.xlu1 %7147 }
 0x79f   :  { %v7072_v20 = vpop.permute.xlu0 %7071  ;;  %13966 = vmatprep.subr.mxu0 %v18365_v60 }
 0x7a0   :  { %13992 = vmatpush3.xpose.msk.msra.mxu1 %vm855_vm2, %v7072_v20 }
 0x7a1   :  { %13959 = vmatmul.mubr.msk.f32.vlgmr.msra.gmra.mrb[76].mxu0 %vm855_vm2, %v16427_v43  ;;  %14001 = vmatprep.subr.mxu1 %v18365_v60 }
 0x7a2   :  { %13967 = vmatpush3.xpose.msk.msra.mxu0 %vm855_vm2, %v16468_v53  ;;  %13968 = vmatprep.mubr.msk.f32.mxu0 %vm14955_vm1, %v18365_v60  ;;  %v7306_v53 = vpop.permute.xlu1 %7305 }
 0x7a3   :  { %v7070_v4 = vpop.permute.xlu0 %7069  ;;  %13976 = vmatprep.subr.mxu0 %v18365_v60 }
 0x7a4   :  { %13994 = vmatmul.mubr.msk.f32.vlgmr.msra.gmra.mrb[84].mxu1 %vm855_vm2, %v7070_v4 }
 0x7a5   :  { %13969 = vmatmul.mubr.msk.f32.vlgmr.msra.gmra.mrb[78].mxu0 %vm855_vm2, %v6680_v14  ;;  %14003 = vmatprep.mubr.msk.f32.mxu1 %vm14955_vm1, %v18365_v60 }
 0x7a6   :  { %13977 = vmatpush3.xpose.msk.msra.mxu0 %vm855_vm2, %v6838_v1  ;;  %13978 = vmatprep.mubr.msk.f32.mxu0 %vm14955_vm1, %v18365_v60  ;;  %v7304_v19 = vpop.permute.xlu1 %7303 }
 0x7a7   :  { %v7228_v43 = vpop.permute.xlu0 %7227  ;;  %13986 = vmatprep.subr.mxu0 %v18365_v60 }
 0x7a8   :  { %14002 = vmatpush3.xpose.msk.msra.mxu1 %vm855_vm2, %v7228_v43  ;;  %v16752_v43 = vld [vmem:[#allocation2] sm:$0xff] }
 0x7a9   :  { %13979 = vmatmul.mubr.msk.f32.vlgmr.msra.gmra.mrb[80].mxu0 %vm855_vm2, %v6836_v56  ;;  %14011 = vmatprep.subr.mxu1 %v18365_v60  ;;  %18459 = vst [vmem:[#allocation65_spill] sm:$0xff] %v16752_v43 }
 0x7aa   :  { %13987 = vmatpush3.xpose.msk.msra.mxu0 %vm855_vm2, %v6994_v13  ;;  %13988 = vmatprep.mubr.msk.f32.mxu0 %vm14955_vm1, %v18365_v60  ;;  %v7634_v24 = vpop.permute.xlu1 %7633 }
 0x7ab   :  { %v7226_v57 = vpop.permute.xlu0 %7225  ;;  %13996 = vmatprep.subr.mxu0 %v18365_v60 }
 0x7ac   :  { %14004 = vmatmul.mubr.msk.f32.vlgmr.msra.gmra.mrb[86].mxu1 %vm855_vm2, %v7226_v57 }
 0x7ad   :  { %13989 = vmatmul.mubr.msk.f32.vlgmr.msra.gmra.mrb[82].mxu0 %vm855_vm2, %v6992_v61  ;;  %14013 = vmatprep.mubr.msk.f32.mxu1 %vm14955_vm1, %v18365_v60 }
 0x7ae   :  { %13997 = vmatpush3.xpose.msk.msra.mxu0 %vm855_vm2, %v7150_v16  ;;  %13998 = vmatprep.mubr.msk.f32.mxu0 %vm14955_vm1, %v18365_v60 }
 0x7af   :  { %v7558_v44 = vpop.permute.xlu0 %7557  ;;  %14006 = vmatprep.subr.mxu0 %v18365_v60 }
 0x7b0   :  { %14012 = vmatpush3.msra.mxu1 %v7558_v44 }
 0x7b1   :  { %13999 = vmatmul.mubr.msk.f32.vlgmr.msra.gmra.mrb[84].mxu0 %vm855_vm2, %v7148_v59  ;;  %14021 = vmatprep.subr.mxu1 %v18365_v60 }
 0x7b2   :  { %14007 = vmatpush3.xpose.msk.msra.mxu0 %vm855_vm2, %v7306_v53  ;;  %14008 = vmatprep.mubr.msk.f32.mxu0 %vm14955_vm1, %v18365_v60 }
 0x7b3   :  { %14016 = vmatprep.subr.mxu0 %v18365_v60 }
 0x7b5   :  { %14009 = vmatmul.mubr.msk.f32.vlgmr.msra.gmra.mrb[86].mxu0 %vm855_vm2, %v7304_v19 }
 0x7b6   :  { %14017 = vmatpush3.msra.mxu0 %v7634_v24  ;;  %14018 = vmatprep.mubr.msk.f32.mxu0 %vm14955_vm1, %v18365_v60 }
 0x7b7   :  { %14026 = vmatprep.subr.mxu0 %v18365_v60 }
 0x802   :  { %v16722_v6 = vpop.f32.mrb[56].mxu0 }
 0x803   :  { %18444 = vst [vmem:[#allocation57_spill] sm:$0xff] %v16722_v6  ;;  %v13860_v46 = vpop.f32.mrb[57].mxu0 }
 0x828   :  { %v16724_v40 = vpop.f32.mrb[56].mxu1 }
 0x829   :  { %18445 = vst [vmem:[#allocation30_spill] sm:$0xff] %v16724_v40  ;;  %v13855_v27 = vpop.f32.mrb[57].mxu1 }
 0x82c   :  { %v16726_v58 = vpop.f32.mrb[58].mxu1 }
 0x82d   :  { %18446 = vst [vmem:[#allocation45_spill] sm:$0xff] %v16726_v58  ;;  %v13865_v15 = vpop.f32.mrb[59].mxu1 }
 0x830   :  { %v16728_v8 = vpop.f32.mrb[58].mxu0 }
 0x831   :  { %18447 = vst [vmem:[#allocation34_spill] sm:$0xff] %v16728_v8  ;;  %v13870_v37 = vpop.f32.mrb[59].mxu0 }
 0x834   :  { %v16730_v50 = vpop.f32.mrb[60].mxu0 }
 0x835   :  { %18448 = vst [vmem:[#allocation47_spill] sm:$0xff] %v16730_v50  ;;  %v16732_v14 = vpop.f32.mrb[60].mxu1  ;;  %v13880_v5 = vpop.f32.mrb[61].mxu0 }
 0x836   :  { %18449 = vst [vmem:[#allocation33_spill] sm:$0xff] %v16732_v14  ;;  %v13875_v1 = vpop.f32.mrb[61].mxu1 }
 0x839   :  { %v16734_v12 = vpop.f32.mrb[62].mxu1  ;;  %v16736_v56 = vpop.f32.mrb[62].mxu0 }
 0x83a   :  { %18450 = vst [vmem:[#allocation59_spill] sm:$0xff] %v16734_v12  ;;  %18451 = vst [vmem:[#allocation51_spill] sm:$0xff] %v16736_v56  ;;  %v13885_v38 = vpop.f32.mrb[63].mxu1  ;;  %v13890_v48 = vpop.f32.mrb[63].mxu0 }
 0x83d   :  { %v16738_v13 = vpop.f32.mrb[64].mxu1  ;;  %v16740_v9 = vpop.f32.mrb[64].mxu0 }
 0x83e   :  { %18452 = vst [vmem:[#allocation61_spill] sm:$0xff] %v16738_v13  ;;  %18453 = vst [vmem:[#allocation52_spill] sm:$0xff] %v16740_v9  ;;  %v13895_v41 = vpop.f32.mrb[65].mxu1  ;;  %v13900_v22 = vpop.f32.mrb[65].mxu0 }
 0x841   :  { %v16742_v23 = vpop.f32.mrb[66].mxu1  ;;  %v16744_v61 = vpop.f32.mrb[66].mxu0 }
 0x842   :  { %18454 = vst [vmem:[#allocation62_spill] sm:$0xff] %v16742_v23  ;;  %18455 = vst [vmem:[#allocation53_spill] sm:$0xff] %v16744_v61  ;;  %v13905_v52 = vpop.f32.mrb[67].mxu1  ;;  %v13910_v7 = vpop.f32.mrb[67].mxu0 }
 0x845   :  { %v16746_v29 = vpop.f32.mrb[68].mxu1  ;;  %v16748_v45 = vpop.f32.mrb[68].mxu0 }
 0x846   :  { %18456 = vst [vmem:[#allocation63_spill] sm:$0xff] %v16746_v29  ;;  %18457 = vst [vmem:[#allocation54_spill] sm:$0xff] %v16748_v45  ;;  %v13915_v16 = vpop.f32.mrb[69].mxu1  ;;  %v13920_v36 = vpop.f32.mrb[69].mxu0 }
 0x849   :  { %v16750_v20 = vpop.f32.mrb[70].mxu1 }
 0x84a   :  { %18458 = vst [vmem:[#allocation64_spill] sm:$0xff] %v16750_v20  ;;  %v13925_v59 = vpop.f32.mrb[71].mxu1 }
 0x850   :  { %v6207_v4 = vpop.f32.mrb[72].mxu1 }
 0x851   :  { %v16755_v53 = vadd.f32 %v16752_v43, %v6207_v4  ;;  %v13935_v57 = vpop.f32.mrb[73].mxu1 }
 0x853   :  { %v7381_v19 = vsel %vm855_vm2, %v16755_v53, -inf }
 0x854   :  { %7382 = vmax.xlane.f32.xlu0 %v7381_v19  ;;  %v6363_v44 = vpop.f32.mrb[74].mxu1 }
 0x855   :  { %v16760_v24 = vadd.f32 %v16752_v43, %v6363_v44  ;;  %v13945_v46 = vpop.f32.mrb[75].mxu1 }
 0x857   :  { %v7387_v27 = vsel %vm855_vm2, %v16760_v24, -inf }
 0x858   :  { %7388 = vmax.xlane.f32.xlu0 %v7387_v27  ;;  %v6519_v15 = vpop.f32.mrb[76].mxu1 }
 0x859   :  { %v13955_v37 = vpop.f32.mrb[77].mxu1  ;;  %v16775_v46 = vadd.f32 %v16752_v43, %v6519_v15 }
 0x85f   :  { %v6675_v5 = vpop.f32.mrb[78].mxu1 }
 0x860   :  { %v13965_v1 = vpop.f32.mrb[79].mxu1 }
 0x867   :  { %v6831_v38 = vpop.f32.mrb[80].mxu1 }
 0x868   :  { %v16764_v48 = vpop.f32.mrb[70].mxu0  ;;  %v13975_v41 = vpop.f32.mrb[81].mxu1 }
 0x869   :  { %18460 = vst [vmem:[#allocation66_spill] sm:$0xff] %v16764_v48  ;;  %v13930_v22 = vpop.f32.mrb[71].mxu0 }
 0x86a   :  { %v16783_v22 = vadd.f32 %v16752_v43, %v6675_v5 }
 0x86c   :  { %v6285_v52 = vpop.f32.mrb[72].mxu0 }
 0x86d   :  { %v16767_v7 = vadd.f32 %v16752_v43, %v6285_v52  ;;  %v13940_v16 = vpop.f32.mrb[73].mxu0 }
 0x86e   :  { %v7393_v16 = vsel %vm855_vm2, %v16775_v46, -inf }
 0x86f   :  { %v6987_v36 = vpop.f32.mrb[82].mxu1  ;;  %v7384_v59 = vsel %vm855_vm2, %v16767_v7, -inf }
 0x870   :  { %7385 = vmax.xlane.f32.xlu1 %v7384_v59  ;;  %v6441_v4 = vpop.f32.mrb[74].mxu0  ;;  %v13985_v57 = vpop.f32.mrb[83].mxu1 }
 0x871   :  { %v16772_v19 = vadd.f32 %v16752_v43, %v6441_v4  ;;  %v13950_v44 = vpop.f32.mrb[75].mxu0 }
 0x873   :  { %v7390_v27 = vsel %vm855_vm2, %v16772_v19, -inf }
 0x874   :  { %7391 = vmax.xlane.f32.xlu0 %v7390_v27  ;;  %v6597_v37 = vpop.f32.mrb[76].mxu0  ;;  %v16793_v27 = vadd.f32 %v16752_v43, %v6831_v38 }
 0x875   :  { %v16780_v1 = vadd.f32 %v16752_v43, %v6597_v37  ;;  %v13960_v41 = vpop.f32.mrb[77].mxu0  ;;  %v7399_v37 = vsel %vm855_vm2, %v16783_v22, -inf }
 0x877   :  { %v7143_v52 = vpop.f32.mrb[84].mxu1  ;;  %v7396_v15 = vsel %vm855_vm2, %v16780_v1, -inf }
 0x878   :  { %7394 = vmax.xlane.f32.xlu0 %v7393_v16  ;;  %7397 = vmax.xlane.f32.xlu1 %v7396_v15  ;;  %v6753_v59 = vpop.f32.mrb[78].mxu0  ;;  %v13995_v4 = vpop.f32.mrb[85].mxu1 }
 0x879   :  { %v16790_v57 = vadd.f32 %v16752_v43, %v6753_v59  ;;  %v13970_v44 = vpop.f32.mrb[79].mxu0  ;;  %v16803_v59 = vadd.f32 %v16752_v43, %v6987_v36 }
 0x87a   :  { %v7405_v44 = vsel %vm855_vm2, %v16793_v27, -inf }
 0x87b   :  { %v7402_v5 = vsel %vm855_vm2, %v16790_v57, -inf  ;;  %v7411_v29 = vsel %vm855_vm2, %v16803_v59, -inf }
 0x87c   :  { %7403 = vmax.xlane.f32.xlu1 %v7402_v5  ;;  %v6909_v41 = vpop.f32.mrb[80].mxu0  ;;  %7400 = vmax.xlane.f32.xlu0 %v7399_v37 }
 0x87d   :  { %v16800_v16 = vadd.f32 %v16752_v43, %v6909_v41  ;;  %v13980_v15 = vpop.f32.mrb[81].mxu0 }
 0x87e   :  { %v16813_v15 = vadd.f32 %v16752_v43, %v7143_v52 }
 0x87f   :  { %v7299_v4 = vpop.f32.mrb[86].mxu1  ;;  %v7408_v38 = vsel %vm855_vm2, %v16800_v16, -inf }
 0x880   :  { %7409 = vmax.xlane.f32.xlu1 %v7408_v38  ;;  %v7065_v20 = vpop.f32.mrb[82].mxu0  ;;  %7406 = vmax.xlane.f32.xlu0 %v7405_v44  ;;  %v14005_v5 = vpop.f32.mrb[87].mxu1 }
 0x881   :  { %v16810_v37 = vadd.f32 %v16752_v43, %v7065_v20  ;;  %v13990_v41 = vpop.f32.mrb[83].mxu0  ;;  %v16823_v20 = vadd.f32 %v16752_v43, %v7299_v4  ;;  %v7417_v5 = vsel %vm855_vm2, %v16813_v15, -inf }
 0x883   :  { %v7414_v36 = vsel %vm855_vm2, %v16810_v37, -inf  ;;  %v7423_v4 = vsel %vm855_vm2, %v16823_v20, -inf }
 0x884   :  { %7415 = vmax.xlane.f32.xlu1 %v7414_v36  ;;  %v7221_v23 = vpop.f32.mrb[84].mxu0  ;;  %7412 = vmax.xlane.f32.xlu0 %v7411_v29 }
 0x885   :  { %v16820_v38 = vadd.f32 %v16752_v43, %v7221_v23  ;;  %v14000_v44 = vpop.f32.mrb[85].mxu0 }
 0x886   :  { %v16836_v44 = vpop.permute.xlu0 %7709 }
 0x887   :  { %v7420_v52 = vsel %vm855_vm2, %v16820_v38, -inf }
 0x888   :  { %7421 = vmax.xlane.f32.xlu1 %v7420_v52  ;;  %v7377_v41 = vpop.f32.mrb[86].mxu0  ;;  %7418 = vmax.xlane.f32.xlu0 %v7417_v5 }
 0x889   :  { %v16830_v36 = vadd.f32 %v16752_v43, %v7377_v41  ;;  %v14010_v29 = vpop.f32.mrb[87].mxu0  ;;  %v16846_v41 = vpop.permute.xlu1 %7785 }
 0x88a   :  { %v16840_v52 = vpop.permute.xlu0 %7861 }
 0x88b   :  { %v7426_v23 = vsel %vm855_vm2, %v16830_v36, -inf }
 0x88c   :  { %7427 = vmax.xlane.f32.xlu1 %v7426_v23  ;;  %7424 = vmax.xlane.f32.xlu0 %v7423_v4 }
 0x88d   :  { %v16850_v13 = vpop.permute.xlu1 %7937 }
 0x88e   :  { %v16844_v5 = vpop.permute.xlu0 %8165 }
 0x88f   :  { %18461 = vst [vmem:[#allocation67_spill] sm:$0xff] %v16844_v5 }
 0x891   :  { %v16854_v4 = vpop.permute.xlu1 %8013 }
 0x892   :  { %v16848_v29 = vpop.permute.xlu0 %8317 }
 0x893   :  { %18462 = vst [vmem:[#allocation55_spill] sm:$0xff] %v16848_v29 }
 0x895   :  { %v16858_v14 = vpop.permute.xlu1 %8089 }
 0x896   :  { %v16852_v23 = vpop.permute.xlu0 %8469 }
 0x897   :  { %18463 = vst [vmem:[#allocation56_spill] sm:$0xff] %v16852_v23 }
 0x899   :  { %v16862_v48 = vpop.permute.xlu1 %8241 }
 0x89a   :  { %v16856_v12 = vpop.permute.xlu0 %8621 }
 0x89b   :  { %18464 = vst [vmem:[#allocation58_spill] sm:$0xff] %v16856_v12 }
 0x89d   :  { %9321 = vrot.lane.b32.xlu1 %v15470_v47, %s14964_s0  ;;  %v16866_v45 = vpop.permute.xlu1 %8393 }
 0x89e   :  { %v16860_v58 = vpop.permute.xlu0 %8775  ;;  %18467 = vst [vmem:[#allocation69_spill] sm:$0xff] %v16866_v45 }
 0x89f   :  { %18465 = vst [vmem:[#allocation60_spill] sm:$0xff] %v16860_v58 }
 0x8a1   :  { %v16870_v9 = vpop.permute.xlu1 %8545 }
 0x8a2   :  { %9243 = vrot.lane.b32.xlu0 %v15464_v17, %s14964_s0  ;;  %v16864_v40 = vpop.permute.xlu0 %8773  ;;  %18469 = vst [vmem:[#allocation71_spill] sm:$0xff] %v16870_v9 }
 0x8a3   :  { %18466 = vst [vmem:[#allocation68_spill] sm:$0xff] %v16864_v40 }
 0x8a5   :  { %v16874_v50 = vpop.permute.xlu1 %8697 }
 0x8a6   :  { %v16868_v61 = vpop.permute.xlu0 %8931  ;;  %18471 = vst [vmem:[#allocation73_spill] sm:$0xff] %v16874_v50 }
 0x8a7   :  { %18468 = vst [vmem:[#allocation70_spill] sm:$0xff] %v16868_v61 }
 0x8a9   :  { %v16878_v6 = vpop.permute.xlu1 %8853 }
 0x8aa   :  { %v16872_v56 = vpop.permute.xlu0 %8929  ;;  %18473 = vst [vmem:[#allocation75_spill] sm:$0xff] %v16878_v6 }
 0x8ab   :  { %18470 = vst [vmem:[#allocation72_spill] sm:$0xff] %v16872_v56 }
 0x8ad   :  { %v16882_v58 = vpop.permute.xlu1 %8851 }
 0x8ae   :  { %v16876_v8 = vpop.permute.xlu0 %9087  ;;  %18475 = vst [vmem:[#allocation77_spill] sm:$0xff] %v16882_v58 }
 0x8af   :  { %18472 = vst [vmem:[#allocation74_spill] sm:$0xff] %v16876_v8 }
 0x8b1   :  { %v16886_v9 = vpop.permute.xlu1 %9009 }
 0x8b2   :  { %v16880_v43 = vpop.permute.xlu0 %9085  ;;  %18476 = vst [vmem:[#allocation78_spill] sm:$0xff] %v16886_v9 }
 0x8b3   :  { %18474 = vst [vmem:[#allocation76_spill] sm:$0xff] %v16880_v43 }
 0x8b5   :  { %v16888_v50 = vpop.permute.xlu1 %9007 }
 0x8b6   :  { %18477 = vst [vmem:[#allocation79_spill] sm:$0xff] %v16888_v50 }
 0x8b9   :  { %v16894_v58 = vpop.permute.xlu1 %9165 }
 0x8ba   :  { %18478 = vst [vmem:[#allocation80_spill] sm:$0xff] %v16894_v58 }
 0x8e1   :  { %v7383_v12 = vpop.xlane.xlu0 %7382 }
 0x8e2   :  { %v7429_v40 = vsub.f32 %v16755_v53, %v7383_v12  ;;  %v16900_v53 = vpop.permute.xlu1 %9163 }
 0x8e3   :  { %18479 = vst [vmem:[#allocation81_spill] sm:$0xff] %v16900_v53 }
 0x8e4   :  { %v7445_v23 = vmul.f32 1.442695, %v7429_v40 }
 0x8e5   :  { %v7389_v29 = vpop.xlane.xlu0 %7388 }
 0x8e6   :  { %14626 = vpow2.f32 %v7445_v23  ;;  %v7431_v61 = vsub.f32 %v16760_v24, %v7389_v29 }
 0x8e8   :  { %v7449_v56 = vmul.f32 1.442695, %v7431_v61 }
 0x8ea   :  { %14628 = vpow2.f32 %v7449_v56 }
 0x8f0   :  { %v16890_v8 = vpop.eup %14626 }
 0x8f1   :  { %v7477_v43 = vsel %vm855_vm2, %v16890_v8, 0.0 }
 0x8f2   :  { %7478 = vadd.xlane.f32.xlu0 %v7477_v43 }
 0x8f4   :  { %v16896_v12 = vpop.eup %14628 }
 0x8f5   :  { %v7483_v40 = vsel %vm855_vm2, %v16896_v12, 0.0 }
 0x8f6   :  { %7484 = vadd.xlane.f32.xlu0 %v7483_v40 }
 0x8fd   :  { %v7386_v61 = vpop.xlane.xlu1 %7385 }
 0x8fe   :  { %v7430_v56 = vsub.f32 %v16767_v7, %v7386_v61 }
 0x900   :  { %v7447_v24 = vmul.f32 1.442695, %v7430_v56 }
 0x901   :  { %v7392_v29 = vpop.xlane.xlu0 %7391 }
 0x902   :  { %14630 = vpow2.f32 %v7447_v24  ;;  %v7432_v23 = vsub.f32 %v16772_v19, %v7392_v29 }
 0x904   :  { %v7451_v50 = vmul.f32 1.442695, %v7432_v23 }
 0x905   :  { %v7398_v43 = vpop.xlane.xlu1 %7397  ;;  %v7395_v9 = vpop.xlane.xlu0 %7394 }
 0x906   :  { %14632 = vpow2.f32 %v7451_v50  ;;  %v7434_v58 = vsub.f32 %v16780_v1, %v7398_v43  ;;  %v7433_v6 = vsub.f32 %v16775_v46, %v7395_v9 }
 0x908   :  { %v7455_v45 = vmul.f32 1.442695, %v7434_v58  ;;  %v7453_v40 = vmul.f32 1.442695, %v7433_v6 }
 0x909   :  { %v7404_v5 = vpop.xlane.xlu1 %7403  ;;  %v7401_v53 = vpop.xlane.xlu0 %7400 }
 0x90a   :  { %14634 = vpow2.f32 %v7455_v45  ;;  %v7436_v7 = vsub.f32 %v16790_v57, %v7404_v5  ;;  %v7435_v61 = vsub.f32 %v16783_v22, %v7401_v53 }
 0x90b   :  { %14636 = vpow2.f32 %v7453_v40 }
 0x90c   :  { %v16908_v56 = vpop.eup %14630  ;;  %v7459_v19 = vmul.f32 1.442695, %v7436_v7  ;;  %v7457_v24 = vmul.f32 1.442695, %v7435_v61 }
 0x90d   :  { %v7410_v29 = vpop.xlane.xlu1 %7409  ;;  %v7407_v50 = vpop.xlane.xlu0 %7406  ;;  %v7480_v1 = vsel %vm855_vm2, %v16908_v56, 0.0 }
 0x90e   :  { %14638 = vpow2.f32 %v7459_v19  ;;  %v7438_v6 = vsub.f32 %v16800_v16, %v7410_v29  ;;  %v7437_v58 = vsub.f32 %v16793_v27, %v7407_v50  ;;  %7481 = vadd.xlane.f32.xlu1 %v7480_v1 }
 0x90f   :  { %14640 = vpow2.f32 %v7457_v24 }
 0x910   :  { %v16914_v9 = vpop.eup %14632  ;;  %v7463_v45 = vmul.f32 1.442695, %v7438_v6  ;;  %v7461_v46 = vmul.f32 1.442695, %v7437_v58 }
 0x911   :  { %v7416_v22 = vpop.xlane.xlu1 %7415  ;;  %v7413_v57 = vpop.xlane.xlu0 %7412  ;;  %v7486_v5 = vsel %vm855_vm2, %v16914_v9, 0.0 }
 0x912   :  { %14642 = vpow2.f32 %v7463_v45  ;;  %v7440_v53 = vsub.f32 %v16810_v37, %v7416_v22  ;;  %v7439_v23 = vsub.f32 %v16803_v59, %v7413_v57  ;;  %7487 = vadd.xlane.f32.xlu1 %v7486_v5 }
 0x913   :  { %14644 = vpow2.f32 %v7461_v46 }
 0x914   :  { %v16920_v16 = vpop.eup %14634  ;;  %v7467_v27 = vmul.f32 1.442695, %v7440_v53  ;;  %v7465_v43 = vmul.f32 1.442695, %v7439_v23 }
 0x915   :  { %v16922_v40 = vpop.eup %14636  ;;  %v7419_v7 = vpop.xlane.xlu0 %7418  ;;  %v7492_v61 = vsel %vm855_vm2, %v16920_v16, 0.0 }
 0x916   :  { %14646 = vpow2.f32 %v7467_v27  ;;  %v7441_v19 = vsub.f32 %v16813_v15, %v7419_v7  ;;  %7493 = vadd.xlane.f32.xlu1 %v7492_v61  ;;  %v7489_v37 = vsel %vm855_vm2, %v16922_v40, 0.0  ;;  %v7422_v27 = vpop.xlane.xlu1 %7421 }
 0x917   :  { %14648 = vpow2.f32 %v7465_v43  ;;  %7490 = vadd.xlane.f32.xlu0 %v7489_v37  ;;  %v7442_v43 = vsub.f32 %v16820_v38, %v7422_v27  ;;  %v18481_v27 = vld [vmem:[#allocation69_spill] sm:$0xff] }
 0x918   :  { %v16929_v59 = vpop.eup %14638  ;;  %v7469_v24 = vmul.f32 1.442695, %v7441_v19 }
 0x919   :  { %v16931_v29 = vpop.eup %14640  ;;  %v7498_v50 = vsel %vm855_vm2, %v16929_v59, 0.0  ;;  %v7425_v7 = vpop.xlane.xlu0 %7424  ;;  %v7471_v19 = vmul.f32 1.442695, %v7442_v43 }
 0x91a   :  { %7499 = vadd.xlane.f32.xlu1 %v7498_v50  ;;  %v7495_v1 = vsel %vm855_vm2, %v16931_v29, 0.0  ;;  %14650 = vpow2.f32 %v7469_v24  ;;  %v7428_v61 = vpop.xlane.xlu1 %7427  ;;  %v7443_v37 = vsub.f32 %v16823_v20, %v7425_v7  ;;  %v18482_v7 = vld [vmem:[#allocation55_spill] sm:$0xff] }
 0x91b   :  { %7496 = vadd.xlane.f32.xlu0 %v7495_v1  ;;  %v7444_v24 = vsub.f32 %v16830_v36, %v7428_v61  ;;  %14652 = vpow2.f32 %v7471_v19  ;;  %v18483_v61 = vld [vmem:[#allocation71_spill] sm:$0xff] }
 0x91c   :  { %v16937_v15 = vpop.eup %14642  ;;  %v7473_v50 = vmul.f32 1.442695, %v7443_v37  ;;  %v18484_v37 = vld [vmem:[#allocation56_spill] sm:$0xff] }
 0x91d   :  { %v16939_v6 = vpop.eup %14644  ;;  %v7504_v58 = vsel %vm855_vm2, %v16937_v15, 0.0  ;;  %v7475_v1 = vmul.f32 1.442695, %v7444_v24 }
 0x91e   :  { %7505 = vadd.xlane.f32.xlu1 %v7504_v58  ;;  %v7501_v45 = vsel %vm855_vm2, %v16939_v6, 0.0  ;;  %14654 = vpow2.f32 %v7473_v50 }
 0x91f   :  { %7502 = vadd.xlane.f32.xlu0 %v7501_v45  ;;  %14656 = vpow2.f32 %v7475_v1  ;;  %v16990_v45 = vpop.permute.xlu0 %9243 }
 0x920   :  { %v16945_v46 = vpop.eup %14646 }
 0x921   :  { %v16947_v22 = vpop.eup %14648  ;;  %v7510_v57 = vsel %vm855_vm2, %v16945_v46, 0.0 }
 0x922   :  { %7511 = vadd.xlane.f32.xlu1 %v7510_v57  ;;  %v7507_v5 = vsel %vm855_vm2, %v16947_v22, 0.0 }
 0x923   :  { %7508 = vadd.xlane.f32.xlu0 %v7507_v5 }
 0x924   :  { %v16953_v53 = vpop.eup %14650 }
 0x925   :  { %v7513_v23 = vsel %vm855_vm2, %v16953_v53, 0.0  ;;  %v16964_v58 = vpop.eup %14652 }
 0x927   :  { %7514 = vadd.xlane.f32.xlu0 %v7513_v23 }
 0x933   :  { %9319 = vrot.lane.b32.xlu1 %v15625_v54, %s14965_s1  ;;  %v7516_v54 = vsel %vm855_vm2, %v16964_v58, 0.0 }
 0x93d   :  { %9241 = vrot.lane.b32.xlu0 %v15604_v32, %s14965_s1  ;;  %v16968_v32 = vpop.eup %14654 }
 0x93e   :  { %v16970_v38 = vpop.eup %14656  ;;  %v7519_v20 = vsel %vm855_vm2, %v16968_v32, 0.0 }
 0x93f   :  { %v7522_v36 = vsel %vm855_vm2, %v16970_v38, 0.0 }
 0x957   :  { %7517 = vadd.xlane.f32.xlu1 %v7516_v54 }
 0x95b   :  { %7520 = vadd.xlane.f32.xlu1 %v7519_v20 }
 0x95c   :  { %7523 = vadd.xlane.f32.xlu0 %v7522_v36 }
 0x96c   :  { %9477 = vrot.lane.b32.xlu1 %v15478_v49, %s14964_s0 }
 0x970   :  { %9475 = vrot.lane.b32.xlu1 %v15590_v30, %s14965_s1 }
 0x972   :  { %9399 = vrot.lane.b32.xlu0 %v15472_v10, %s14964_s0 }
 0x974   :  { %9633 = vrot.lane.b32.xlu1 %v15486_v0, %s14964_s0 }
 0x976   :  { %9397 = vrot.lane.b32.xlu0 %v15640_v62, %s14965_s1 }
 0x978   :  { %9631 = vrot.lane.b32.xlu1 %v15607_v35, %s14965_s1 }
 0x97a   :  { %9555 = vrot.lane.b32.xlu0 %v15480_v51, %s14964_s0 }
 0x97c   :  { %9789 = vrot.lane.b32.xlu1 %v15494_v3, %s14964_s0 }
 0x97e   :  { %9553 = vrot.lane.b32.xlu0 %v15655_v26, %s14965_s1 }
 0x97f   :  { %v7479_v30 = vpop.xlane.xlu0 %7478 }
 0x980   :  { %14658 = vrcp.f32 %v7479_v30  ;;  %9787 = vrot.lane.b32.xlu1 %v15622_v42, %s14965_s1 }
 0x982   :  { %9711 = vrot.lane.b32.xlu0 %v15488_v55, %s14964_s0 }
 0x983   :  { %v7485_v35 = vpop.xlane.xlu0 %7484 }
 0x984   :  { %14660 = vrcp.f32 %v7485_v35  ;;  %9945 = vrot.lane.b32.xlu1 %v15502_v11, %s14964_s0 }
 0x986   :  { %9709 = vrot.lane.b32.xlu0 %v15667_v21, %s14965_s1 }
 0x988   :  { %9943 = vrot.lane.b32.xlu1 %v15643_v63, %s14965_s1 }
 0x98a   :  { %v14659_v62 = vpop.eup %14658  ;;  %9867 = vrot.lane.b32.xlu0 %v15496_v18, %s14964_s0 }
 0x98b   :  { %v7541_v42 = vmul.f32 %v14659_v62, %v16890_v8 }
 0x98c   :  { %10273 = vrot.lane.b32.xlu1 %v15442_v2, %s14966_s28  ;;  %v17032_v2 = vpop.permute.xlu1 %9321 }
 0x98d   :  { %14014 = vmatmul.mubr.msk.f32.vlgmr.msra.gmra.mrb[88].mxu1 %vm855_vm2, %v7541_v42 }
 0x98e   :  { %v14661_v26 = vpop.eup %14660  ;;  %14022 = vmatpush3.msra.mxu1 %v16836_v44  ;;  %9865 = vrot.lane.b32.xlu0 %v15676_v28, %s14965_s1 }
 0x98f   :  { %14023 = vmatprep.mubr.msk.f32.mxu1 %vm14955_vm1, %v18365_v60  ;;  %14031 = vmatprep.subr.mxu1 %v18365_v60  ;;  %v7543_v63 = vmul.f32 %v14661_v26, %v16896_v12 }
 0x990   :  { %10425 = vrot.lane.b32.xlu1 %v15454_v33, %s14966_s28 }
 0x991   :  { %14024 = vmatmul.mubr.msk.f32.vlgmr.msra.gmra.mrb[90].mxu1 %vm855_vm2, %v7543_v63  ;;  %v18486_v63 = vld [vmem:[#allocation73_spill] sm:$0xff] }
 0x992   :  { %14032 = vmatpush3.msra.mxu1 %v16840_v52  ;;  %10197 = vrot.lane.b32.xlu0 %v15444_v25, %s14966_s28 }
 0x993   :  { %14033 = vmatprep.mubr.msk.f32.mxu1 %vm14955_vm1, %v18365_v60  ;;  %14041 = vmatprep.subr.mxu1 %v18365_v60 }
 0x994   :  { %10501 = vrot.lane.b32.xlu1 %v15456_v34, %s14966_s28 }
 0x996   :  { %10349 = vrot.lane.b32.xlu0 %v15450_v31, %s14966_s28 }
 0x998   :  { %10577 = vrot.lane.b32.xlu1 %v15462_v39, %s14966_s28 }
 0x99a   :  { %10653 = vrot.lane.b32.xlu0 %v15464_v17, %s14966_s28 }
 0x99b   :  { %v7482_v25 = vpop.xlane.xlu1 %7481 }
 0x99c   :  { %14662 = vrcp.f32 %v7482_v25  ;;  %10729 = vrot.lane.b32.xlu1 %v15470_v47, %s14966_s28 }
 0x99e   :  { %10805 = vrot.lane.b32.xlu0 %v15472_v10, %s14966_s28 }
 0x99f   :  { %v7488_v33 = vpop.xlane.xlu1 %7487 }
 0x9a0   :  { %14664 = vrcp.f32 %v7488_v33  ;;  %10881 = vrot.lane.b32.xlu1 %v15478_v49, %s14966_s28 }
 0x9a3   :  { %v7494_v31 = vpop.xlane.xlu1 %7493 }
 0x9a4   :  { %14666 = vrcp.f32 %v7494_v31  ;;  %v7491_v34 = vpop.xlane.xlu0 %7490 }
 0x9a5   :  { %14668 = vrcp.f32 %v7491_v34 }
 0x9a6   :  { %v14663_v39 = vpop.eup %14662 }
 0x9a7   :  { %v7500_v21 = vpop.xlane.xlu1 %7499  ;;  %v7542_v17 = vmul.f32 %v14663_v39, %v16908_v56 }
 0x9a8   :  { %14670 = vrcp.f32 %v7500_v21  ;;  %v7497_v28 = vpop.xlane.xlu0 %7496 }
 0x9a9   :  { %14672 = vrcp.f32 %v7497_v28  ;;  %14019 = vmatmul.mubr.msk.f32.vlgmr.msra.gmra.mrb[88].mxu0 %vm855_vm2, %v7542_v17  ;;  %v18490_v28 = vld [vmem:[#allocation70_spill] sm:$0xff] }
 0x9aa   :  { %v14665_v47 = vpop.eup %14664  ;;  %14027 = vmatpush3.msra.mxu0 %v16846_v41  ;;  %14028 = vmatprep.mubr.msk.f32.mxu0 %vm14955_vm1, %v18365_v60 }
 0x9ab   :  { %v7506_v10 = vpop.xlane.xlu1 %7505  ;;  %14036 = vmatprep.subr.mxu0 %v18365_v60  ;;  %v7544_v49 = vmul.f32 %v14665_v47, %v16914_v9  ;;  %v18491_v47 = vld [vmem:[#allocation77_spill] sm:$0xff] }
 0x9ac   :  { %14674 = vrcp.f32 %v7506_v10  ;;  %v7503_v8 = vpop.xlane.xlu0 %7502 }
 0x9ad   :  { %14676 = vrcp.f32 %v7503_v8  ;;  %14029 = vmatmul.mubr.msk.f32.vlgmr.msra.gmra.mrb[90].mxu0 %vm855_vm2, %v7544_v49  ;;  %v18492_v49 = vld [vmem:[#allocation78_spill] sm:$0xff]  ;;  %v18493_v8 = vld [vmem:[#allocation72_spill] sm:$0xff] }
 0x9ae   :  { %v14667_v44 = vpop.eup %14666  ;;  %14037 = vmatpush3.msra.mxu0 %v16850_v13  ;;  %14038 = vmatprep.mubr.msk.f32.mxu0 %vm14955_vm1, %v18365_v60 }
 0x9af   :  { %v14669_v52 = vpop.eup %14668  ;;  %v7512_v41 = vpop.xlane.xlu1 %7511  ;;  %14046 = vmatprep.subr.mxu0 %v18365_v60  ;;  %v7546_v12 = vmul.f32 %v14667_v44, %v16920_v16  ;;  %v18494_v44 = vld [vmem:[#allocation74_spill] sm:$0xff] }
 0x9b0   :  { %14678 = vrcp.f32 %v7512_v41  ;;  %v7509_v56 = vpop.xlane.xlu0 %7508  ;;  %v7545_v9 = vmul.f32 %v14669_v52, %v16922_v40  ;;  %v18495_v41 = vld [vmem:[#allocation79_spill] sm:$0xff] }
 0x9b1   :  { %14680 = vrcp.f32 %v7509_v56  ;;  %14039 = vmatmul.mubr.msk.f32.vlgmr.msra.gmra.mrb[92].mxu0 %vm855_vm2, %v7546_v12  ;;  %v18496_v12 = vld [vmem:[#allocation80_spill] sm:$0xff] }
 0x9b2   :  { %v14671_v57 = vpop.eup %14670  ;;  %14034 = vmatmul.mubr.msk.f32.vlgmr.msra.gmra.mrb[92].mxu1 %vm855_vm2, %v7545_v9  ;;  %14047 = vmatpush3.msra.mxu0 %v16858_v14  ;;  %v18497_v56 = vld [vmem:[#allocation76_spill] sm:$0xff] }
 0x9b3   :  { %v14673_v13 = vpop.eup %14672  ;;  %14042 = vmatpush3.msra.mxu1 %v16854_v4  ;;  %14043 = vmatprep.mubr.msk.f32.mxu1 %vm14955_vm1, %v18365_v60  ;;  %v7548_v16 = vmul.f32 %v14671_v57, %v16929_v59  ;;  %v18480_v59 = vld [vmem:[#allocation67_spill] sm:$0xff]  ;;  %v17110_v24 = vpop.permute.xlu1 %9319  ;;  %v18498_v57 = vld [vmem:[#allocation81_spill] sm:$0xff] }
 0x9b4   :  { %v7515_v5 = vpop.xlane.xlu0 %7514  ;;  %14048 = vmatprep.mubr.msk.f32.mxu0 %vm14955_vm1, %v18365_v60  ;;  %14051 = vmatprep.subr.mxu1 %v18365_v60  ;;  %v7547_v40 = vmul.f32 %v14673_v13, %v16931_v29 }
 0x9b5   :  { %14682 = vrcp.f32 %v7515_v5  ;;  %14056 = vmatprep.subr.mxu0 %v18365_v60  ;;  %14049 = vmatmul.mubr.msk.f32.vlgmr.msra.gmra.mrb[94].mxu0 %vm855_vm2, %v7548_v16 }
 0x9b6   :  { %v14675_v14 = vpop.eup %14674  ;;  %14044 = vmatmul.mubr.msk.f32.vlgmr.msra.gmra.mrb[94].mxu1 %vm855_vm2, %v7547_v40  ;;  %14057 = vmatpush3.msra.mxu0 %v16862_v48 }
 0x9b7   :  { %v14677_v4 = vpop.eup %14676  ;;  %14052 = vmatpush3.msra.mxu1 %v18480_v59  ;;  %14053 = vmatprep.mubr.msk.f32.mxu1 %vm14955_vm1, %v18365_v60  ;;  %v7550_v23 = vmul.f32 %v14675_v14, %v16937_v15 }
 0x9b8   :  { %14058 = vmatprep.mubr.msk.f32.mxu0 %vm14955_vm1, %v18365_v60  ;;  %14061 = vmatprep.subr.mxu1 %v18365_v60  ;;  %v7549_v29 = vmul.f32 %v14677_v4, %v16939_v6  ;;  %v9242_v1 = vpop.permute.xlu0 %9241 }
 0x9b9   :  { %14066 = vmatprep.subr.mxu0 %v18365_v60  ;;  %14059 = vmatmul.mubr.msk.f32.vlgmr.msra.gmra.mrb[96].mxu0 %vm855_vm2, %v7550_v23 }
 0x9ba   :  { %v14679_v48 = vpop.eup %14678  ;;  %14054 = vmatmul.mubr.msk.f32.vlgmr.msra.gmra.mrb[96].mxu1 %vm855_vm2, %v7549_v29  ;;  %14067 = vmatpush3.msra.mxu0 %v18481_v27 }
 0x9bb   :  { %v14681_v43 = vpop.eup %14680  ;;  %14062 = vmatpush3.msra.mxu1 %v18482_v7  ;;  %14063 = vmatprep.mubr.msk.f32.mxu1 %vm14955_vm1, %v18365_v60  ;;  %v7552_v15 = vmul.f32 %v14679_v48, %v16945_v46 }
 0x9bc   :  { %14068 = vmatprep.mubr.msk.f32.mxu0 %vm14955_vm1, %v18365_v60  ;;  %14071 = vmatprep.subr.mxu1 %v18365_v60  ;;  %v7551_v6 = vmul.f32 %v14681_v43, %v16947_v22  ;;  %v18485_v22 = vld [vmem:[#allocation58_spill] sm:$0xff] }
 0x9bd   :  { %14076 = vmatprep.subr.mxu0 %v18365_v60  ;;  %14069 = vmatmul.mubr.msk.f32.vlgmr.msra.gmra.mrb[98].mxu0 %vm855_vm2, %v7552_v15 }
 0x9be   :  { %14064 = vmatmul.mubr.msk.f32.vlgmr.msra.gmra.mrb[98].mxu1 %vm855_vm2, %v7551_v6  ;;  %14077 = vmatpush3.msra.mxu0 %v18483_v61 }
 0x9bf   :  { %v14683_v19 = vpop.eup %14682  ;;  %14072 = vmatpush3.msra.mxu1 %v18484_v37  ;;  %14073 = vmatprep.mubr.msk.f32.mxu1 %vm14955_vm1, %v18365_v60 }
 0x9c0   :  { %14081 = vmatprep.subr.mxu1 %v18365_v60  ;;  %v7553_v46 = vmul.f32 %v14683_v19, %v16953_v53  ;;  %14078 = vmatprep.mubr.msk.f32.mxu0 %vm14955_vm1, %v18365_v60 }
 0x9c1   :  { %14086 = vmatprep.subr.mxu0 %v18365_v60 }
 0x9c2   :  { %14074 = vmatmul.mubr.msk.f32.vlgmr.msra.gmra.mrb[100].mxu1 %vm855_vm2, %v7553_v46 }
 0x9c3   :  { %14082 = vmatpush3.msra.mxu1 %v18485_v22  ;;  %14083 = vmatprep.mubr.msk.f32.mxu1 %vm14955_vm1, %v18365_v60 }
 0x9c4   :  { %14091 = vmatprep.subr.mxu1 %v18365_v60 }
 0x9e4   :  { %v7518_v50 = vpop.xlane.xlu1 %7517 }
 0x9e5   :  { %14684 = vrcp.f32 %v7518_v50 }
 0x9e8   :  { %v7521_v53 = vpop.xlane.xlu1 %7520 }
 0x9e9   :  { %14686 = vrcp.f32 %v7521_v53  ;;  %v7524_v54 = vpop.xlane.xlu0 %7523 }
 0x9ea   :  { %14688 = vrcp.f32 %v7524_v54 }
 0x9ec   :  { %v9478_v20 = vpop.permute.xlu1 %9477 }
 0x9ed   :  { %v9400_v36 = vpop.permute.xlu0 %9399 }
 0x9ef   :  { %v14685_v30 = vpop.eup %14684 }
 0x9f0   :  { %v17112_v35 = vpop.permute.xlu1 %9475  ;;  %v7554_v62 = vmul.f32 %v14685_v30, %v16964_v58  ;;  %v18487_v58 = vld [vmem:[#allocation60_spill] sm:$0xff] }
 0x9f1   :  { %v9398_v42 = vpop.permute.xlu0 %9397 }
 0x9f2   :  { %14079 = vmatmul.mubr.msk.f32.vlgmr.msra.gmra.mrb[100].mxu0 %vm855_vm2, %v7554_v62 }
 0x9f3   :  { %v14687_v26 = vpop.eup %14686  ;;  %14087 = vmatpush3.msra.mxu0 %v18486_v63  ;;  %14088 = vmatprep.mubr.msk.f32.mxu0 %vm14955_vm1, %v18365_v60 }
 0x9f4   :  { %v14689_v25 = vpop.eup %14688  ;;  %v7555_v33 = vmul.f32 %v14687_v26, %v16968_v32  ;;  %14096 = vmatprep.subr.mxu0 %v18365_v60  ;;  %v9634_v31 = vpop.permute.xlu1 %9633  ;;  %v18488_v32 = vld [vmem:[#allocation75_spill] sm:$0xff] }
 0x9f5   :  { %v9556_v34 = vpop.permute.xlu0 %9555  ;;  %v7556_v39 = vmul.f32 %v14689_v25, %v16970_v38  ;;  %v18489_v38 = vld [vmem:[#allocation68_spill] sm:$0xff] }
 0x9f6   :  { %14084 = vmatmul.mubr.msk.f32.vlgmr.msra.gmra.mrb[102].mxu1 %vm855_vm2, %v7555_v33 }
 0x9f7   :  { %14089 = vmatmul.mubr.msk.f32.vlgmr.msra.gmra.mrb[102].mxu0 %vm855_vm2, %v7556_v39  ;;  %14092 = vmatpush3.xpose.msk.msra.mxu1 %vm855_vm2, %v18487_v58  ;;  %v18499_v58 = vld [vmem:[#allocation65_spill] sm:$0xff] }
 0x9f8   :  { %14093 = vmatprep.mubr.msk.f32.mxu1 %vm14955_vm1, %v18365_v60  ;;  %14101 = vmatprep.subr.mxu1 %v18365_v60  ;;  %v9632_v17 = vpop.permute.xlu1 %9631 }
 0x9f9   :  { %v9554_v21 = vpop.permute.xlu0 %9553  ;;  %14098 = vmatprep.mubr.msk.f32.mxu0 %vm14955_vm1, %v18365_v60 }
 0x9fa   :  { %14097 = vmatpush3.xpose.msk.msra.mxu0 %vm855_vm2, %v18488_v32  ;;  %14094 = vmatmul.mubr.msk.f32.vlgmr.msra.gmra.mrb[104].mxu1 %vm855_vm2, %v18489_v38 }
 0x9fb   :  { %14102 = vmatpush3.xpose.msk.msra.mxu1 %vm855_vm2, %v18490_v28  ;;  %14106 = vmatprep.subr.mxu0 %v18365_v60 }
 0x9fc   :  { %14103 = vmatprep.mubr.msk.f32.mxu1 %vm14955_vm1, %v18365_v60  ;;  %14111 = vmatprep.subr.mxu1 %v18365_v60  ;;  %v9790_v52 = vpop.permute.xlu1 %9789 }
 0x9fd   :  { %14099 = vmatmul.mubr.msk.f32.vlgmr.msra.gmra.mrb[104].mxu0 %vm855_vm2, %v18491_v47  ;;  %v9712_v10 = vpop.permute.xlu0 %9711 }
 0x9fe   :  { %14107 = vmatpush3.xpose.msk.msra.mxu0 %vm855_vm2, %v18492_v49  ;;  %14104 = vmatmul.mubr.msk.f32.vlgmr.msra.gmra.mrb[106].mxu1 %vm855_vm2, %v18493_v8 }
 0x9ff   :  { %14112 = vmatpush3.xpose.msk.msra.mxu1 %vm855_vm2, %v18494_v44  ;;  %14108 = vmatprep.mubr.msk.f32.mxu0 %vm14955_vm1, %v18365_v60 }
 0xa00   :  { %14116 = vmatprep.subr.mxu0 %v18365_v60  ;;  %14113 = vmatprep.mubr.msk.f32.mxu1 %vm14955_vm1, %v18365_v60 }
 0xa01   :  { %14109 = vmatmul.mubr.msk.f32.vlgmr.msra.gmra.mrb[106].mxu0 %vm855_vm2, %v18495_v41  ;;  %14121 = vmatprep.subr.mxu1 %v18365_v60  ;;  %v9710_v9 = vpop.permute.xlu0 %9709 }
 0xa02   :  { %14117 = vmatpush3.xpose.msk.msra.mxu0 %vm855_vm2, %v18496_v12  ;;  %14114 = vmatmul.mubr.msk.f32.vlgmr.msra.gmra.mrb[108].mxu1 %vm855_vm2, %v18497_v56 }
 0xa03   :  { %14122 = vmatpush3.xpose.msk.msra.mxu1 %vm855_vm2, %v16990_v45  ;;  %14118 = vmatprep.mubr.msk.f32.mxu0 %vm14955_vm1, %v18365_v60  ;;  %v9788_v45 = vpop.permute.xlu1 %9787 }
 0xa04   :  { %14126 = vmatprep.subr.mxu0 %v18365_v60  ;;  %14123 = vmatprep.mubr.msk.f32.mxu1 %vm14955_vm1, %v18365_v60 }
 0xa05   :  { %14119 = vmatmul.mubr.msk.f32.vlgmr.msra.gmra.mrb[108].mxu0 %vm855_vm2, %v18498_v57  ;;  %14131 = vmatprep.subr.mxu1 %v18365_v60  ;;  %v9868_v13 = vpop.permute.xlu0 %9867 }
 0xa06   :  { %14127 = vmatpush3.xpose.msk.msra.mxu0 %vm855_vm2, %v17032_v2  ;;  %14124 = vmatmul.mubr.msk.f32.vlgmr.msra.gmra.mrb[110].mxu1 %vm855_vm2, %v9242_v1 }
 0xa07   :  { %14132 = vmatpush3.xpose.msk.msra.mxu1 %vm855_vm2, %v9400_v36  ;;  %14128 = vmatprep.mubr.msk.f32.mxu0 %vm14955_vm1, %v18365_v60  ;;  %v9946_v2 = vpop.permute.xlu1 %9945 }
 0xa08   :  { %14136 = vmatprep.subr.mxu0 %v18365_v60  ;;  %14133 = vmatprep.mubr.msk.f32.mxu1 %vm14955_vm1, %v18365_v60 }
 0xa09   :  { %14129 = vmatmul.mubr.msk.f32.vlgmr.msra.gmra.mrb[110].mxu0 %vm855_vm2, %v17110_v24  ;;  %14141 = vmatprep.subr.mxu1 %v18365_v60  ;;  %v9866_v16 = vpop.permute.xlu0 %9865 }
 0xa0a   :  { %14137 = vmatpush3.xpose.msk.msra.mxu0 %vm855_vm2, %v9478_v20  ;;  %14134 = vmatmul.mubr.msk.f32.vlgmr.msra.gmra.mrb[112].mxu1 %vm855_vm2, %v9398_v42 }
 0xa0b   :  { %14142 = vmatpush3.xpose.msk.msra.mxu1 %vm855_vm2, %v9556_v34  ;;  %14138 = vmatprep.mubr.msk.f32.mxu0 %vm14955_vm1, %v18365_v60  ;;  %v9944_v5 = vpop.permute.xlu1 %9943 }
 0xa0c   :  { %14146 = vmatprep.subr.mxu0 %v18365_v60  ;;  %14143 = vmatprep.mubr.msk.f32.mxu1 %vm14955_vm1, %v18365_v60 }
 0xa0d   :  { %14139 = vmatmul.mubr.msk.f32.vlgmr.msra.gmra.mrb[112].mxu0 %vm855_vm2, %v17112_v35  ;;  %14151 = vmatprep.subr.mxu1 %v18365_v60  ;;  %v10198_v40 = vpop.permute.xlu0 %10197 }
 0xa0e   :  { %14147 = vmatpush3.xpose.msk.msra.mxu0 %vm855_vm2, %v9634_v31  ;;  %14144 = vmatmul.mubr.msk.f32.vlgmr.msra.gmra.mrb[114].mxu1 %vm855_vm2, %v9554_v21 }
 0xa0f   :  { %14152 = vmatpush3.xpose.msk.msra.mxu1 %vm855_vm2, %v9712_v10  ;;  %14148 = vmatprep.mubr.msk.f32.mxu0 %vm14955_vm1, %v18365_v60  ;;  %v10274_v14 = vpop.permute.xlu1 %10273 }
 0xa10   :  { %14156 = vmatprep.subr.mxu0 %v18365_v60  ;;  %14153 = vmatprep.mubr.msk.f32.mxu1 %vm14955_vm1, %v18365_v60 }
 0xa11   :  { %14149 = vmatmul.mubr.msk.f32.vlgmr.msra.gmra.mrb[114].mxu0 %vm855_vm2, %v9632_v17  ;;  %14161 = vmatprep.subr.mxu1 %v18365_v60 }
 0xa12   :  { %14157 = vmatpush3.xpose.msk.msra.mxu0 %vm855_vm2, %v9790_v52  ;;  %14154 = vmatmul.mubr.msk.f32.vlgmr.msra.gmra.mrb[116].mxu1 %vm855_vm2, %v9710_v9 }
 0xa13   :  { %14162 = vmatpush3.xpose.msk.msra.mxu1 %vm855_vm2, %v9868_v13  ;;  %14158 = vmatprep.mubr.msk.f32.mxu0 %vm14955_vm1, %v18365_v60 }
 0xa14   :  { %14166 = vmatprep.subr.mxu0 %v18365_v60  ;;  %14163 = vmatprep.mubr.msk.f32.mxu1 %vm14955_vm1, %v18365_v60 }
 0xa15   :  { %14159 = vmatmul.mubr.msk.f32.vlgmr.msra.gmra.mrb[116].mxu0 %vm855_vm2, %v9788_v45  ;;  %14171 = vmatprep.subr.mxu1 %v18365_v60  ;;  %v14852_v45 = vld [vmem:[#allocation2] sm:$0xff] }
 0xa16   :  { %14167 = vmatpush3.xpose.msk.msra.mxu0 %vm855_vm2, %v9946_v2  ;;  %14164 = vmatmul.mubr.msk.f32.vlgmr.msra.gmra.mrb[118].mxu1 %vm855_vm2, %v9866_v16 }
 0xa17   :  { %14172 = vmatpush3.msra.mxu1 %v10198_v40  ;;  %14168 = vmatprep.mubr.msk.f32.mxu0 %vm14955_vm1, %v18365_v60 }
 0xa18   :  { %14176 = vmatprep.subr.mxu0 %v18365_v60  ;;  %14173 = vmatprep.mubr.msk.f32.mxu1 %vm14955_vm1, %v18365_v60 }
 0xa19   :  { %14169 = vmatmul.mubr.msk.f32.vlgmr.msra.gmra.mrb[118].mxu0 %vm855_vm2, %v9944_v5  ;;  %14181 = vmatprep.subr.mxu1 %v18365_v60 }
 0xa1a   :  { %14177 = vmatpush3.msra.mxu0 %v10274_v14  ;;  %14178 = vmatprep.mubr.msk.f32.mxu0 %vm14955_vm1, %v18365_v60 }
 0xa1b   :  { %14186 = vmatprep.subr.mxu0 %v18365_v60 }
 0xa60   :  { %v17226_v4 = vpop.f32.mrb[88].mxu1 }
 0xa61   :  { %v14015_v59 = vpop.f32.mrb[89].mxu1 }
 0xa64   :  { %v17228_v23 = vpop.f32.mrb[90].mxu1 }
 0xa65   :  { %v14025_v29 = vpop.f32.mrb[91].mxu1 }
 0xa7c   :  { %v17230_v48 = vpop.f32.mrb[88].mxu0 }
 0xa7d   :  { %v14020_v27 = vpop.f32.mrb[89].mxu0 }
 0xa80   :  { %v17232_v43 = vpop.f32.mrb[90].mxu0 }
 0xa81   :  { %v14030_v7 = vpop.f32.mrb[91].mxu0 }
 0xa84   :  { %v17234_v15 = vpop.f32.mrb[92].mxu0 }
 0xa85   :  { %v17236_v6 = vpop.f32.mrb[92].mxu1  ;;  %v14040_v61 = vpop.f32.mrb[93].mxu0 }
 0xa86   :  { %v14035_v19 = vpop.f32.mrb[93].mxu1 }
 0xa88   :  { %v17238_v37 = vpop.f32.mrb[94].mxu0 }
 0xa89   :  { %v17240_v46 = vpop.f32.mrb[94].mxu1  ;;  %v14050_v22 = vpop.f32.mrb[95].mxu0 }
 0xa8a   :  { %v14045_v24 = vpop.f32.mrb[95].mxu1 }
 0xa8c   :  { %v17242_v50 = vpop.f32.mrb[96].mxu0 }
 0xa8d   :  { %v17244_v1 = vpop.f32.mrb[96].mxu1  ;;  %v14060_v53 = vpop.f32.mrb[97].mxu0 }
 0xa8e   :  { %v14055_v54 = vpop.f32.mrb[97].mxu1 }
 0xa90   :  { %v17246_v20 = vpop.f32.mrb[98].mxu0 }
 0xa91   :  { %v17248_v36 = vpop.f32.mrb[98].mxu1  ;;  %v14070_v30 = vpop.f32.mrb[99].mxu0 }
 0xa92   :  { %v14065_v35 = vpop.f32.mrb[99].mxu1 }
 0xa95   :  { %v17250_v62 = vpop.f32.mrb[100].mxu1 }
 0xa96   :  { %v14075_v42 = vpop.f32.mrb[101].mxu1 }
 0xac5   :  { %v17252_v26 = vpop.f32.mrb[100].mxu0 }
 0xac6   :  { %v14080_v63 = vpop.f32.mrb[101].mxu0 }
 0xac9   :  { %v17254_v25 = vpop.f32.mrb[102].mxu1 }
 0xaca   :  { %v17256_v33 = vpop.f32.mrb[102].mxu0  ;;  %v14085_v31 = vpop.f32.mrb[103].mxu1 }
 0xacb   :  { %v14090_v34 = vpop.f32.mrb[103].mxu0 }
 0xacd   :  { %v8847_v39 = vpop.f32.mrb[104].mxu1 }
 0xace   :  { %v17259_v21 = vadd.f32 %v18499_v58, %v8847_v39  ;;  %v14095_v32 = vpop.f32.mrb[105].mxu1 }
 0xad0   :  { %v8925_v38 = vpop.f32.mrb[104].mxu0  ;;  %v10021_v17 = vsel %vm855_vm2, %v17259_v21, -inf }
 0xad1   :  { %v17264_v28 = vadd.f32 %v18499_v58, %v8925_v38  ;;  %v14100_v47 = vpop.f32.mrb[105].mxu0  ;;  %10022 = vmax.xlane.f32.xlu0 %v10021_v17  ;;  %v9003_v10 = vpop.f32.mrb[106].mxu1 }
 0xad2   :  { %v17267_v49 = vadd.f32 %v18499_v58, %v9003_v10  ;;  %v14105_v8 = vpop.f32.mrb[107].mxu1 }
 0xad3   :  { %v10024_v44 = vsel %vm855_vm2, %v17264_v28, -inf }
 0xad4   :  { %10025 = vmax.xlane.f32.xlu1 %v10024_v44  ;;  %v9081_v52 = vpop.f32.mrb[106].mxu0  ;;  %v10027_v41 = vsel %vm855_vm2, %v17267_v49, -inf }
 0xad5   :  { %v17274_v12 = vadd.f32 %v18499_v58, %v9081_v52  ;;  %v14110_v56 = vpop.f32.mrb[107].mxu0  ;;  %10028 = vmax.xlane.f32.xlu0 %v10027_v41  ;;  %v9159_v9 = vpop.f32.mrb[108].mxu1 }
 0xad6   :  { %v14115_v57 = vpop.f32.mrb[109].mxu1  ;;  %v17276_v13 = vadd.f32 %v14852_v45, %v9159_v9 }
 0xad7   :  { %v10030_v16 = vsel %vm855_vm2, %v17274_v12, -inf }
 0xad8   :  { %v9237_v2 = vpop.f32.mrb[108].mxu0  ;;  %v10033_v61 = vsel %vm855_vm2, %v17276_v13, -inf }
 0xad9   :  { %v17280_v5 = vadd.f32 %v14852_v45, %v9237_v2  ;;  %v14120_v40 = vpop.f32.mrb[109].mxu0  ;;  %v9315_v14 = vpop.f32.mrb[110].mxu1  ;;  %10031 = vmax.xlane.f32.xlu0 %v10030_v16 }
 0xada   :  { %v14125_v59 = vpop.f32.mrb[111].mxu1  ;;  %v17284_v27 = vadd.f32 %v14852_v45, %v9315_v14 }
 0xadb   :  { %v10036_v29 = vsel %vm855_vm2, %v17280_v5, -inf }
 0xadc   :  { %10037 = vmax.xlane.f32.xlu1 %v10036_v29  ;;  %v9393_v7 = vpop.f32.mrb[110].mxu0  ;;  %v10039_v42 = vsel %vm855_vm2, %v17284_v27, -inf }
 0xadd   :  { %v17288_v19 = vadd.f32 %v14852_v45, %v9393_v7  ;;  %v14130_v22 = vpop.f32.mrb[111].mxu0  ;;  %10034 = vmax.xlane.f32.xlu0 %v10033_v61  ;;  %v9471_v24 = vpop.f32.mrb[112].mxu1 }
 0xade   :  { %v14135_v53 = vpop.f32.mrb[113].mxu1  ;;  %v17292_v30 = vadd.f32 %v14852_v45, %v9471_v24 }
 0xadf   :  { %v10042_v54 = vsel %vm855_vm2, %v17288_v19, -inf }
 0xae0   :  { %10043 = vmax.xlane.f32.xlu1 %v10042_v54  ;;  %v9549_v35 = vpop.f32.mrb[112].mxu0  ;;  %v10045_v17 = vsel %vm855_vm2, %v17292_v30, -inf  ;;  %v17334_v54 = vpop.permute.xlu1 %10425 }
 0xae1   :  { %v17296_v63 = vadd.f32 %v14852_v45, %v9549_v35  ;;  %v14140_v31 = vpop.f32.mrb[113].mxu0  ;;  %10040 = vmax.xlane.f32.xlu0 %v10039_v42  ;;  %v9627_v34 = vpop.f32.mrb[114].mxu1 }
 0xae2   :  { %v14145_v39 = vpop.f32.mrb[115].mxu1  ;;  %v17300_v32 = vadd.f32 %v14852_v45, %v9627_v34 }
 0xae3   :  { %v10048_v58 = vsel %vm855_vm2, %v17296_v63, -inf }
 0xae4   :  { %10049 = vmax.xlane.f32.xlu1 %v10048_v58  ;;  %v9705_v38 = vpop.f32.mrb[114].mxu0  ;;  %v10051_v9 = vsel %vm855_vm2, %v17300_v32, -inf  ;;  %v17336_v35 = vpop.permute.xlu1 %10501 }
 0xae5   :  { %v17304_v47 = vadd.f32 %v14852_v45, %v9705_v38  ;;  %v14150_v10 = vpop.f32.mrb[115].mxu0  ;;  %10046 = vmax.xlane.f32.xlu0 %v10045_v17  ;;  %v9783_v8 = vpop.f32.mrb[116].mxu1 }
 0xae6   :  { %v14155_v44 = vpop.f32.mrb[117].mxu1  ;;  %v17308_v41 = vadd.f32 %v14852_v45, %v9783_v8 }
 0xae7   :  { %v10054_v52 = vsel %vm855_vm2, %v17304_v47, -inf }
 0xae8   :  { %10055 = vmax.xlane.f32.xlu1 %v10054_v52  ;;  %v9861_v56 = vpop.f32.mrb[116].mxu0  ;;  %v10057_v7 = vsel %vm855_vm2, %v17308_v41, -inf  ;;  %v17340_v42 = vpop.permute.xlu1 %10577 }
 0xae9   :  { %v17312_v57 = vadd.f32 %v14852_v45, %v9861_v56  ;;  %v14160_v2 = vpop.f32.mrb[117].mxu0  ;;  %10052 = vmax.xlane.f32.xlu0 %v10051_v9  ;;  %v9939_v16 = vpop.f32.mrb[118].mxu1 }
 0xaea   :  { %v14165_v40 = vpop.f32.mrb[119].mxu1  ;;  %v17316_v59 = vadd.f32 %v14852_v45, %v9939_v16 }
 0xaeb   :  { %v10060_v14 = vsel %vm855_vm2, %v17312_v57, -inf }
 0xaec   :  { %10061 = vmax.xlane.f32.xlu1 %v10060_v14  ;;  %v10017_v29 = vpop.f32.mrb[118].mxu0  ;;  %v10063_v22 = vsel %vm855_vm2, %v17316_v59, -inf }
 0xaed   :  { %v14170_v61 = vpop.f32.mrb[119].mxu0  ;;  %10058 = vmax.xlane.f32.xlu0 %v10057_v7  ;;  %v17328_v24 = vadd.f32 %v14852_v45, %v10017_v29 }
 0xaef   :  { %v10066_v53 = vsel %vm855_vm2, %v17328_v24, -inf }
 0xaf1   :  { %10064 = vmax.xlane.f32.xlu0 %v10063_v22 }
 0xafd   :  { %11033 = vrot.lane.b32.xlu1 %v15486_v0, %s14966_s28  ;;  %v17338_v0 = vpop.permute.xlu0 %10349 }
 0xb07   :  { %10957 = vrot.lane.b32.xlu0 %v15480_v51, %s14966_s28  ;;  %v17342_v51 = vpop.permute.xlu0 %10653 }
 0xb0b   :  { %11109 = vrot.lane.b32.xlu0 %v15488_v55, %s14966_s28  ;;  %v17344_v55 = vpop.permute.xlu1 %10729  ;;  %v17346_v45 = vpop.permute.xlu0 %10805 }
 0xb0f   :  { %v17348_v31 = vpop.permute.xlu1 %10881 }
 0xb21   :  { %10067 = vmax.xlane.f32.xlu1 %v10066_v53 }
 0xb32   :  { %11185 = vrot.lane.b32.xlu1 %v15494_v3, %s14966_s28 }
 0xb5e   :  { %v10023_v34 = vpop.xlane.xlu0 %10022 }
 0xb5f   :  { %v10069_v39 = vsub.f32 %v17259_v21, %v10023_v34 }
 0xb61   :  { %v10085_v3 = vmul.f32 1.442695, %v10069_v39  ;;  %v10026_v58 = vpop.xlane.xlu1 %10025 }
 0xb62   :  { %v10070_v38 = vsub.f32 %v17264_v28, %v10026_v58  ;;  %v10029_v17 = vpop.xlane.xlu0 %10028 }
 0xb63   :  { %14690 = vpow2.f32 %v10085_v3  ;;  %v10071_v10 = vsub.f32 %v17267_v49, %v10029_v17 }
 0xb64   :  { %v10087_v8 = vmul.f32 1.442695, %v10070_v38 }
 0xb65   :  { %v10089_v44 = vmul.f32 1.442695, %v10071_v10 }
 0xb66   :  { %14692 = vpow2.f32 %v10087_v8  ;;  %v10032_v52 = vpop.xlane.xlu0 %10031 }
 0xb67   :  { %14694 = vpow2.f32 %v10089_v44  ;;  %v10072_v56 = vsub.f32 %v17274_v12, %v10032_v52 }
 0xb69   :  { %v10091_v9 = vmul.f32 1.442695, %v10072_v56  ;;  %v10038_v2 = vpop.xlane.xlu1 %10037 }
 0xb6a   :  { %v10074_v16 = vsub.f32 %v17280_v5, %v10038_v2  ;;  %v10035_v21 = vpop.xlane.xlu0 %10034 }
 0xb6b   :  { %14696 = vpow2.f32 %v10091_v9  ;;  %v10073_v40 = vsub.f32 %v17276_v13, %v10035_v21 }
 0xb6c   :  { %v10095_v28 = vmul.f32 1.442695, %v10074_v16 }
 0xb6d   :  { %v17356_v14 = vpop.eup %14690  ;;  %v10093_v29 = vmul.f32 1.442695, %v10073_v40  ;;  %v10044_v49 = vpop.xlane.xlu1 %10043 }
 0xb6e   :  { %14698 = vpow2.f32 %v10095_v28  ;;  %v10076_v7 = vsub.f32 %v17288_v19, %v10044_v49  ;;  %v10041_v61 = vpop.xlane.xlu0 %10040  ;;  %v10117_v12 = vsel %vm855_vm2, %v17356_v14, 0.0 }
 0xb6f   :  { %14700 = vpow2.f32 %v10093_v29  ;;  %v10075_v22 = vsub.f32 %v17284_v27, %v10041_v61  ;;  %10118 = vadd.xlane.f32.xlu0 %v10117_v12 }
 0xb70   :  { %v17362_v5 = vpop.eup %14692  ;;  %v10099_v53 = vmul.f32 1.442695, %v10076_v7 }
 0xb71   :  { %v17364_v13 = vpop.eup %14694  ;;  %v10097_v34 = vmul.f32 1.442695, %v10075_v22  ;;  %v10050_v39 = vpop.xlane.xlu1 %10049  ;;  %v10120_v3 = vsel %vm855_vm2, %v17362_v5, 0.0 }
 0xb72   :  { %14702 = vpow2.f32 %v10099_v53  ;;  %v10078_v19 = vsub.f32 %v17296_v63, %v10050_v39  ;;  %10121 = vadd.xlane.f32.xlu1 %v10120_v3  ;;  %v10047_v58 = vpop.xlane.xlu0 %10046  ;;  %v10123_v38 = vsel %vm855_vm2, %v17364_v13, 0.0 }
 0xb73   :  { %14704 = vpow2.f32 %v10097_v34  ;;  %v10077_v27 = vsub.f32 %v17292_v30, %v10047_v58  ;;  %10124 = vadd.xlane.f32.xlu0 %v10123_v38 }
 0xb74   :  { %v10103_v17 = vmul.f32 1.442695, %v10078_v19 }
 0xb75   :  { %v17372_v10 = vpop.eup %14696  ;;  %v10101_v8 = vmul.f32 1.442695, %v10077_v27  ;;  %v10056_v44 = vpop.xlane.xlu1 %10055 }
 0xb76   :  { %14706 = vpow2.f32 %v10103_v17  ;;  %v10080_v52 = vsub.f32 %v17304_v47, %v10056_v44  ;;  %v10053_v56 = vpop.xlane.xlu0 %10052  ;;  %v10126_v63 = vsel %vm855_vm2, %v17372_v10, 0.0 }
 0xb77   :  { %14708 = vpow2.f32 %v10101_v8  ;;  %v10079_v9 = vsub.f32 %v17300_v32, %v10053_v56  ;;  %10127 = vadd.xlane.f32.xlu1 %v10126_v63 }
 0xb78   :  { %v17378_v2 = vpop.eup %14698  ;;  %v10107_v30 = vmul.f32 1.442695, %v10080_v52 }
 0xb79   :  { %v17380_v16 = vpop.eup %14700  ;;  %v10105_v21 = vmul.f32 1.442695, %v10079_v9  ;;  %v10062_v40 = vpop.xlane.xlu1 %10061  ;;  %v10132_v47 = vsel %vm855_vm2, %v17378_v2, 0.0 }
 0xb7a   :  { %14710 = vpow2.f32 %v10107_v30  ;;  %v10082_v28 = vsub.f32 %v17312_v57, %v10062_v40  ;;  %v10059_v29 = vpop.xlane.xlu0 %10058  ;;  %v10129_v49 = vsel %vm855_vm2, %v17380_v16, 0.0 }
 0xb7b   :  { %14712 = vpow2.f32 %v10105_v21  ;;  %v10081_v32 = vsub.f32 %v17308_v41, %v10059_v29  ;;  %10133 = vadd.xlane.f32.xlu1 %v10132_v47  ;;  %10130 = vadd.xlane.f32.xlu0 %v10129_v49  ;;  %v18500_v21 = vld [vmem:[#allocation57_spill] sm:$0xff] }
 0xb7c   :  { %v17388_v7 = vpop.eup %14702  ;;  %v10111_v61 = vmul.f32 1.442695, %v10082_v28  ;;  %v18501_v28 = vld [vmem:[#allocation34_spill] sm:$0xff] }
 0xb7d   :  { %v17390_v12 = vpop.eup %14704  ;;  %v10109_v22 = vmul.f32 1.442695, %v10081_v32  ;;  %v10138_v53 = vsel %vm855_vm2, %v17388_v7, 0.0  ;;  %v17431_v40 = vpop.permute.xlu1 %11033 }
 0xb7e   :  { %14714 = vpow2.f32 %v10111_v61  ;;  %v10065_v57 = vpop.xlane.xlu0 %10064  ;;  %v10135_v34 = vsel %vm855_vm2, %v17390_v12, 0.0 }
 0xb7f   :  { %14716 = vpow2.f32 %v10109_v22  ;;  %v10083_v39 = vsub.f32 %v17316_v59, %v10065_v57  ;;  %10139 = vadd.xlane.f32.xlu1 %v10138_v53  ;;  %10136 = vadd.xlane.f32.xlu0 %v10135_v34  ;;  %v18513_v34 = vld [vmem:[#allocation62_spill] sm:$0xff] }
 0xb80   :  { %v17397_v41 = vpop.eup %14706 }
 0xb81   :  { %v17399_v3 = vpop.eup %14708  ;;  %v10113_v19 = vmul.f32 1.442695, %v10083_v39  ;;  %v10144_v58 = vsel %vm855_vm2, %v17397_v41, 0.0 }
 0xb82   :  { %v10141_v38 = vsel %vm855_vm2, %v17399_v3, 0.0  ;;  %v17482_v22 = vpop.permute.xlu0 %10957 }
 0xb83   :  { %14718 = vpow2.f32 %v10113_v19  ;;  %10145 = vadd.xlane.f32.xlu1 %v10144_v58  ;;  %10142 = vadd.xlane.f32.xlu0 %v10141_v38 }
 0xb84   :  { %v17405_v27 = vpop.eup %14710 }
 0xb85   :  { %v17407_v17 = vpop.eup %14712  ;;  %v10150_v59 = vsel %vm855_vm2, %v17405_v27, 0.0 }
 0xb86   :  { %v10147_v8 = vsel %vm855_vm2, %v17407_v17, 0.0 }
 0xb87   :  { %10151 = vadd.xlane.f32.xlu1 %v10150_v59  ;;  %10148 = vadd.xlane.f32.xlu0 %v10147_v8 }
 0xb88   :  { %v17413_v44 = vpop.eup %14714 }
 0xb89   :  { %v17415_v52 = vpop.eup %14716  ;;  %v10156_v56 = vsel %vm855_vm2, %v17413_v44, 0.0 }
 0xb8a   :  { %v10153_v63 = vsel %vm855_vm2, %v17415_v52, 0.0 }
 0xb8b   :  { %10157 = vadd.xlane.f32.xlu1 %v10156_v56  ;;  %10154 = vadd.xlane.f32.xlu0 %v10153_v63 }
 0xb8d   :  { %v17421_v9 = vpop.eup %14718 }
 0xb8e   :  { %v10159_v30 = vsel %vm855_vm2, %v17421_v9, 0.0 }
 0xb8f   :  { %10160 = vadd.xlane.f32.xlu1 %v10159_v30 }
 0xba0   :  { %11337 = vrot.lane.b32.xlu1 %v15502_v11, %s14966_s28  ;;  %v18502_v11 = vld [vmem:[#allocation47_spill] sm:$0xff] }
 0xba4   :  { %11431 = vrot.lane.b32.xlu1 %v18500_v21, %s14949_s24 }
 0xba8   :  { %11495 = vrot.lane.b32.xlu1 %v17230_v48, %s14967_s21  ;;  %v18503_v48 = vld [vmem:[#allocation51_spill] sm:$0xff] }
 0xbac   :  { %11435 = vrot.lane.b32.xlu1 %v18501_v28, %s14949_s24 }
 0xbae   :  { %v10068_v29 = vpop.xlane.xlu1 %10067 }
 0xbaf   :  { %v10084_v47 = vsub.f32 %v17328_v24, %v10068_v29  ;;  %v18506_v24 = vld [vmem:[#allocation54_spill] sm:$0xff] }
 0xbb0   :  { %11499 = vrot.lane.b32.xlu1 %v17232_v43, %s14967_s21  ;;  %v18504_v43 = vld [vmem:[#allocation52_spill] sm:$0xff] }
 0xbb1   :  { %v10115_v49 = vmul.f32 1.442695, %v10084_v47 }
 0xbb3   :  { %14720 = vpow2.f32 %v10115_v49 }
 0xbb4   :  { %11439 = vrot.lane.b32.xlu1 %v18502_v11, %s14949_s24 }
 0xbb8   :  { %11503 = vrot.lane.b32.xlu1 %v17234_v15, %s14967_s21  ;;  %v18505_v15 = vld [vmem:[#allocation53_spill] sm:$0xff] }
 0xbbc   :  { %11443 = vrot.lane.b32.xlu1 %v18503_v48, %s14949_s24 }
 0xbbd   :  { %v17444_v32 = vpop.eup %14720 }
 0xbbe   :  { %v10162_v61 = vsel %vm855_vm2, %v17444_v32, 0.0 }
 0xbbf   :  { %10163 = vadd.xlane.f32.xlu0 %v10162_v61 }
 0xbc0   :  { %11507 = vrot.lane.b32.xlu1 %v17238_v37, %s14967_s21  ;;  %v18507_v37 = vld [vmem:[#allocation30_spill] sm:$0xff] }
 0xbc4   :  { %11447 = vrot.lane.b32.xlu1 %v18504_v43, %s14949_s24 }
 0xbc8   :  { %11511 = vrot.lane.b32.xlu1 %v17242_v50, %s14967_s21  ;;  %v18508_v50 = vld [vmem:[#allocation66_spill] sm:$0xff] }
 0xbcc   :  { %11451 = vrot.lane.b32.xlu1 %v18505_v15, %s14949_s24 }
 0xbd0   :  { %11515 = vrot.lane.b32.xlu1 %v17246_v20, %s14967_s21  ;;  %v18509_v20 = vld [vmem:[#allocation45_spill] sm:$0xff] }
 0xbd4   :  { %11455 = vrot.lane.b32.xlu1 %v18506_v24, %s14949_s24 }
 0xbd5   :  { %11261 = vrot.lane.b32.xlu0 %v15496_v18, %s14966_s28  ;;  %v18510_v18 = vld [vmem:[#allocation33_spill] sm:$0xff] }
 0xbd8   :  { %11519 = vrot.lane.b32.xlu1 %v17252_v26, %s14967_s21  ;;  %v18511_v26 = vld [vmem:[#allocation59_spill] sm:$0xff] }
 0xbd9   :  { %11429 = vrot.lane.b32.xlu0 %v18507_v37, %s14949_s24 }
 0xbdc   :  { %11459 = vrot.lane.b32.xlu1 %v18508_v50, %s14949_s24 }
 0xbdd   :  { %11493 = vrot.lane.b32.xlu0 %v17226_v4, %s14967_s21  ;;  %v17486_v4 = vpop.permute.xlu0 %11109 }
 0xbe0   :  { %11523 = vrot.lane.b32.xlu1 %v17256_v33, %s14967_s21  ;;  %v18512_v33 = vld [vmem:[#allocation61_spill] sm:$0xff] }
 0xbe1   :  { %11433 = vrot.lane.b32.xlu0 %v18509_v20, %s14949_s24 }
 0xbe5   :  { %11497 = vrot.lane.b32.xlu0 %v17228_v23, %s14967_s21  ;;  %v17490_v23 = vpop.permute.xlu1 %11185 }
 0xbe9   :  { %11437 = vrot.lane.b32.xlu0 %v18510_v18, %s14949_s24 }
 0xbed   :  { %11501 = vrot.lane.b32.xlu0 %v17236_v6, %s14967_s21 }
 0xbf1   :  { %11441 = vrot.lane.b32.xlu0 %v18511_v26, %s14949_s24 }
 0xbf5   :  { %11505 = vrot.lane.b32.xlu0 %v17240_v46, %s14967_s21 }
 0xbf9   :  { %11445 = vrot.lane.b32.xlu0 %v18512_v33, %s14949_s24 }
 0xbfc   :  { %v10119_v57 = vpop.xlane.xlu0 %10118 }
 0xbfd   :  { %11509 = vrot.lane.b32.xlu0 %v17244_v1, %s14967_s21  ;;  %14722 = vrcp.f32 %v10119_v57  ;;  %v18514_v1 = vld [vmem:[#allocation63_spill] sm:$0xff] }
 0xbff   :  { %v10122_v6 = vpop.xlane.xlu1 %10121 }
 0xc00   :  { %14724 = vrcp.f32 %v10122_v6  ;;  %v10125_v53 = vpop.xlane.xlu0 %10124 }
 0xc01   :  { %11449 = vrot.lane.b32.xlu0 %v18513_v34, %s14949_s24  ;;  %14726 = vrcp.f32 %v10125_v53 }
 0xc04   :  { %v10128_v46 = vpop.xlane.xlu1 %10127 }
 0xc05   :  { %14728 = vrcp.f32 %v10128_v46  ;;  %11513 = vrot.lane.b32.xlu0 %v17248_v36, %s14967_s21 }
 0xc07   :  { %v14723_v39 = vpop.eup %14722 }
 0xc08   :  { %v10134_v19 = vpop.xlane.xlu1 %10133  ;;  %v10131_v58 = vpop.xlane.xlu0 %10130  ;;  %v10181_v38 = vmul.f32 %v14723_v39, %v17356_v14 }
 0xc09   :  { %14730 = vrcp.f32 %v10134_v19  ;;  %11453 = vrot.lane.b32.xlu0 %v18514_v1, %s14949_s24 }
 0xc0a   :  { %v14725_v59 = vpop.eup %14724  ;;  %14732 = vrcp.f32 %v10131_v58  ;;  %14174 = vmatmul.mubr.msk.f32.vlgmr.msra.gmra.mrb[120].mxu1 %vm855_vm2, %v10181_v38  ;;  %v18516_v38 = vld [vmem:[#allocation41_spill] sm:$0xff] }
 0xc0b   :  { %v14727_v8 = vpop.eup %14726  ;;  %v10182_v56 = vmul.f32 %v14725_v59, %v17362_v5  ;;  %14182 = vmatpush3.msra.mxu1 %v17338_v0  ;;  %14183 = vmatprep.mubr.msk.f32.mxu1 %vm14955_vm1, %v18365_v60 }
 0xc0c   :  { %v10183_v36 = vmul.f32 %v14727_v8, %v17364_v13  ;;  %v10140_v63 = vpop.xlane.xlu1 %10139  ;;  %v10137_v14 = vpop.xlane.xlu0 %10136  ;;  %14191 = vmatprep.subr.mxu1 %v18365_v60 }
 0xc0d   :  { %14179 = vmatmul.mubr.msk.f32.vlgmr.msra.gmra.mrb[120].mxu0 %vm855_vm2, %v10182_v56  ;;  %14734 = vrcp.f32 %v10140_v63  ;;  %11517 = vrot.lane.b32.xlu0 %v17250_v62, %s14967_s21  ;;  %v18515_v62 = vld [vmem:[#allocation64_spill] sm:$0xff] }
 0xc0e   :  { %14187 = vmatpush3.msra.mxu0 %v17334_v54  ;;  %14736 = vrcp.f32 %v10137_v14  ;;  %14184 = vmatmul.mubr.msk.f32.vlgmr.msra.gmra.mrb[122].mxu1 %vm855_vm2, %v10183_v36 }
 0xc0f   :  { %v14729_v0 = vpop.eup %14728  ;;  %14192 = vmatpush3.msra.mxu1 %v17336_v35  ;;  %14188 = vmatprep.mubr.msk.f32.mxu0 %vm14955_vm1, %v18365_v60 }
 0xc10   :  { %v10184_v5 = vmul.f32 %v14729_v0, %v17372_v10  ;;  %v10146_v13 = vpop.xlane.xlu1 %10145  ;;  %v10143_v30 = vpop.xlane.xlu0 %10142  ;;  %14196 = vmatprep.subr.mxu0 %v18365_v60  ;;  %14193 = vmatprep.mubr.msk.f32.mxu1 %vm14955_vm1, %v18365_v60 }
 0xc11   :  { %14738 = vrcp.f32 %v10146_v13  ;;  %11457 = vrot.lane.b32.xlu0 %v18515_v62, %s14949_s24  ;;  %14201 = vmatprep.subr.mxu1 %v18365_v60 }
 0xc12   :  { %14740 = vrcp.f32 %v10143_v30  ;;  %14189 = vmatmul.mubr.msk.f32.vlgmr.msra.gmra.mrb[122].mxu0 %vm855_vm2, %v10184_v5 }
 0xc13   :  { %v14731_v54 = vpop.eup %14730  ;;  %14197 = vmatpush3.msra.mxu0 %v17340_v42  ;;  %14198 = vmatprep.mubr.msk.f32.mxu0 %vm14955_vm1, %v18365_v60 }
 0xc14   :  { %v14733_v35 = vpop.eup %14732  ;;  %v10186_v10 = vmul.f32 %v14731_v54, %v17378_v2  ;;  %v10152_v21 = vpop.xlane.xlu1 %10151  ;;  %14206 = vmatprep.subr.mxu0 %v18365_v60  ;;  %v18517_v54 = vld [vmem:[#allocation43_spill] sm:$0xff] }
 0xc15   :  { %v10149_v28 = vpop.xlane.xlu0 %10148  ;;  %v10185_v29 = vmul.f32 %v14733_v35, %v17380_v16  ;;  %14742 = vrcp.f32 %v10152_v21  ;;  %11521 = vrot.lane.b32.xlu0 %v17254_v25, %s14967_s21  ;;  %v11656_v21 = vld [vmem:[#allocation5 + $0x8] sm:$0xff] }
 0xc16   :  { %14744 = vrcp.f32 %v10149_v28  ;;  %14199 = vmatmul.mubr.msk.f32.vlgmr.msra.gmra.mrb[124].mxu0 %vm855_vm2, %v10186_v10  ;;  %v11655_v10 = vld [vmem:[#allocation5] sm:$0xff]  ;;  %v11657_v28 = vld [vmem:[#allocation5 + $0x10] sm:$0xff] }
 0xc17   :  { %v14735_v42 = vpop.eup %14734  ;;  %14194 = vmatmul.mubr.msk.f32.vlgmr.msra.gmra.mrb[124].mxu1 %vm855_vm2, %v10185_v29  ;;  %14207 = vmatpush3.msra.mxu0 %v17344_v55  ;;  %v14379_v29 = vpack.c.bf16 %v11656_v21, %v11655_v10 }
 0xc18   :  { %v14737_v47 = vpop.eup %14736  ;;  %v10188_v2 = vmul.f32 %v14735_v42, %v17388_v7  ;;  %14202 = vmatpush3.msra.mxu1 %v17342_v51  ;;  %v10158_v49 = vpop.xlane.xlu1 %10157  ;;  %14203 = vmatprep.mubr.msk.f32.mxu1 %vm14955_vm1, %v18365_v60  ;;  %v11658_v42 = vld [vmem:[#allocation5 + $0x18] sm:$0xff] }
 0xc19   :  { %v10155_v11 = vpop.xlane.xlu0 %10154  ;;  %v10187_v25 = vmul.f32 %v14737_v47, %v17390_v12  ;;  %14746 = vrcp.f32 %v10158_v49  ;;  %14208 = vmatprep.mubr.msk.f32.mxu0 %vm14955_vm1, %v18365_v60  ;;  %14211 = vmatprep.subr.mxu1 %v18365_v60  ;;  %v14383_v47 = vpack.c.bf16 %v11658_v42, %v11657_v28 }
 0xc1a   :  { %14748 = vrcp.f32 %v10155_v11  ;;  %14216 = vmatprep.subr.mxu0 %v18365_v60  ;;  %14209 = vmatmul.mubr.msk.f32.vlgmr.msra.gmra.mrb[126].mxu0 %vm855_vm2, %v10188_v2 }
 0xc1b   :  { %v14739_v55 = vpop.eup %14738  ;;  %14204 = vmatmul.mubr.msk.f32.vlgmr.msra.gmra.mrb[126].mxu1 %vm855_vm2, %v10187_v25  ;;  %14217 = vmatpush3.msra.mxu0 %v17348_v31 }
 0xc1c   :  { %v14741_v51 = vpop.eup %14740  ;;  %v10190_v16 = vmul.f32 %v14739_v55, %v17397_v41  ;;  %14212 = vmatpush3.msra.mxu1 %v17346_v45  ;;  %v10161_v7 = vpop.xlane.xlu1 %10160  ;;  %14213 = vmatprep.mubr.msk.f32.mxu1 %vm14955_vm1, %v18365_v60 }
 0xc1d   :  { %v10189_v12 = vmul.f32 %v14741_v51, %v17399_v3  ;;  %14218 = vmatprep.mubr.msk.f32.mxu0 %vm14955_vm1, %v18365_v60  ;;  %14221 = vmatprep.subr.mxu1 %v18365_v60  ;;  %14750 = vrcp.f32 %v10161_v7 }
 0xc1e   :  { %14226 = vmatprep.subr.mxu0 %v18365_v60  ;;  %14219 = vmatmul.mubr.msk.f32.vlgmr.msra.gmra.mrb[128].mxu0 %vm855_vm2, %v10190_v16 }
 0xc1f   :  { %v14743_v31 = vpop.eup %14742  ;;  %14214 = vmatmul.mubr.msk.f32.vlgmr.msra.gmra.mrb[128].mxu1 %vm855_vm2, %v10189_v12  ;;  %14227 = vmatpush3.msra.mxu0 %v17431_v40 }
 0xc20   :  { %v14745_v45 = vpop.eup %14744  ;;  %v10192_v41 = vmul.f32 %v14743_v31, %v17405_v27  ;;  %14222 = vmatpush3.msra.mxu1 %v17482_v22  ;;  %v11338_v3 = vpop.permute.xlu1 %11337  ;;  %14223 = vmatprep.mubr.msk.f32.mxu1 %vm14955_vm1, %v18365_v60 }
 0xc21   :  { %v10191_v48 = vmul.f32 %v14745_v45, %v17407_v17  ;;  %14228 = vmatprep.mubr.msk.f32.mxu0 %vm14955_vm1, %v18365_v60  ;;  %14231 = vmatprep.subr.mxu1 %v18365_v60 }
 0xc22   :  { %14236 = vmatprep.subr.mxu0 %v18365_v60  ;;  %14229 = vmatmul.mubr.msk.f32.vlgmr.msra.gmra.mrb[130].mxu0 %vm855_vm2, %v10192_v41 }
 0xc23   :  { %v14747_v40 = vpop.eup %14746  ;;  %14224 = vmatmul.mubr.msk.f32.vlgmr.msra.gmra.mrb[130].mxu1 %vm855_vm2, %v10191_v48  ;;  %14237 = vmatpush3.msra.mxu0 %v17490_v23 }
 0xc24   :  { %v14749_v27 = vpop.eup %14748  ;;  %v10194_v61 = vmul.f32 %v14747_v40, %v17413_v44  ;;  %14232 = vmatpush3.msra.mxu1 %v17486_v4  ;;  %v17573_v17 = vpop.permute.xlu1 %11431  ;;  %14233 = vmatprep.mubr.msk.f32.mxu1 %vm14955_vm1, %v18365_v60 }
 0xc25   :  { %v10193_v43 = vmul.f32 %v14749_v27, %v17415_v52  ;;  %14238 = vmatprep.mubr.msk.f32.mxu0 %vm14955_vm1, %v18365_v60  ;;  %14246 = vmatprep.subr.mxu0 %v18365_v60 }
 0xc26   :  { %14239 = vmatmul.mubr.msk.f32.vlgmr.msra.gmra.mrb[132].mxu0 %vm855_vm2, %v10194_v61  ;;  %14241 = vmatprep.subr.mxu1 %v18365_v60 }
 0xc27   :  { %14234 = vmatmul.mubr.msk.f32.vlgmr.msra.gmra.mrb[132].mxu1 %vm855_vm2, %v10193_v43  ;;  %14247 = vmatpush3.msra.mxu0 %v11338_v3 }
 0xc28   :  { %v17584_v44 = vpop.permute.xlu1 %11495  ;;  %14243 = vmatprep.mubr.msk.f32.mxu1 %vm14955_vm1, %v18365_v60  ;;  %14248 = vmatprep.mubr.msk.f32.mxu0 %vm14955_vm1, %v18365_v60  ;;  %v14751_v60 = vpop.eup %14750 }
 0xc29   :  { %v10195_v33 = vmul.f32 %v14751_v60, %v17421_v9 }
 0xc2c   :  { %v17590_v52 = vpop.permute.xlu1 %11435 }
 0xc30   :  { %v17592_v15 = vpop.permute.xlu1 %11499 }
 0xc34   :  { %v17594_v24 = vpop.permute.xlu1 %11439 }
 0xc38   :  { %v17596_v37 = vpop.permute.xlu1 %11503 }
 0xc3c   :  { %v17598_v50 = vpop.permute.xlu1 %11443 }
 0xc40   :  { %v17600_v20 = vpop.permute.xlu1 %11507 }
 0xc44   :  { %v17602_v18 = vpop.permute.xlu1 %11447 }
 0xc48   :  { %v17604_v26 = vpop.permute.xlu1 %11511 }
 0xc4c   :  { %v10164_v22 = vpop.xlane.xlu0 %10163  ;;  %v17606_v4 = vpop.permute.xlu1 %11451 }
 0xc4d   :  { %14752 = vrcp.f32 %v10164_v22 }
 0xc50   :  { %v11262_v23 = vpop.permute.xlu0 %11261  ;;  %v17609_v57 = vpop.permute.xlu1 %11515 }
 0xc51   :  { %14242 = vmatpush3.msra.mxu1 %v11262_v23 }
 0xc52   :  { %14244 = vmatmul.mubr.msk.f32.vlgmr.msra.gmra.mrb[134].mxu1 %vm855_vm2, %v10195_v33  ;;  %14380 = vmatprep.subr.bf16.mxu1 %v14379_v29 }
 0xc53   :  { %14382 = vmatpush3.bf16.msra.mxu1 %v14379_v29 }
 0xc54   :  { %v17612_v6 = vpop.permute.xlu0 %11429  ;;  %v17614_v53 = vpop.permute.xlu1 %11455  ;;  %14384 = vmatprep.subr.bf16.mxu1 %v14383_v47 }
 0xc57   :  { %v14753_v34 = vpop.eup %14752  ;;  %14386 = vmatpush3.bf16.msra.mxu1 %v14383_v47  ;;  %v18518_v47 = vld [vmem:[#allocation35_spill] sm:$0xff] }
 0xc58   :  { %v10196_v46 = vmul.f32 %v14753_v34, %v17444_v32  ;;  %v17617_v39 = vpop.permute.xlu0 %11493  ;;  %v17619_v19 = vpop.permute.xlu1 %11519 }
 0xc5a   :  { %14249 = vmatmul.mubr.msk.f32.vlgmr.msra.gmra.mrb[134].mxu0 %vm855_vm2, %v10196_v46 }
 0xc5c   :  { %v17622_v9 = vpop.permute.xlu0 %11433  ;;  %v11460_v58 = vpop.permute.xlu1 %11459 }
 0xc5d   :  { %v17626_v1 = vsel %vm855_vm2, %v18516_v38, %v11460_v58 }
 0xc60   :  { %v17628_v59 = vpop.permute.xlu0 %11497 }
 0xc64   :  { %v17630_v8 = vpop.permute.xlu0 %11437 }
 0xc68   :  { %v17632_v56 = vpop.permute.xlu0 %11501 }
 0xc6c   :  { %v17634_v32 = vpop.permute.xlu0 %11441 }
 0xc70   :  { %v17636_v36 = vpop.permute.xlu0 %11505 }
 0xc74   :  { %v17638_v63 = vpop.permute.xlu0 %11445 }
 0xc78   :  { %v17640_v14 = vpop.permute.xlu0 %11509 }
 0xc7c   :  { %v17642_v0 = vpop.permute.xlu0 %11449 }
 0xc80   :  { %v17644_v5 = vpop.permute.xlu0 %11513 }
 0xc84   :  { %v17646_v13 = vpop.permute.xlu0 %11453 }
 0xc88   :  { %v17648_v30 = vpop.permute.xlu0 %11517 }
 0xc8c   :  { %v11458_v62 = vpop.permute.xlu0 %11457 }
 0xc8d   :  { %v17652_v35 = vsel %vm855_vm2, %v18517_v54, %v11458_v62 }
 0xc90   :  { %v17670_v42 = vpop.permute.xlu0 %11521 }
 0xcdd   :  { %v10269_v2 = vpop.f32.mrb[120].mxu1 }
 0xcde   :  { %11557 = vrot.lane.b32.xlu0 %v10269_v2, %s14968_s22  ;;  %v14175_v49 = vpop.f32.mrb[121].mxu1  ;;  %v11605_v2 = vsel %vm855_vm2, %v18518_v47, %v17612_v6 }
 0xcdf   :  { %v17675_v49 = vpop.permute.xlu1 %11523 }
 0xce0   :  { %v10345_v11 = vpop.f32.mrb[120].mxu0 }
 0xce1   :  { %v14180_v25 = vpop.f32.mrb[121].mxu0  ;;  %11559 = vrot.lane.b32.xlu1 %v10345_v11, %s14968_s22  ;;  %v10421_v55 = vpop.f32.mrb[122].mxu1  ;;  %v11622_v11 = vsel %vm11621_vm4, %v11605_v2, %v17617_v39  ;;  %v18528_v2 = vld [vmem:[#allocation46_spill] sm:$0xff] }
 0xce2   :  { %11561 = vrot.lane.b32.xlu0 %v10421_v55, %s14968_s22  ;;  %v14185_v51 = vpop.f32.mrb[123].mxu1 }
 0xce3   :  { %v18519_v51 = vld [vmem:[#allocation31_spill] sm:$0xff] }
 0xce5   :  { %v10497_v16 = vpop.f32.mrb[122].mxu0 }
 0xce6   :  { %v14190_v7 = vpop.f32.mrb[123].mxu0  ;;  %11563 = vrot.lane.b32.xlu1 %v10497_v16, %s14968_s22  ;;  %v11606_v16 = vsel %vm855_vm2, %v18519_v51, %v17573_v17 }
 0xce7   :  { %v11623_v7 = vsel %vm11621_vm4, %v11606_v16, %v17584_v44 }
 0xce9   :  { %v10649_v12 = vpop.f32.mrb[124].mxu0 }
 0xcea   :  { %v10573_v31 = vpop.f32.mrb[124].mxu1  ;;  %v14200_v45 = vpop.f32.mrb[125].mxu0  ;;  %11567 = vrot.lane.b32.xlu1 %v10649_v12, %s14968_s22  ;;  %v18520_v12 = vld [vmem:[#allocation32_spill] sm:$0xff] }
 0xceb   :  { %11565 = vrot.lane.b32.xlu0 %v10573_v31, %s14968_s22  ;;  %v14195_v41 = vpop.f32.mrb[125].mxu1  ;;  %v11607_v6 = vsel %vm855_vm2, %v18520_v12, %v17622_v9 }
 0xcec   :  { %v11624_v39 = vsel %vm11621_vm4, %v11607_v6, %v17628_v59  ;;  %v18522_v59 = vld [vmem:[#allocation39_spill] sm:$0xff] }
 0xced   :  { %v10801_v3 = vpop.f32.mrb[126].mxu0 }
 0xcee   :  { %v10725_v48 = vpop.f32.mrb[126].mxu1  ;;  %v14210_v40 = vpop.f32.mrb[127].mxu0  ;;  %11571 = vrot.lane.b32.xlu1 %v10801_v3, %s14968_s22  ;;  %v18521_v3 = vld [vmem:[#allocation36_spill] sm:$0xff] }
 0xcef   :  { %11569 = vrot.lane.b32.xlu0 %v10725_v48, %s14968_s22  ;;  %v14205_v27 = vpop.f32.mrb[127].mxu1  ;;  %v11608_v44 = vsel %vm855_vm2, %v18521_v3, %v17590_v52 }
 0xcf0   :  { %v11625_v9 = vsel %vm11621_vm4, %v11608_v44, %v17592_v15  ;;  %v11610_v27 = vsel %vm855_vm2, %v18522_v59, %v17594_v24  ;;  %v17785_v44 = vld [vmem:[%s18285_s7] ss:$0 sm:$0xff] }
 0xcf1   :  { %v10953_v61 = vpop.f32.mrb[128].mxu0 }
 0xcf2   :  { %v10877_v43 = vpop.f32.mrb[128].mxu1  ;;  %v14220_v22 = vpop.f32.mrb[129].mxu0  ;;  %11575 = vrot.lane.b32.xlu1 %v10953_v61, %s14968_s22  ;;  %v11627_v61 = vsel %vm11621_vm4, %v11610_v27, %v17596_v37 }
 0xcf3   :  { %11573 = vrot.lane.b32.xlu0 %v10877_v43, %s14968_s22  ;;  %v14215_v60 = vpop.f32.mrb[129].mxu1  ;;  %v18523_v43 = vld [vmem:[#allocation37_spill] sm:$0xff] }
 0xcf4   :  { %v11609_v22 = vsel %vm855_vm2, %v18523_v43, %v17630_v8  ;;  %v18525_v8 = vld [vmem:[#allocation38_spill] sm:$0xff] }
 0xcf5   :  { %v11105_v33 = vpop.f32.mrb[130].mxu0  ;;  %v11626_v15 = vsel %vm11621_vm4, %v11609_v22, %v17632_v56 }
 0xcf6   :  { %v11029_v23 = vpop.f32.mrb[130].mxu1  ;;  %v14230_v34 = vpop.f32.mrb[131].mxu0  ;;  %11579 = vrot.lane.b32.xlu1 %v11105_v33, %s14968_s22 }
 0xcf7   :  { %11577 = vrot.lane.b32.xlu0 %v11029_v23, %s14968_s22  ;;  %v14225_v46 = vpop.f32.mrb[131].mxu1  ;;  %v18524_v34 = vld [vmem:[#allocation40_spill] sm:$0xff] }
 0xcf8   :  { %v11612_v24 = vsel %vm855_vm2, %v18524_v34, %v17598_v50  ;;  %v11611_v46 = vsel %vm855_vm2, %v18525_v8, %v17634_v32  ;;  %v18527_v32 = vld [vmem:[#allocation49_spill] sm:$0xff] }
 0xcf9   :  { %v11257_v58 = vpop.f32.mrb[132].mxu0  ;;  %v11629_v37 = vsel %vm11621_vm4, %v11612_v24, %v17600_v20 }
 0xcfa   :  { %v11181_v38 = vpop.f32.mrb[132].mxu1  ;;  %v14240_v62 = vpop.f32.mrb[133].mxu0  ;;  %11583 = vrot.lane.b32.xlu1 %v11257_v58, %s14968_s22  ;;  %v11628_v58 = vsel %vm11621_vm4, %v11611_v46, %v17636_v36 }
 0xcfb   :  { %11581 = vrot.lane.b32.xlu0 %v11181_v38, %s14968_s22  ;;  %v14235_v54 = vpop.f32.mrb[133].mxu1 }
 0xcfc   :  { %v18526_v54 = vld [vmem:[#allocation42_spill] sm:$0xff] }
 0xd25   :  { %v11333_v10 = vpop.f32.mrb[134].mxu1 }
 0xd26   :  { %11585 = vrot.lane.b32.xlu0 %v11333_v10, %s14968_s22  ;;  %v14245_v21 = vpop.f32.mrb[135].mxu1  ;;  %v11614_v10 = vsel %vm855_vm2, %v18526_v54, %v17602_v18 }
 0xd27   :  { %v11631_v20 = vsel %vm11621_vm4, %v11614_v10, %v17604_v26  ;;  %v11613_v21 = vsel %vm855_vm2, %v18527_v32, %v17638_v63  ;;  %v18529_v63 = vld [vmem:[#allocation44_spill] sm:$0xff] }
 0xd2d   :  { %v11409_v28 = vpop.f32.mrb[134].mxu0 }
 0xd2e   :  { %11587 = vrot.lane.b32.xlu1 %v11409_v28, %s14968_s22  ;;  %v14250_v29 = vpop.f32.mrb[135].mxu0  ;;  %v11630_v28 = vsel %vm11621_vm4, %v11613_v21, %v17640_v14 }
 0xd50   :  { %v11558_v25 = vpop.permute.xlu0 %11557 }
 0xd51   :  { %v11639_v55 = vsel %vm11638_vm3, %v11622_v11, %v11558_v25  ;;  %v11616_v11 = vsel %vm855_vm2, %v18528_v2, %v17606_v4  ;;  %v11615_v25 = vsel %vm855_vm2, %v18529_v63, %v17642_v0  ;;  %v18531_v0 = vld [vmem:[#allocation48_spill] sm:$0xff] }
 0xd52   :  { %14259 = vmatprep.mubr.msk.f32.mxu1 %vm377_vm0, %v11639_v55  ;;  %v11633_v26 = vsel %vm11621_vm4, %v11616_v11, %v17609_v57  ;;  %v11632_v55 = vsel %vm11621_vm4, %v11615_v25, %v17644_v5  ;;  %v11617_v6 = vsel %vm855_vm2, %v18531_v0, %v17646_v13 }
 0xd53   :  { %v11560_v31 = vpop.permute.xlu1 %11559 }
 0xd54   :  { %v11640_v45 = vsel %vm11638_vm3, %v11623_v7, %v11560_v31  ;;  %v11562_v41 = vpop.permute.xlu0 %11561  ;;  %v18530_v7 = vld [vmem:[#allocation50_spill] sm:$0xff]  ;;  %v11634_v31 = vsel %vm11621_vm4, %v11617_v6, %v17648_v30  ;;  %v11637_v30 = vsel %vm11621_vm4, %v17626_v1, %v17675_v49 }
 0xd55   :  { %14260 = vmatmul.mubr.msk.f32.vlgmr.msra.gmra.mrb[136].mxu1 %vm377_vm0, %v11640_v45  ;;  %v11641_v17 = vsel %vm11638_vm3, %v11624_v39, %v11562_v41  ;;  %v11618_v12 = vsel %vm855_vm2, %v18530_v7, %v17614_v53  ;;  %v18533_v1 = vld [vmem:[#allocation14_spill] sm:$0xff] }
 0xd56   :  { %14262 = vmatprep.mubr.msk.f32.mxu1 %vm377_vm0, %v11641_v17  ;;  %v11635_v57 = vsel %vm11621_vm4, %v11618_v12, %v17619_v19  ;;  %v11636_v19 = vsel %vm11621_vm4, %v17652_v35, %v17670_v42 }
 0xd58   :  { %v11564_v48 = vpop.permute.xlu1 %11563 }
 0xd59   :  { %v11642_v40 = vsel %vm11638_vm3, %v11625_v9, %v11564_v48 }
 0xd5a   :  { %14263 = vmatmul.mubr.msk.f32.gmra.mrb[138].mxu1 %vm377_vm0, %v11642_v40  ;;  %v18532_v40 = vld [vmem:[#allocation16_spill] sm:$0xff] }
 0xd5c   :  { %v11568_v52 = vpop.permute.xlu1 %11567 }
 0xd5d   :  { %v11644_v60 = vsel %vm11638_vm3, %v11627_v61, %v11568_v52  ;;  %v11566_v33 = vpop.permute.xlu0 %11565 }
 0xd5e   :  { %v11643_v23 = vsel %vm11638_vm3, %v11626_v15, %v11566_v33 }
 0xd5f   :  { %14265 = vmatprep.mubr.msk.f32.mxu1 %vm377_vm0, %v11643_v23  ;;  %v18535_v23 = vld [vmem:[#allocation15_spill] sm:$0xff] }
 0xd60   :  { %14266 = vmatmul.mubr.msk.f32.gmra.mrb[140].mxu1 %vm377_vm0, %v11644_v60  ;;  %v11572_v56 = vpop.permute.xlu1 %11571  ;;  %v18534_v60 = vld [vmem:[#allocation17_spill] sm:$0xff] }
 0xd61   :  { %v11646_v38 = vsel %vm11638_vm3, %v11629_v37, %v11572_v56  ;;  %v11570_v62 = vpop.permute.xlu0 %11569 }
 0xd62   :  { %v11645_v50 = vsel %vm11638_vm3, %v11628_v58, %v11570_v62  ;;  %v18536_v58 = vld [vmem:[#allocation19_spill] sm:$0xff] }
 0xd63   :  { %14268 = vmatprep.mubr.msk.f32.mxu1 %vm377_vm0, %v11645_v50  ;;  %v18537_v50 = vld [vmem:[#allocation18_spill] sm:$0xff] }
 0xd64   :  { %14269 = vmatmul.mubr.msk.f32.gmra.mrb[142].mxu1 %vm377_vm0, %v11646_v38  ;;  %v11576_v36 = vpop.permute.xlu1 %11575 }
 0xd65   :  { %v11648_v29 = vsel %vm11638_vm3, %v11631_v20, %v11576_v36  ;;  %v11574_v47 = vpop.permute.xlu0 %11573 }
 0xd66   :  { %v11647_v18 = vsel %vm11638_vm3, %v11630_v28, %v11574_v47  ;;  %v18538_v28 = vld [vmem:[#allocation21_spill] sm:$0xff] }
 0xd67   :  { %14271 = vmatprep.mubr.msk.f32.mxu1 %vm377_vm0, %v11647_v18  ;;  %v18539_v18 = vld [vmem:[#allocation20_spill] sm:$0xff] }
 0xd68   :  { %14272 = vmatmul.mubr.msk.f32.gmra.mrb[144].mxu1 %vm377_vm0, %v11648_v29  ;;  %v11580_v14 = vpop.permute.xlu1 %11579 }
 0xd69   :  { %v11650_v51 = vsel %vm11638_vm3, %v11633_v26, %v11580_v14  ;;  %v11578_v16 = vpop.permute.xlu0 %11577 }
 0xd6a   :  { %v11649_v4 = vsel %vm11638_vm3, %v11632_v55, %v11578_v16  ;;  %v18540_v55 = vld [vmem:[#allocation23_spill] sm:$0xff] }
 0xd6b   :  { %14274 = vmatprep.mubr.msk.f32.mxu1 %vm377_vm0, %v11649_v4  ;;  %v18541_v4 = vld [vmem:[#allocation22_spill] sm:$0xff] }
 0xd6c   :  { %14275 = vmatmul.mubr.msk.f32.gmra.mrb[146].mxu1 %vm377_vm0, %v11650_v51  ;;  %v11584_v5 = vpop.permute.xlu1 %11583 }
 0xd6d   :  { %v11652_v39 = vsel %vm11638_vm3, %v11635_v57, %v11584_v5  ;;  %v11582_v45 = vpop.permute.xlu0 %11581 }
 0xd6e   :  { %v11651_v53 = vsel %vm11638_vm3, %v11634_v31, %v11582_v45  ;;  %v18542_v31 = vld [vmem:[#allocation25_spill] sm:$0xff] }
 0xd6f   :  { %14277 = vmatprep.mubr.msk.f32.mxu1 %vm377_vm0, %v11651_v53  ;;  %v18543_v53 = vld [vmem:[#allocation24_spill] sm:$0xff] }
 0xd70   :  { %14278 = vmatmul.mubr.msk.f32.gmra.mrb[148].mxu1 %vm377_vm0, %v11652_v39 }
 0xd98   :  { %v11586_v13 = vpop.permute.xlu0 %11585 }
 0xd99   :  { %v11653_v41 = vsel %vm11638_vm3, %v11636_v19, %v11586_v13 }
 0xd9a   :  { %14280 = vmatprep.mubr.msk.f32.mxu1 %vm377_vm0, %v11653_v41 }
 0xda0   :  { %v11588_v17 = vpop.permute.xlu1 %11587 }
 0xda1   :  { %v11654_v3 = vsel %vm11638_vm3, %v11637_v30, %v11588_v17 }
 0xda2   :  { %14281 = vmatmul.mubr.msk.f32.gmra.mrb[150].mxu1 %vm377_vm0, %v11654_v3 }
 0xe28   :  { %v14261_v35 = vpop.f32.mrb[136].mxu1 }
 0xe29   :  { %v11786_v42 = vadd.f32 %v14261_v35, %v17785_v44  ;;  %v11780_v9 = vpop.f32.mrb[137].mxu1  ;;  %v18544_v35 = vld [vmem:[#allocation27_spill] sm:$0xff] }
 0xe2a   :  { %v11781_v48 = vadd.f32 %v17785_v44, %v11780_v9 }
 0xe2b   :  { %v17790_v59 = vadd.f32 %v11786_v42, %v18532_v40 }
 0xe2c   :  { %v17793_v49 = vadd.f32 %v11781_v48, %v18533_v1  ;;  %v18545_v48 = vld [vmem:[#allocation26_spill] sm:$0xff] }
 0xe2d   :  { %v11880_v27 = vsel %vm377_vm0, %v17790_v59, 0.0  ;;  %v14264_v61 = vpop.f32.mrb[138].mxu1 }
 0xe2e   :  { %11881 = vadd.xlane.f32.xlu1 %v11880_v27  ;;  %v11796_v43 = vadd.f32 %v14264_v61, %v17785_v44  ;;  %v11877_v22 = vsel %vm377_vm0, %v17793_v49, 0.0  ;;  %v11790_v52 = vpop.f32.mrb[139].mxu1 }
 0xe2f   :  { %11878 = vadd.xlane.f32.xlu0 %v11877_v22  ;;  %v11791_v15 = vadd.f32 %v17785_v44, %v11790_v52 }
 0xe30   :  { %v17802_v33 = vadd.f32 %v11796_v43, %v18534_v60 }
 0xe31   :  { %v17805_v34 = vadd.f32 %v11791_v15, %v18535_v23  ;;  %v18546_v15 = vld [vmem:[#allocation29_spill] sm:$0xff]  ;;  %v18547_v23 = vld [vmem:[#allocation28_spill] sm:$0xff] }
 0xe32   :  { %v11886_v24 = vsel %vm377_vm0, %v17802_v33, 0.0 }
 0xe33   :  { %v14267_v37 = vpop.f32.mrb[140].mxu1  ;;  %11887 = vadd.xlane.f32.xlu0 %v11886_v24  ;;  %v11883_v62 = vsel %vm377_vm0, %v17805_v34, 0.0 }
 0xe34   :  { %v11806_v8 = vadd.f32 %v14267_v37, %v17785_v44  ;;  %v11800_v46 = vpop.f32.mrb[141].mxu1 }
 0xe35   :  { %v11801_v56 = vadd.f32 %v17785_v44, %v11800_v46 }
 0xe36   :  { %v17812_v38 = vadd.f32 %v11806_v8, %v18536_v58 }
 0xe37   :  { %v17817_v54 = vadd.f32 %v11801_v56, %v18537_v50  ;;  %v14270_v10 = vpop.f32.mrb[142].mxu1  ;;  %11884 = vadd.xlane.f32.xlu0 %v11883_v62 }
 0xe38   :  { %v11816_v20 = vadd.f32 %v14270_v10, %v17785_v44  ;;  %v11810_v32 = vpop.f32.mrb[143].mxu1  ;;  %v11892_v21 = vsel %vm377_vm0, %v17812_v38, 0.0 }
 0xe39   :  { %v11811_v36 = vadd.f32 %v17785_v44, %v11810_v32  ;;  %11893 = vadd.xlane.f32.xlu1 %v11892_v21  ;;  %v11889_v47 = vsel %vm377_vm0, %v17817_v54, 0.0 }
 0xe3a   :  { %v17824_v29 = vadd.f32 %v11816_v20, %v18538_v28 }
 0xe3b   :  { %v17829_v2 = vadd.f32 %v11811_v36, %v18539_v18  ;;  %v14273_v11 = vpop.f32.mrb[144].mxu1  ;;  %11890 = vadd.xlane.f32.xlu0 %v11889_v47 }
 0xe3c   :  { %v11826_v26 = vadd.f32 %v14273_v11, %v17785_v44  ;;  %v11820_v63 = vpop.f32.mrb[145].mxu1  ;;  %v11898_v25 = vsel %vm377_vm0, %v17824_v29, 0.0 }
 0xe3d   :  { %v11821_v14 = vadd.f32 %v17785_v44, %v11820_v63  ;;  %11899 = vadd.xlane.f32.xlu1 %v11898_v25  ;;  %v11895_v16 = vsel %vm377_vm0, %v17829_v2, 0.0 }
 0xe3e   :  { %v17836_v51 = vadd.f32 %v11826_v26, %v18540_v55 }
 0xe3f   :  { %v17841_v7 = vadd.f32 %v11821_v14, %v18541_v4  ;;  %v14276_v12 = vpop.f32.mrb[146].mxu1  ;;  %11896 = vadd.xlane.f32.xlu0 %v11895_v16 }
 0xe40   :  { %v11836_v57 = vadd.f32 %v14276_v12, %v17785_v44  ;;  %v11830_v0 = vpop.f32.mrb[147].mxu1  ;;  %v11904_v6 = vsel %vm377_vm0, %v17836_v51, 0.0 }
 0xe41   :  { %v11831_v5 = vadd.f32 %v17785_v44, %v11830_v0  ;;  %11905 = vadd.xlane.f32.xlu1 %v11904_v6  ;;  %v11901_v45 = vsel %vm377_vm0, %v17841_v7, 0.0 }
 0xe42   :  { %v17848_v39 = vadd.f32 %v11836_v57, %v18542_v31 }
 0xe43   :  { %v17853_v19 = vadd.f32 %v11831_v5, %v18543_v53  ;;  %v14279_v13 = vpop.f32.mrb[148].mxu1  ;;  %11902 = vadd.xlane.f32.xlu0 %v11901_v45 }
 0xe44   :  { %v11846_v41 = vadd.f32 %v14279_v13, %v17785_v44  ;;  %v11840_v30 = vpop.f32.mrb[149].mxu1  ;;  %v11910_v17 = vsel %vm377_vm0, %v17848_v39, 0.0 }
 0xe45   :  { %v11841_v3 = vadd.f32 %v17785_v44, %v11840_v30  ;;  %11911 = vadd.xlane.f32.xlu1 %v11910_v17  ;;  %v11907_v9 = vsel %vm377_vm0, %v17853_v19, 0.0 }
 0xe46   :  { %v17860_v42 = vadd.f32 %v11846_v41, %v18544_v35 }
 0xe47   :  { %v17865_v40 = vadd.f32 %v11841_v3, %v18545_v48  ;;  %11908 = vadd.xlane.f32.xlu0 %v11907_v9 }
 0xe48   :  { %v11916_v1 = vsel %vm377_vm0, %v17860_v42, 0.0 }
 0xe49   :  { %11917 = vadd.xlane.f32.xlu1 %v11916_v1  ;;  %v11913_v27 = vsel %vm377_vm0, %v17865_v40, 0.0 }
 0xe4b   :  { %11914 = vadd.xlane.f32.xlu0 %v11913_v27 }
 0xe75   :  { %v14282_v61 = vpop.f32.mrb[150].mxu1 }
 0xe76   :  { %v11856_v43 = vadd.f32 %v14282_v61, %v17785_v44  ;;  %v11850_v22 = vpop.f32.mrb[151].mxu1 }
 0xe77   :  { %v11851_v52 = vadd.f32 %v17785_v44, %v11850_v22 }
 0xe78   :  { %v17874_v60 = vadd.f32 %v11856_v43, %v18546_v15 }
 0xe79   :  { %v17877_v24 = vadd.f32 %v11851_v52, %v18547_v23 }
 0xe7a   :  { %v11922_v37 = vsel %vm377_vm0, %v17874_v60, 0.0 }
 0xe7b   :  { %11923 = vadd.xlane.f32.xlu1 %v11922_v37  ;;  %v11919_v8 = vsel %vm377_vm0, %v17877_v24, 0.0 }
 0xe7c   :  { %11920 = vadd.xlane.f32.xlu0 %v11919_v8 }
 0xebb   :  { %v11882_v46 = vpop.xlane.xlu1 %11881 }
 0xebc   :  { %v11926_v56 = vmul.f32 0.03125, %v11882_v46  ;;  %v11879_v58 = vpop.xlane.xlu0 %11878 }
 0xebd   :  { %v11925_v62 = vmul.f32 0.03125, %v11879_v58 }
 0xebe   :  { %v17884_v44 = vsub.f32 %v17790_v59, %v11926_v56 }
 0xebf   :  { %v17887_v50 = vsub.f32 %v17793_v49, %v11925_v62 }
 0xec0   :  { %v11888_v10 = vpop.xlane.xlu0 %11887  ;;  %v11958_v20 = vmul.f32 %v17884_v44, %v17884_v44 }
 0xec1   :  { %v11928_v32 = vmul.f32 0.03125, %v11888_v10  ;;  %v11957_v21 = vmul.f32 %v17887_v50, %v17887_v50 }
 0xec2   :  { %v11976_v36 = vsel %vm377_vm0, %v11958_v20, 0.0 }
 0xec3   :  { %v17895_v28 = vsub.f32 %v17802_v33, %v11928_v32  ;;  %11977 = vadd.xlane.f32.xlu1 %v11976_v36  ;;  %v11973_v47 = vsel %vm377_vm0, %v11957_v21, 0.0 }
 0xec4   :  { %11974 = vadd.xlane.f32.xlu0 %v11973_v47  ;;  %v11885_v18 = vpop.xlane.xlu0 %11884 }
 0xec5   :  { %v11927_v11 = vmul.f32 0.03125, %v11885_v18  ;;  %v11960_v26 = vmul.f32 %v17895_v28, %v17895_v28 }
 0xec6   :  { %v11894_v63 = vpop.xlane.xlu1 %11893 }
 0xec7   :  { %v17901_v25 = vsub.f32 %v17805_v34, %v11927_v11  ;;  %v11930_v14 = vmul.f32 0.03125, %v11894_v63  ;;  %v11982_v55 = vsel %vm377_vm0, %v11960_v26, 0.0 }
 0xec8   :  { %11983 = vadd.xlane.f32.xlu1 %v11982_v55  ;;  %v11891_v16 = vpop.xlane.xlu0 %11890 }
 0xec9   :  { %v17905_v4 = vsub.f32 %v17812_v38, %v11930_v14  ;;  %v11929_v12 = vmul.f32 0.03125, %v11891_v16  ;;  %v11959_v57 = vmul.f32 %v17901_v25, %v17901_v25 }
 0xeca   :  { %v11900_v0 = vpop.xlane.xlu1 %11899 }
 0xecb   :  { %v17910_v6 = vsub.f32 %v17817_v54, %v11929_v12  ;;  %v11932_v5 = vmul.f32 0.03125, %v11900_v0  ;;  %v11979_v31 = vsel %vm377_vm0, %v11959_v57, 0.0  ;;  %v11962_v45 = vmul.f32 %v17905_v4, %v17905_v4 }
 0xecc   :  { %11980 = vadd.xlane.f32.xlu0 %v11979_v31  ;;  %v11897_v53 = vpop.xlane.xlu0 %11896 }
 0xecd   :  { %v17916_v13 = vsub.f32 %v17824_v29, %v11932_v5  ;;  %v11931_v41 = vmul.f32 0.03125, %v11897_v53  ;;  %v11988_v30 = vsel %vm377_vm0, %v11962_v45, 0.0  ;;  %v11961_v17 = vmul.f32 %v17910_v6, %v17910_v6  ;;  %v12152_v45 = vld [vmem:[#allocation7] sm:$0xff]  ;;  %v12153_v53 = vld [vmem:[#allocation7 + $0x8] sm:$0xff] }
 0xece   :  { %v11906_v3 = vpop.xlane.xlu1 %11905  ;;  %11989 = vadd.xlane.f32.xlu1 %v11988_v30  ;;  %v12154_v30 = vld [vmem:[#allocation7 + $0x10] sm:$0xff] }
 0xecf   :  { %v17922_v35 = vsub.f32 %v17829_v2, %v11931_v41  ;;  %v11934_v9 = vmul.f32 0.03125, %v11906_v3  ;;  %v11985_v48 = vsel %vm377_vm0, %v11961_v17, 0.0  ;;  %v11964_v1 = vmul.f32 %v17916_v13, %v17916_v13  ;;  %v12155_v17 = vld [vmem:[#allocation7 + $0x18] sm:$0xff] }
 0xed0   :  { %11986 = vadd.xlane.f32.xlu0 %v11985_v48  ;;  %v11903_v27 = vpop.xlane.xlu0 %11902  ;;  %v14387_v41 = vpack.c.bf16 %v12153_v53, %v12152_v45  ;;  %v14391_v3 = vpack.c.bf16 %v12155_v17, %v12154_v30  ;;  %v17982_v53 = vld [vmem:[%s18286_s8] ss:$0 sm:$0xff] }
 0xed1   :  { %v17928_v61 = vsub.f32 %v17836_v51, %v11934_v9  ;;  %v11933_v43 = vmul.f32 0.03125, %v11903_v27  ;;  %v11994_v22 = vsel %vm377_vm0, %v11964_v1, 0.0  ;;  %v11963_v52 = vmul.f32 %v17922_v35, %v17922_v35 }
 0xed2   :  { %v11912_v15 = vpop.xlane.xlu1 %11911  ;;  %11995 = vadd.xlane.f32.xlu1 %v11994_v22  ;;  %14388 = vmatprep.subr.bf16.mxu0 %v14387_v41 }
 0xed3   :  { %v17934_v23 = vsub.f32 %v17841_v7, %v11933_v43  ;;  %v11936_v37 = vmul.f32 0.03125, %v11912_v15  ;;  %v11991_v8 = vsel %vm377_vm0, %v11963_v52, 0.0  ;;  %v11966_v46 = vmul.f32 %v17928_v61, %v17928_v61  ;;  %14390 = vmatpush3.bf16.msra.mxu0 %v14387_v41 }
 0xed4   :  { %11992 = vadd.xlane.f32.xlu0 %v11991_v8  ;;  %v11909_v56 = vpop.xlane.xlu0 %11908  ;;  %14392 = vmatprep.subr.bf16.mxu0 %v14391_v3 }
 0xed5   :  { %v17940_v58 = vsub.f32 %v17848_v39, %v11936_v37  ;;  %v11935_v62 = vmul.f32 0.03125, %v11909_v56  ;;  %v12000_v10 = vsel %vm377_vm0, %v11966_v46, 0.0  ;;  %v11965_v20 = vmul.f32 %v17934_v23, %v17934_v23 }
 0xed6   :  { %v11918_v32 = vpop.xlane.xlu1 %11917  ;;  %12001 = vadd.xlane.f32.xlu1 %v12000_v10 }
 0xed7   :  { %v17946_v21 = vsub.f32 %v17853_v19, %v11935_v62  ;;  %v11938_v36 = vmul.f32 0.03125, %v11918_v32  ;;  %v11997_v47 = vsel %vm377_vm0, %v11965_v20, 0.0  ;;  %v11968_v18 = vmul.f32 %v17940_v58, %v17940_v58  ;;  %14394 = vmatpush3.bf16.msra.mxu0 %v14391_v3 }
 0xed8   :  { %11998 = vadd.xlane.f32.xlu0 %v11997_v47  ;;  %v11915_v11 = vpop.xlane.xlu0 %11914 }
 0xed9   :  { %v17952_v26 = vsub.f32 %v17860_v42, %v11938_v36  ;;  %v11937_v63 = vmul.f32 0.03125, %v11915_v11  ;;  %v12006_v14 = vsel %vm377_vm0, %v11968_v18, 0.0  ;;  %v11967_v55 = vmul.f32 %v17946_v21, %v17946_v21 }
 0xeda   :  { %12007 = vadd.xlane.f32.xlu1 %v12006_v14 }
 0xedb   :  { %v17958_v16 = vsub.f32 %v17865_v40, %v11937_v63  ;;  %v12003_v12 = vsel %vm377_vm0, %v11967_v55, 0.0  ;;  %v11970_v57 = vmul.f32 %v17952_v26, %v17952_v26 }
 0xedc   :  { %12004 = vadd.xlane.f32.xlu0 %v12003_v12 }
 0xedd   :  { %v12012_v0 = vsel %vm377_vm0, %v11970_v57, 0.0  ;;  %v11969_v5 = vmul.f32 %v17958_v16, %v17958_v16 }
 0xede   :  { %12013 = vadd.xlane.f32.xlu1 %v12012_v0 }
 0xedf   :  { %v12009_v31 = vsel %vm377_vm0, %v11969_v5, 0.0 }
 0xee0   :  { %12010 = vadd.xlane.f32.xlu0 %v12009_v31 }
 0xf08   :  { %v11924_v9 = vpop.xlane.xlu1 %11923 }
 0xf09   :  { %v11940_v48 = vmul.f32 0.03125, %v11924_v9  ;;  %v11921_v1 = vpop.xlane.xlu0 %11920 }
 0xf0a   :  { %v11939_v27 = vmul.f32 0.03125, %v11921_v1 }
 0xf0b   :  { %v17968_v43 = vsub.f32 %v17874_v60, %v11940_v48 }
 0xf0c   :  { %v17971_v22 = vsub.f32 %v17877_v24, %v11939_v27 }
 0xf0d   :  { %v11972_v52 = vmul.f32 %v17968_v43, %v17968_v43 }
 0xf0e   :  { %v11971_v15 = vmul.f32 %v17971_v22, %v17971_v22 }
 0xf0f   :  { %v12018_v37 = vsel %vm377_vm0, %v11972_v52, 0.0  ;;  %v17989_v52 = vld [vmem:[%s18287_s9] ss:$0 sm:$0xff] }
 0xf10   :  { %12019 = vadd.xlane.f32.xlu1 %v12018_v37  ;;  %v12015_v8 = vsel %vm377_vm0, %v11971_v15, 0.0 }
 0xf11   :  { %12016 = vadd.xlane.f32.xlu0 %v12015_v8 }
 0xf50   :  { %v11978_v46 = vpop.xlane.xlu1 %11977 }
 0xf51   :  { %v12022_v56 = vmul.f32 0.03125, %v11978_v46  ;;  %v11975_v62 = vpop.xlane.xlu0 %11974 }
 0xf52   :  { %v12021_v10 = vmul.f32 0.03125, %v11975_v62 }
 0xf53   :  { %v12038_v20 = vadd.f32 1e-05, %v12022_v56 }
 0xf54   :  { %v12037_v32 = vadd.f32 1e-05, %v12021_v10 }
 0xf55   :  { %14754 = vrsqrt.f32 %v12038_v20  ;;  %v11984_v36 = vpop.xlane.xlu1 %11983 }
 0xf56   :  { %14756 = vrsqrt.f32 %v12037_v32  ;;  %v12024_v47 = vmul.f32 0.03125, %v11984_v36 }
 0xf58   :  { %v12040_v18 = vadd.f32 1e-05, %v12024_v47 }
 0xf59   :  { %v11981_v11 = vpop.xlane.xlu0 %11980 }
 0xf5a   :  { %14758 = vrsqrt.f32 %v12040_v18  ;;  %v12023_v63 = vmul.f32 0.03125, %v11981_v11 }
 0xf5b   :  { %v11990_v14 = vpop.xlane.xlu1 %11989 }
 0xf5c   :  { %v12039_v55 = vadd.f32 1e-05, %v12023_v63  ;;  %v12026_v12 = vmul.f32 0.03125, %v11990_v14 }
 0xf5d   :  { %v11987_v57 = vpop.xlane.xlu0 %11986 }
 0xf5e   :  { %14760 = vrsqrt.f32 %v12039_v55  ;;  %v12042_v0 = vadd.f32 1e-05, %v12026_v12  ;;  %v12025_v5 = vmul.f32 0.03125, %v11987_v57 }
 0xf5f   :  { %v14755_v31 = vpop.eup %14754  ;;  %v11996_v45 = vpop.xlane.xlu1 %11995 }
 0xf60   :  { %v14757_v41 = vpop.eup %14756  ;;  %v12070_v30 = vmul.f32 %v14755_v31, %v17884_v44  ;;  %14762 = vrsqrt.f32 %v12042_v0  ;;  %v12041_v17 = vadd.f32 1e-05, %v12025_v5  ;;  %v12028_v3 = vmul.f32 0.03125, %v11996_v45 }
 0xf61   :  { %v11993_v9 = vpop.xlane.xlu0 %11992  ;;  %v12069_v48 = vmul.f32 %v14757_v41, %v17887_v50 }
 0xf62   :  { %14764 = vrsqrt.f32 %v12041_v17  ;;  %v12044_v1 = vadd.f32 1e-05, %v12028_v3  ;;  %v12027_v27 = vmul.f32 0.03125, %v11993_v9  ;;  %v12092_v15 = vmul.f32 %v17982_v53, %v12070_v30 }
 0xf63   :  { %v12002_v37 = vpop.xlane.xlu1 %12001  ;;  %v12091_v8 = vmul.f32 %v17982_v53, %v12069_v48 }
 0xf64   :  { %v14759_v44 = vpop.eup %14758  ;;  %14766 = vrsqrt.f32 %v12044_v1  ;;  %v12043_v46 = vadd.f32 1e-05, %v12027_v27  ;;  %v12030_v56 = vmul.f32 0.03125, %v12002_v37  ;;  %v12114_v36 = vadd.f32 %v17989_v52, %v12092_v15 }
 0xf65   :  { %v11999_v62 = vpop.xlane.xlu0 %11998  ;;  %v12113_v50 = vadd.f32 %v17989_v52, %v12091_v8  ;;  %v12072_v10 = vmul.f32 %v14759_v44, %v17895_v28 }
 0xf66   :  { %14768 = vrsqrt.f32 %v12043_v46  ;;  %v12046_v20 = vadd.f32 1e-05, %v12030_v56  ;;  %v12029_v32 = vmul.f32 0.03125, %v11999_v62 }
 0xf67   :  { %v12008_v47 = vpop.xlane.xlu1 %12007  ;;  %14291 = vmatprep.mubr.msk.f32.mxu0 %vm377_vm0, %v12113_v50  ;;  %v12094_v12 = vmul.f32 %v17982_v53, %v12072_v10 }
 0xf68   :  { %v14761_v18 = vpop.eup %14760  ;;  %14770 = vrsqrt.f32 %v12046_v20  ;;  %v12045_v11 = vadd.f32 1e-05, %v12029_v32  ;;  %v12032_v63 = vmul.f32 0.03125, %v12008_v47  ;;  %14292 = vmatmul.mubr.msk.f32.vlgmr.msra.gmra.mrb[136].mxu0 %vm377_vm0, %v12114_v36 }
 0xf69   :  { %v12005_v14 = vpop.xlane.xlu0 %12004  ;;  %v12071_v55 = vmul.f32 %v14761_v18, %v17901_v25  ;;  %v12116_v25 = vadd.f32 %v17989_v52, %v12094_v12 }
 0xf6a   :  { %v14763_v28 = vpop.eup %14762  ;;  %14772 = vrsqrt.f32 %v12045_v11  ;;  %v12048_v57 = vadd.f32 1e-05, %v12032_v63  ;;  %v12031_v0 = vmul.f32 0.03125, %v12005_v14 }
 0xf6b   :  { %v12014_v5 = vpop.xlane.xlu1 %12013  ;;  %v12093_v31 = vmul.f32 %v17982_v53, %v12071_v55  ;;  %v12074_v45 = vmul.f32 %v14763_v28, %v17905_v4 }
 0xf6c   :  { %v14765_v41 = vpop.eup %14764  ;;  %14774 = vrsqrt.f32 %v12048_v57  ;;  %v12047_v30 = vadd.f32 1e-05, %v12031_v0  ;;  %v12034_v17 = vmul.f32 0.03125, %v12014_v5 }
 0xf6d   :  { %v12011_v3 = vpop.xlane.xlu0 %12010  ;;  %v12115_v9 = vadd.f32 %v17989_v52, %v12093_v31  ;;  %v12073_v48 = vmul.f32 %v14765_v41, %v17910_v6  ;;  %v12096_v37 = vmul.f32 %v17982_v53, %v12074_v45 }
 0xf6e   :  { %v14767_v1 = vpop.eup %14766  ;;  %14776 = vrsqrt.f32 %v12047_v30  ;;  %v12050_v27 = vadd.f32 1e-05, %v12034_v17  ;;  %v12033_v15 = vmul.f32 0.03125, %v12011_v3 }
 0xf6f   :  { %14294 = vmatprep.mubr.msk.f32.mxu0 %vm377_vm0, %v12115_v9  ;;  %v12095_v4 = vmul.f32 %v17982_v53, %v12073_v48  ;;  %v12076_v8 = vmul.f32 %v14767_v1, %v17916_v13  ;;  %v12118_v50 = vadd.f32 %v17989_v52, %v12096_v37 }
 0xf70   :  { %v14769_v44 = vpop.eup %14768  ;;  %14778 = vrsqrt.f32 %v12050_v27  ;;  %v12049_v46 = vadd.f32 1e-05, %v12033_v15  ;;  %14295 = vmatmul.mubr.msk.f32.gmra.mrb[138].mxu0 %vm377_vm0, %v12116_v25 }
 0xf71   :  { %v12117_v56 = vadd.f32 %v17989_v52, %v12095_v4  ;;  %v12075_v6 = vmul.f32 %v14769_v44, %v17922_v35  ;;  %v12098_v10 = vmul.f32 %v17982_v53, %v12076_v8 }
 0xf72   :  { %v14771_v62 = vpop.eup %14770  ;;  %14780 = vrsqrt.f32 %v12049_v46 }
 0xf73   :  { %14297 = vmatprep.mubr.msk.f32.mxu0 %vm377_vm0, %v12117_v56  ;;  %v12097_v20 = vmul.f32 %v17982_v53, %v12075_v6  ;;  %v12078_v13 = vmul.f32 %v14771_v62, %v17928_v61  ;;  %v12120_v18 = vadd.f32 %v17989_v52, %v12098_v10  ;;  %v12484_v6 = vld [vmem:[%s18290_s12] sm:$0xff]  ;;  %v12489_v10 = vld [vmem:[%s18290_s12 + $0x28] sm:$0xff] }
 0xf74   :  { %v14773_v32 = vpop.eup %14772  ;;  %14298 = vmatmul.mubr.msk.f32.gmra.mrb[140].mxu0 %vm377_vm0, %v12118_v50  ;;  %v12488_v50 = vld [vmem:[%s18290_s12 + $0x20] sm:$0xff] }
 0xf75   :  { %v12119_v36 = vadd.f32 %v17989_v52, %v12097_v20  ;;  %v12077_v47 = vmul.f32 %v14773_v32, %v17934_v23  ;;  %v12100_v11 = vmul.f32 %v17982_v53, %v12078_v13  ;;  %v14403_v20 = vpack.c.bf16 %v12489_v10, %v12488_v50  ;;  %v12490_v13 = vld [vmem:[%s18290_s12 + $0x30] sm:$0xff]  ;;  %v12491_v32 = vld [vmem:[%s18290_s12 + $0x38] sm:$0xff] }
 0xf76   :  { %v14775_v35 = vpop.eup %14774 }
 0xf77   :  { %14300 = vmatprep.mubr.msk.f32.mxu0 %vm377_vm0, %v12119_v36  ;;  %v12099_v63 = vmul.f32 %v17982_v53, %v12077_v47  ;;  %v12080_v14 = vmul.f32 %v14775_v35, %v17940_v58  ;;  %v12122_v23 = vadd.f32 %v17989_v52, %v12100_v11  ;;  %v14407_v36 = vpack.c.bf16 %v12491_v32, %v12490_v13  ;;  %v12492_v47 = vld [vmem:[%s18290_s12 + $0x40] sm:$0xff]  ;;  %v12493_v35 = vld [vmem:[%s18290_s12 + $0x48] sm:$0xff]  ;;  %v12494_v11 = vld [vmem:[%s18290_s12 + $0x50] sm:$0xff] }
 0xf78   :  { %v14777_v55 = vpop.eup %14776  ;;  %14301 = vmatmul.mubr.msk.f32.gmra.mrb[142].mxu0 %vm377_vm0, %v12120_v18  ;;  %v14411_v18 = vpack.c.bf16 %v12493_v35, %v12492_v47 }
 0xf79   :  { %v12121_v61 = vadd.f32 %v17989_v52, %v12099_v63  ;;  %v12079_v12 = vmul.f32 %v14777_v55, %v17946_v21  ;;  %v12102_v57 = vmul.f32 %v17982_v53, %v12080_v14  ;;  %v12495_v63 = vld [vmem:[%s18290_s12 + $0x58] sm:$0xff]  ;;  %v12496_v55 = vld [vmem:[%s18290_s12 + $0x60] sm:$0xff] }
 0xf7a   :  { %v14779_v28 = vpop.eup %14778  ;;  %v14415_v14 = vpack.c.bf16 %v12495_v63, %v12494_v11 }
 0xf7b   :  { %14303 = vmatprep.mubr.msk.f32.mxu0 %vm377_vm0, %v12121_v61  ;;  %v12101_v0 = vmul.f32 %v17982_v53, %v12079_v12  ;;  %v12082_v5 = vmul.f32 %v14779_v28, %v17952_v26  ;;  %v12124_v21 = vadd.f32 %v17989_v52, %v12102_v57  ;;  %v12497_v61 = vld [vmem:[%s18290_s12 + $0x68] sm:$0xff]  ;;  %v12498_v28 = vld [vmem:[%s18290_s12 + $0x70] sm:$0xff] }
 0xf7c   :  { %v14781_v31 = vpop.eup %14780  ;;  %14304 = vmatmul.mubr.msk.f32.gmra.mrb[144].mxu0 %vm377_vm0, %v12122_v23  ;;  %v14419_v12 = vpack.c.bf16 %v12497_v61, %v12496_v55  ;;  %v12499_v23 = vld [vmem:[%s18290_s12 + $0x78] sm:$0xff] }
 0xf7d   :  { %v12123_v58 = vadd.f32 %v17989_v52, %v12101_v0  ;;  %v12081_v45 = vmul.f32 %v14781_v31, %v17958_v16  ;;  %v12104_v41 = vmul.f32 %v17982_v53, %v12082_v5  ;;  %v14423_v57 = vpack.c.bf16 %v12499_v23, %v12498_v28  ;;  %v18104_v0 = vld [vmem:[%s18289_s11] ss:$0 sm:$0xff] }
 0xf7f   :  { %14306 = vmatprep.mubr.msk.f32.mxu0 %vm377_vm0, %v12123_v58  ;;  %v12103_v30 = vmul.f32 %v17982_v53, %v12081_v45  ;;  %v12126_v26 = vadd.f32 %v17989_v52, %v12104_v41 }
 0xf80   :  { %14307 = vmatmul.mubr.msk.f32.gmra.mrb[146].mxu0 %vm377_vm0, %v12124_v21 }
 0xf81   :  { %v12125_v17 = vadd.f32 %v17989_v52, %v12103_v30 }
 0xf83   :  { %14309 = vmatprep.mubr.msk.f32.mxu0 %vm377_vm0, %v12125_v17 }
 0xf84   :  { %14310 = vmatmul.mubr.msk.f32.gmra.mrb[148].mxu0 %vm377_vm0, %v12126_v26 }
 0xf9d   :  { %v12020_v3 = vpop.xlane.xlu1 %12019 }
 0xf9e   :  { %v12036_v16 = vmul.f32 0.03125, %v12020_v3  ;;  %v12017_v9 = vpop.xlane.xlu0 %12016 }
 0xf9f   :  { %v12035_v25 = vmul.f32 0.03125, %v12017_v9 }
 0xfa0   :  { %v12052_v48 = vadd.f32 1e-05, %v12036_v16 }
 0xfa1   :  { %v12051_v1 = vadd.f32 1e-05, %v12035_v25 }
 0xfa2   :  { %14782 = vrsqrt.f32 %v12052_v48 }
 0xfa3   :  { %14784 = vrsqrt.f32 %v12051_v1 }
 0xfac   :  { %v14783_v27 = vpop.eup %14782 }
 0xfad   :  { %v14785_v15 = vpop.eup %14784  ;;  %v12084_v37 = vmul.f32 %v14783_v27, %v17968_v43  ;;  %v12485_v43 = vld [vmem:[%s18290_s12 + $0x8] sm:$0xff] }
 0xfae   :  { %v12083_v4 = vmul.f32 %v14785_v15, %v17971_v22  ;;  %v14395_v22 = vpack.c.bf16 %v12485_v43, %v12484_v6 }
 0xfaf   :  { %v12106_v8 = vmul.f32 %v17982_v53, %v12084_v37 }
 0xfb0   :  { %v12105_v44 = vmul.f32 %v17982_v53, %v12083_v4  ;;  %14396 = vmatprep.subr.bf16.mxu0 %v14395_v22  ;;  %14427 = vmatprep.subr.bf16.mxu1 %v14395_v22  ;;  %v12486_v53 = vld [vmem:[%s18290_s12 + $0x10] sm:$0xff] }
 0xfb1   :  { %v12128_v56 = vadd.f32 %v17989_v52, %v12106_v8  ;;  %14398 = vmatpush3.bf16.msra.mxu0 %v14395_v22  ;;  %14435 = vmatpush3.bf16.msra.mxu1 %v14395_v22 }
 0xfb2   :  { %v12127_v46 = vadd.f32 %v17989_v52, %v12105_v44  ;;  %v12487_v52 = vld [vmem:[%s18290_s12 + $0x18] sm:$0xff] }
 0xfb3   :  { %v14399_v62 = vpack.c.bf16 %v12487_v52, %v12486_v53 }
 0xfb4   :  { %14312 = vmatprep.mubr.msk.f32.mxu0 %vm377_vm0, %v12127_v46 }
 0xfb5   :  { %14313 = vmatmul.mubr.msk.f32.gmra.mrb[150].mxu0 %vm377_vm0, %v12128_v56  ;;  %14400 = vmatprep.subr.bf16.mxu0 %v14399_v62 }
 0xfb6   :  { %14428 = vmatprep.subr.bf16.mxu1 %v14399_v62  ;;  %14402 = vmatpush3.bf16.msra.mxu0 %v14399_v62 }
 0xfb7   :  { %14436 = vmatpush3.bf16.msra.mxu1 %v14399_v62  ;;  %14404 = vmatprep.subr.bf16.mxu0 %v14403_v20 }
 0xfb8   :  { %14429 = vmatprep.subr.bf16.mxu1 %v14403_v20 }
 0xfba   :  { %14406 = vmatpush3.bf16.msra.mxu0 %v14403_v20 }
 0xfbb   :  { %14437 = vmatpush3.bf16.msra.mxu1 %v14403_v20  ;;  %14408 = vmatprep.subr.bf16.mxu0 %v14407_v36 }
 0xfbc   :  { %14430 = vmatprep.subr.bf16.mxu1 %v14407_v36 }
 0xfbe   :  { %14410 = vmatpush3.bf16.msra.mxu0 %v14407_v36 }
 0xfbf   :  { %14438 = vmatpush3.bf16.msra.mxu1 %v14407_v36  ;;  %14412 = vmatprep.subr.bf16.mxu0 %v14411_v18 }
 0xfc0   :  { %14431 = vmatprep.subr.bf16.mxu1 %v14411_v18 }
 0xfc2   :  { %14414 = vmatpush3.bf16.msra.mxu0 %v14411_v18 }
 0xfc3   :  { %14439 = vmatpush3.bf16.msra.mxu1 %v14411_v18  ;;  %14416 = vmatprep.subr.bf16.mxu0 %v14415_v14 }
 0xfc4   :  { %14432 = vmatprep.subr.bf16.mxu1 %v14415_v14 }
 0xfc6   :  { %14418 = vmatpush3.bf16.msra.mxu0 %v14415_v14 }
 0xfc7   :  { %14440 = vmatpush3.bf16.msra.mxu1 %v14415_v14  ;;  %14420 = vmatprep.subr.bf16.mxu0 %v14419_v12 }
 0xfc8   :  { %14433 = vmatprep.subr.bf16.mxu1 %v14419_v12 }
 0xfca   :  { %14422 = vmatpush3.bf16.msra.mxu0 %v14419_v12 }
 0xfcb   :  { %14441 = vmatpush3.bf16.msra.mxu1 %v14419_v12  ;;  %14424 = vmatprep.subr.bf16.mxu0 %v14423_v57 }
 0xfcc   :  { %14434 = vmatprep.subr.bf16.mxu1 %v14423_v57 }
 0xfce   :  { %14426 = vmatpush3.bf16.msra.mxu0 %v14423_v57 }
 0xfcf   :  { %14442 = vmatpush3.bf16.msra.mxu1 %v14423_v57 }
0x103b   :  { %v14293_v5 = vpop.f32.mrb[136].mxu0 }
0x103c   :  { %v18107_v31 = vadd.f32 %v14293_v5, %v18104_v0  ;;  %v12277_v58 = vpop.f32.mrb[137].mxu0 }
0x103d   :  { %v18110_v45 = vadd.f32 %v18104_v0, %v12277_v58 }
0x103e   :  { %v13216_v21 = vmul.f32 -1.702, %v18107_v31 }
0x103f   :  { %v13215_v41 = vmul.f32 -1.702, %v18110_v45 }
0x1040   :  { %v12390_v30 = vmul.f32 1.442695, %v13216_v21 }
0x1041   :  { %v12388_v17 = vmul.f32 1.442695, %v13215_v41 }
0x1042   :  { %14786 = vpow2.f32 %v12390_v30 }
0x1043   :  { %14788 = vpow2.f32 %v12388_v17  ;;  %v14296_v26 = vpop.f32.mrb[138].mxu0 }
0x1044   :  { %v18115_v3 = vadd.f32 %v14296_v26, %v18104_v0  ;;  %v12287_v16 = vpop.f32.mrb[139].mxu0 }
0x1045   :  { %v18118_v9 = vadd.f32 %v18104_v0, %v12287_v16 }
0x1046   :  { %v13218_v25 = vmul.f32 -1.702, %v18115_v3 }
0x1047   :  { %v13217_v48 = vmul.f32 -1.702, %v18118_v9  ;;  %v14299_v1 = vpop.f32.mrb[140].mxu0 }
0x1048   :  { %v12394_v27 = vmul.f32 1.442695, %v13218_v25  ;;  %v18123_v15 = vadd.f32 %v14299_v1, %v18104_v0  ;;  %v12297_v37 = vpop.f32.mrb[141].mxu0 }
0x1049   :  { %v12392_v4 = vmul.f32 1.442695, %v13217_v48  ;;  %v18126_v8 = vadd.f32 %v18104_v0, %v12297_v37 }
0x104a   :  { %14790 = vpow2.f32 %v12394_v27  ;;  %v13220_v44 = vmul.f32 -1.702, %v18123_v15 }
0x104b   :  { %14792 = vpow2.f32 %v12392_v4  ;;  %v13219_v46 = vmul.f32 -1.702, %v18126_v8  ;;  %v14302_v56 = vpop.f32.mrb[142].mxu0 }
0x104c   :  { %v14787_v6 = vpop.eup %14786  ;;  %v12398_v43 = vmul.f32 1.442695, %v13220_v44  ;;  %v18131_v22 = vadd.f32 %v14302_v56, %v18104_v0  ;;  %v12307_v53 = vpop.f32.mrb[143].mxu0 }
0x104d   :  { %v14789_v52 = vpop.eup %14788  ;;  %v12421_v62 = vadd.f32 1.0, %v14787_v6  ;;  %v12396_v50 = vmul.f32 1.442695, %v13219_v46  ;;  %v18134_v10 = vadd.f32 %v18104_v0, %v12307_v53 }
0x104e   :  { %v12420_v20 = vadd.f32 1.0, %v14789_v52  ;;  %14794 = vpow2.f32 %v12398_v43  ;;  %v13222_v13 = vmul.f32 -1.702, %v18131_v22 }
0x104f   :  { %14796 = vrcp.f32 %v12421_v62  ;;  %v13221_v32 = vmul.f32 -1.702, %v18134_v10  ;;  %v14305_v36 = vpop.f32.mrb[144].mxu0 }
0x1050   :  { %14798 = vrcp.f32 %v12420_v20  ;;  %v12402_v47 = vmul.f32 1.442695, %v13222_v13  ;;  %v18139_v35 = vadd.f32 %v14305_v36, %v18104_v0  ;;  %v12317_v18 = vpop.f32.mrb[145].mxu0 }
0x1051   :  { %14800 = vpow2.f32 %v12396_v50  ;;  %v12400_v11 = vmul.f32 1.442695, %v13221_v32  ;;  %v18142_v63 = vadd.f32 %v18104_v0, %v12317_v18 }
0x1052   :  { %14802 = vpow2.f32 %v12402_v47  ;;  %v13224_v14 = vmul.f32 -1.702, %v18139_v35 }
0x1053   :  { %14804 = vpow2.f32 %v12400_v11  ;;  %v13223_v55 = vmul.f32 -1.702, %v18142_v63  ;;  %v14308_v61 = vpop.f32.mrb[146].mxu0 }
0x1054   :  { %v14791_v12 = vpop.eup %14790  ;;  %v12406_v28 = vmul.f32 1.442695, %v13224_v14  ;;  %v18147_v23 = vadd.f32 %v14308_v61, %v18104_v0  ;;  %v12327_v57 = vpop.f32.mrb[147].mxu0 }
0x1055   :  { %v14793_v5 = vpop.eup %14792  ;;  %v12423_v58 = vadd.f32 1.0, %v14791_v12  ;;  %v12404_v21 = vmul.f32 1.442695, %v13223_v55  ;;  %v18150_v41 = vadd.f32 %v18104_v0, %v12327_v57 }
0x1056   :  { %v12422_v30 = vadd.f32 1.0, %v14793_v5  ;;  %14806 = vpow2.f32 %v12406_v28  ;;  %v13226_v17 = vmul.f32 -1.702, %v18147_v23 }
0x1057   :  { %14808 = vrcp.f32 %v12423_v58  ;;  %v13225_v26 = vmul.f32 -1.702, %v18150_v41  ;;  %v14311_v16 = vpop.f32.mrb[148].mxu0 }
0x1058   :  { %v14795_v25 = vpop.eup %14794  ;;  %14810 = vrcp.f32 %v12422_v30  ;;  %v12410_v48 = vmul.f32 1.442695, %v13226_v17  ;;  %v18155_v1 = vadd.f32 %v14311_v16, %v18104_v0  ;;  %v12337_v27 = vpop.f32.mrb[149].mxu0 }
0x1059   :  { %v14797_v37 = vpop.eup %14796  ;;  %v12425_v4 = vadd.f32 1.0, %v14795_v25  ;;  %14812 = vpow2.f32 %v12404_v21  ;;  %v12408_v44 = vmul.f32 1.442695, %v13225_v26  ;;  %v18158_v46 = vadd.f32 %v18104_v0, %v12337_v27 }
0x105a   :  { %v14799_v56 = vpop.eup %14798  ;;  %14814 = vpow2.f32 %v12410_v48  ;;  %v13228_v6 = vmul.f32 -1.702, %v18155_v1  ;;  %v12469_v50 = vmul.f32 %v14797_v37, %v18107_v31 }
0x105b   :  { %v14801_v43 = vpop.eup %14800  ;;  %v12468_v53 = vmul.f32 %v14799_v56, %v18110_v45  ;;  %v13227_v52 = vmul.f32 -1.702, %v18158_v46  ;;  %14816 = vpow2.f32 %v12408_v44 }
0x105c   :  { %v14803_v62 = vpop.eup %14802  ;;  %v12424_v20 = vadd.f32 1.0, %v14801_v43  ;;  %14818 = vrcp.f32 %v12425_v4  ;;  %v12414_v36 = vmul.f32 1.442695, %v13228_v6 }
0x105d   :  { %v14805_v13 = vpop.eup %14804  ;;  %v12427_v32 = vadd.f32 1.0, %v14803_v62  ;;  %14347 = vmatprep.mubr.f32.mxu0 %v12468_v53  ;;  %v12412_v18 = vmul.f32 1.442695, %v13227_v52 }
0x105e   :  { %14820 = vrcp.f32 %v12424_v20  ;;  %v12426_v47 = vadd.f32 1.0, %v14805_v13  ;;  %14348 = vmatmul.mubr.f32.vlgmr.msra.gmra.mrb[152].mxu0 %v12469_v50 }
0x105f   :  { %14822 = vrcp.f32 %v12427_v32 }
0x1060   :  { %v14807_v11 = vpop.eup %14806  ;;  %14824 = vrcp.f32 %v12426_v47 }
0x1061   :  { %v14809_v45 = vpop.eup %14808  ;;  %v12429_v14 = vadd.f32 1.0, %v14807_v11  ;;  %14826 = vpow2.f32 %v12414_v36 }
0x1062   :  { %v14811_v55 = vpop.eup %14810  ;;  %14828 = vpow2.f32 %v12412_v18  ;;  %v12471_v28 = vmul.f32 %v14809_v45, %v18115_v3 }
0x1063   :  { %v14813_v31 = vpop.eup %14812  ;;  %v12470_v61 = vmul.f32 %v14811_v55, %v18118_v9  ;;  %14830 = vrcp.f32 %v12429_v14 }
0x1064   :  { %v14815_v12 = vpop.eup %14814  ;;  %v12428_v57 = vadd.f32 1.0, %v14813_v31 }
0x1065   :  { %v12431_v5 = vadd.f32 1.0, %v14815_v12  ;;  %14350 = vmatprep.mubr.f32.mxu0 %v12470_v61  ;;  %v14817_v58 = vpop.eup %14816  ;;  %v18181_v12 = vld [vmem:[%s18291_s13] ss:$0 sm:$0xff]  ;;  %s14969_s13 = smov [#allocation8]  }
0x1066   :  { %14832 = vrcp.f32 %v12428_v57  ;;  %14351 = vmatmul.mubr.f32.gmra.mrb[154].mxu0 %v12471_v28  ;;  %v14819_v21 = vpop.eup %14818  ;;  %v12430_v30 = vadd.f32 1.0, %v14817_v58  ;;  %v12137_v28 = vadd.f32 %v18181_v12, %v17790_v59  ;;  %v12139_v57 = vadd.f32 %v18181_v12, %v17802_v33  ;;  %v18548_v59 = vld [vmem:[#allocation12_spill] sm:$0xff]  ;;  %s12954_s16 = sshll.u32 %s14969_s13, 4  ;;  %s12955_s16 = int_to_ptr.vmem [resolvable:$true] %s12954_s16 }
0x1067   :  { %14834 = vrcp.f32 %v12431_v5  ;;  %v12473_v9 = vmul.f32 %v14819_v21, %v18123_v15  ;;  %v12136_v5 = vadd.f32 %v18181_v12, %v17793_v49  ;;  %v12138_v21 = vadd.f32 %v18181_v12, %v17805_v34  ;;  %s14919_s17 = scalar_lea.vmem %s12955_s16, 2048  ;;  %p14924_p11 = scmp.lt.s32.totalorder %s12955_s16, %s12955_s16 }
0x1068   :  { %v14821_v17 = vpop.eup %14820  ;;  %14836 = vrcp.f32 %v12430_v30  ;;  %v12141_v34 = vadd.f32 %v18181_v12, %v17812_v38  ;;  %p14920_p10 = scmp.ne.s32.totalorder %s12955_s16, %s14919_s17  ;;  %p14925_p12 = scmp.lt.s32.totalorder %s14919_s17, %s14919_s17 }
0x1069   :  { %v14823_v26 = vpop.eup %14822  ;;  %v12472_v16 = vmul.f32 %v14821_v17, %v18126_v8 }
0x106a   :  { %v14825_v25 = vpop.eup %14824  ;;  %v12475_v37 = vmul.f32 %v14823_v26, %v18131_v22  ;;  %p14926_p13 = por %p14925_p12, %p14924_p11 }
0x106b   :  { %v14827_v48 = vpop.eup %14826  ;;  %v12474_v3 = vmul.f32 %v14825_v25, %v18134_v10  ;;  %14353 = vmatprep.mubr.f32.mxu0 %v12472_v16 }
0x106c   :  { %v14829_v27 = vpop.eup %14828  ;;  %v12433_v4 = vadd.f32 1.0, %v14827_v48  ;;  %14354 = vmatmul.mubr.f32.gmra.mrb[156].mxu0 %v12473_v9  ;;  %p14927_p0 = pnand %p14926_p13, %p14920_p10 }
0x106d   :  { %v12432_v44 = vadd.f32 1.0, %v14829_v27  ;;  %14356 = vmatprep.mubr.f32.mxu1 %v12474_v3  ;;  %v14831_v56 = vpop.eup %14830 }
0x106e   :  { %14838 = vrcp.f32 %v12433_v4  ;;  %14357 = vmatmul.mubr.f32.vlgmr.msra.gmra.mrb[152].mxu1 %v12475_v37  ;;  %v12477_v15 = vmul.f32 %v14831_v56, %v18139_v35 }
0x106f   :  { %14840 = vrcp.f32 %v12432_v44 }
0x1070   :  { %v14833_v8 = vpop.eup %14832 }
0x1071   :  { %v12476_v6 = vmul.f32 %v14833_v8, %v18142_v63  ;;  %v14835_v43 = vpop.eup %14834  ;;  %v12143_v8 = vadd.f32 %v18181_v12, %v17824_v29 }
0x1072   :  { %v14837_v53 = vpop.eup %14836  ;;  %v12479_v22 = vmul.f32 %v14835_v43, %v18147_v23 }
0x1073   :  { %14359 = vmatprep.mubr.f32.mxu1 %v12476_v6  ;;  %v12478_v10 = vmul.f32 %v14837_v53, %v18150_v41 }
0x1074   :  { %14360 = vmatmul.mubr.f32.gmra.mrb[154].mxu1 %v12477_v15 }
0x1075   :  { %14362 = vmatprep.mubr.f32.mxu1 %v12478_v10 }
0x1078   :  { %v14839_v52 = vpop.eup %14838  ;;  %14363 = vmatmul.mubr.f32.gmra.mrb[156].mxu1 %v12479_v22 }
0x1079   :  { %v14841_v62 = vpop.eup %14840  ;;  %v12481_v20 = vmul.f32 %v14839_v52, %v18155_v1  ;;  %v12140_v52 = vadd.f32 %v18181_v12, %v17817_v54 }
0x107a   :  { %v12480_v50 = vmul.f32 %v14841_v62, %v18158_v46 }
0x107c   :  { %14365 = vmatprep.mubr.f32.mxu1 %v12480_v50  ;;  %v12142_v50 = vadd.f32 %v18181_v12, %v17829_v2  ;;  %v12145_v2 = vadd.f32 %v18181_v12, %v17836_v51 }
0x107d   :  { %14366 = vmatmul.mubr.f32.gmra.mrb[158].mxu1 %v12481_v20 }
0x1088   :  { %v14314_v63 = vpop.f32.mrb[150].mxu0 }
0x1089   :  { %v12353_v35 = vadd.f32 %v14314_v63, %v18104_v0  ;;  %v12347_v13 = vpop.f32.mrb[151].mxu0 }
0x108a   :  { %v12348_v32 = vadd.f32 %v18104_v0, %v12347_v13 }
0x108b   :  { %v13230_v41 = vmul.f32 -1.702, %v12353_v35 }
0x108c   :  { %v13229_v36 = vmul.f32 -1.702, %v12348_v32 }
0x108d   :  { %v12418_v47 = vmul.f32 1.442695, %v13230_v41 }
0x108e   :  { %v12416_v23 = vmul.f32 1.442695, %v13229_v36 }
0x108f   :  { %14842 = vpow2.f32 %v12418_v47 }
0x1090   :  { %14844 = vpow2.f32 %v12416_v23 }
0x1099   :  { %v14843_v18 = vpop.eup %14842 }
0x109a   :  { %v14845_v11 = vpop.eup %14844  ;;  %v12435_v45 = vadd.f32 1.0, %v14843_v18 }
0x109b   :  { %v12434_v46 = vadd.f32 1.0, %v14845_v11  ;;  %v12144_v11 = vadd.f32 %v18181_v12, %v17841_v7 }
0x109c   :  { %14846 = vrcp.f32 %v12435_v45  ;;  %v12147_v45 = vadd.f32 %v18181_v12, %v17848_v39 }
0x109d   :  { %14848 = vrcp.f32 %v12434_v46  ;;  %v12146_v46 = vadd.f32 %v18181_v12, %v17853_v19 }
0x10a6   :  { %v14847_v1 = vpop.eup %14846 }
0x10a7   :  { %v14849_v14 = vpop.eup %14848  ;;  %v12483_v31 = vmul.f32 %v14847_v1, %v12353_v35 }
0x10a8   :  { %v12482_v55 = vmul.f32 %v14849_v14, %v12348_v32 }
0x10aa   :  { %14368 = vmatprep.mubr.f32.mxu1 %v12482_v55 }
0x10ab   :  { %14369 = vmatmul.mubr.f32.gmra.mrb[160].mxu1 %v12483_v31 }
0x1131   :  { %v14349_v61 = vpop.f32.mrb[152].mxu0 }
0x1132   :  { %v12566_v0 = vpop.f32.mrb[153].mxu0  ;;  %v12646_v30 = vadd.f32 %v14349_v61, %v12137_v28  ;;  %v18549_v61 = vld [vmem:[#allocation13_spill] sm:$0xff] }
0x1133   :  { %v12645_v16 = vadd.f32 %v12566_v0, %v12136_v5 }
0x1139   :  { %v14352_v58 = vpop.f32.mrb[154].mxu0 }
0x113a   :  { %v12648_v17 = vadd.f32 %v14352_v58, %v12139_v57  ;;  %v12576_v26 = vpop.f32.mrb[155].mxu0 }
0x113b   :  { %v12647_v25 = vadd.f32 %v12576_v26, %v12138_v21 }
0x113c   :  { %v12677_v9 = vcombine.low %v12646_v30, %v12648_v17  ;;  %v12678_v48 = vcombine.high %v12646_v30, %v12648_v17 }
0x113d   :  { %v12661_v3 = vcombine.low %v12645_v16, %v12647_v25  ;;  %v12662_v27 = vcombine.high %v12645_v16, %v12647_v25 }
0x113e   :  { %v12685_v37 = vrot.slane %v12677_v9, %v18548_v59  ;;  %v12692_v33 = vrot.slane %v12678_v48, %v18548_v59 }
0x113f   :  { %v12669_v4 = vrot.slane %v12661_v3, %v18548_v59  ;;  %v12676_v49 = vrot.slane %v12662_v27, %v18548_v59  ;;  %v14355_v44 = vpop.f32.mrb[156].mxu0 }
0x1140   :  { %v12586_v56 = vpop.f32.mrb[157].mxu0  ;;  %v12650_v22 = vadd.f32 %v14355_v44, %v12141_v34 }
0x1141   :  { %v12725_v6 = vcombine.low %v12669_v4, %v12685_v37  ;;  %v12726_v43 = vcombine.high %v12669_v4, %v12685_v37  ;;  %v12741_v15 = vcombine.low %v12676_v49, %v12692_v33  ;;  %v12742_v53 = vcombine.high %v12676_v49, %v12692_v33  ;;  %v14358_v10 = vpop.f32.mrb[152].mxu1 }
0x1142   :  { %v12652_v62 = vadd.f32 %v14358_v10, %v12143_v8  ;;  %v12596_v20 = vpop.f32.mrb[153].mxu1  ;;  %v12649_v63 = vadd.f32 %v12586_v56, %v12140_v52 }
0x1143   :  { %v12651_v13 = vadd.f32 %v12596_v20, %v12142_v50  ;;  %v12733_v0 = vrot.slane %v12725_v6, %v18549_v61  ;;  %v12740_v28 = vrot.slane %v12726_v43, %v18549_v61  ;;  %v12749_v57 = vrot.slane %v12741_v15, %v18549_v61 }
0x1144   :  { %v12709_v38 = vcombine.low %v12650_v22, %v12652_v62  ;;  %v12710_v35 = vcombine.high %v12650_v22, %v12652_v62  ;;  %v12756_v51 = vrot.slane %v12742_v53, %v18549_v61  ;;  %v12149_v20 = vadd.f32 %v18181_v12, %v17860_v42 }
0x1145   :  { %v12693_v41 = vcombine.low %v12649_v63, %v12651_v13  ;;  %v12694_v36 = vcombine.high %v12649_v63, %v12651_v13  ;;  %v12151_v63 = vadd.f32 %v18181_v12, %v17874_v60  ;;  %v12150_v13 = vadd.f32 %v18181_v12, %v17877_v24 }
0x1146   :  { %v12717_v29 = vrot.slane %v12709_v38, %v18548_v59  ;;  %v12724_v32 = vrot.slane %v12710_v35, %v18548_v59  ;;  %v12148_v38 = vadd.f32 %v18181_v12, %v17865_v40 }
0x1147   :  { %v14361_v47 = vpop.f32.mrb[154].mxu1  ;;  %v12701_v23 = vrot.slane %v12693_v41, %v18548_v59  ;;  %v12708_v54 = vrot.slane %v12694_v36, %v18548_v59 }
0x1148   :  { %v12606_v18 = vpop.f32.mrb[155].mxu1  ;;  %v12654_v30 = vadd.f32 %v14361_v47, %v12145_v2 }
0x1149   :  { %v12757_v1 = vcombine.low %v12701_v23, %v12717_v29  ;;  %v12758_v14 = vcombine.high %v12701_v23, %v12717_v29  ;;  %v12773_v55 = vcombine.low %v12708_v54, %v12724_v32  ;;  %v12774_v31 = vcombine.high %v12708_v54, %v12724_v32 }
0x114a   :  { %v12653_v17 = vadd.f32 %v12606_v18, %v12144_v11 }
0x114b   :  { %v14364_v5 = vpop.f32.mrb[156].mxu1  ;;  %v12765_v7 = vrot.slane %v12757_v1, %v18549_v61  ;;  %v12772_v39 = vrot.slane %v12758_v14, %v18549_v61  ;;  %v12781_v58 = vrot.slane %v12773_v55, %v18549_v61  ;;  %v12788_v19 = vrot.slane %v12774_v31, %v18549_v61 }
0x114c   :  { %v12616_v21 = vpop.f32.mrb[157].mxu1  ;;  %v12656_v26 = vadd.f32 %v14364_v5, %v12147_v45 }
0x114d   :  { %v12655_v16 = vadd.f32 %v12616_v21, %v12146_v46  ;;  %v12789_v25 = vcombine.low %v12733_v0, %v12765_v7  ;;  %v12790_v9 = vcombine.high %v12733_v0, %v12765_v7  ;;  %v12791_v48 = vcombine.low %v12740_v28, %v12772_v39 }
0x114e   :  { %v12792_v3 = vcombine.high %v12740_v28, %v12772_v39  ;;  %v12793_v27 = vcombine.low %v12749_v57, %v12781_v58  ;;  %v12794_v37 = vcombine.high %v12749_v57, %v12781_v58  ;;  %v12795_v33 = vcombine.low %v12756_v51, %v12788_v19 }
0x114f   :  { %v12796_v4 = vcombine.high %v12756_v51, %v12788_v19  ;;  %12933 = vst.msk [vmem:[#allocation8] sm:$0xff] %vm377_vm0, %v12789_v25  ;;  %12935 = vst.msk [vmem:[#allocation8 + $0x10] sm:$0xff] %vm377_vm0, %v12790_v9  ;;  %v12813_v49 = vcombine.low %v12654_v30, %v12656_v26  ;;  %v12814_v44 = vcombine.high %v12654_v30, %v12656_v26 }
0x1150   :  { %12937 = vst.msk [vmem:[#allocation8 + $0x20] sm:$0xff] %vm377_vm0, %v12791_v48  ;;  %12939 = vst.msk [vmem:[#allocation8 + $0x30] sm:$0xff] %vm377_vm0, %v12792_v3  ;;  %v12797_v34 = vcombine.low %v12653_v17, %v12655_v16  ;;  %v12798_v56 = vcombine.high %v12653_v17, %v12655_v16  ;;  %v14367_v8 = vpop.f32.mrb[158].mxu1 }
0x1151   :  { %12941 = vst.msk [vmem:[#allocation8 + $0x40] sm:$0xff] %vm377_vm0, %v12793_v27  ;;  %12943 = vst.msk [vmem:[#allocation8 + $0x50] sm:$0xff] %vm377_vm0, %v12794_v37  ;;  %v12626_v6 = vpop.f32.mrb[159].mxu1  ;;  %v12821_v43 = vrot.slane %v12813_v49, %v18548_v59  ;;  %v12828_v15 = vrot.slane %v12814_v44, %v18548_v59  ;;  %v12658_v29 = vadd.f32 %v14367_v8, %v12149_v20 }
0x1152   :  { %12945 = vst.msk [vmem:[#allocation8 + $0x60] sm:$0xff] %vm377_vm0, %v12795_v33  ;;  %12947 = vst.msk [vmem:[#allocation8 + $0x70] sm:$0xff] %vm377_vm0, %v12796_v4  ;;  %v12805_v53 = vrot.slane %v12797_v34, %v18548_v59  ;;  %v12812_v10 = vrot.slane %v12798_v56, %v18548_v59  ;;  %v12657_v36 = vadd.f32 %v12626_v6, %v12148_v38 }
0x1154   :  { %v12861_v22 = vcombine.low %v12805_v53, %v12821_v43  ;;  %v12862_v52 = vcombine.high %v12805_v53, %v12821_v43  ;;  %v12877_v62 = vcombine.low %v12812_v10, %v12828_v15  ;;  %v12878_v50 = vcombine.high %v12812_v10, %v12828_v15 }
0x1156   :  { %v12869_v1 = vrot.slane %v12861_v22, %v18549_v61  ;;  %v12876_v14 = vrot.slane %v12862_v52, %v18549_v61  ;;  %v12892_v57 = vrot.slane %v12878_v50, %v18549_v61 }
0x117e   :  { %v14370_v35 = vpop.f32.mrb[160].mxu1 }
0x117f   :  { %v12660_v32 = vadd.f32 %v14370_v35, %v12151_v63  ;;  %v12636_v41 = vpop.f32.mrb[161].mxu1 }
0x1180   :  { %v12659_v47 = vadd.f32 %v12636_v41, %v12150_v13 }
0x1181   :  { %v12845_v23 = vcombine.low %v12658_v29, %v12660_v32  ;;  %v12846_v54 = vcombine.high %v12658_v29, %v12660_v32 }
0x1182   :  { %v12829_v18 = vcombine.low %v12657_v36, %v12659_v47  ;;  %v12830_v2 = vcombine.high %v12657_v36, %v12659_v47 }
0x1183   :  { %v12853_v42 = vrot.slane %v12845_v23, %v18548_v59  ;;  %v12860_v60 = vrot.slane %v12846_v54, %v18548_v59 }
0x1184   :  { %v12837_v11 = vrot.slane %v12829_v18, %v18548_v59  ;;  %v12844_v40 = vrot.slane %v12830_v2, %v18548_v59  ;;  %v12885_v59 = vrot.slane %v12877_v62, %v18549_v61 }
0x1186   :  { %v12893_v45 = vcombine.low %v12837_v11, %v12853_v42  ;;  %v12894_v46 = vcombine.high %v12837_v11, %v12853_v42  ;;  %v12909_v24 = vcombine.low %v12844_v40, %v12860_v60  ;;  %v12910_v12 = vcombine.high %v12844_v40, %v12860_v60 }
0x1188   :  { %v12901_v55 = vrot.slane %v12893_v45, %v18549_v61  ;;  %v12908_v31 = vrot.slane %v12894_v46, %v18549_v61  ;;  %v12917_v0 = vrot.slane %v12909_v24, %v18549_v61  ;;  %v12924_v28 = vrot.slane %v12910_v12, %v18549_v61 }
0x118a   :  { %v12925_v51 = vcombine.low %v12869_v1, %v12901_v55  ;;  %v12926_v5 = vcombine.high %v12869_v1, %v12901_v55  ;;  %v12927_v7 = vcombine.low %v12876_v14, %v12908_v31  ;;  %v12928_v39 = vcombine.high %v12876_v14, %v12908_v31 }
0x118b   :  { %v12929_v58 = vcombine.low %v12885_v59, %v12917_v0  ;;  %v12930_v19 = vcombine.high %v12885_v59, %v12917_v0  ;;  %v12931_v21 = vcombine.low %v12892_v57, %v12924_v28  ;;  %v12932_v30 = vcombine.high %v12892_v57, %v12924_v28 }
0x118c   :  { %12934 = vst.msk [vmem:[#allocation8 + $0x8] sm:$0xff] %vm377_vm0, %v12925_v51  ;;  %12936 = vst.msk [vmem:[#allocation8 + $0x18] sm:$0xff] %vm377_vm0, %v12926_v5 }
0x118d   :  { %12938 = vst.msk [vmem:[#allocation8 + $0x28] sm:$0xff] %vm377_vm0, %v12927_v7  ;;  %12940 = vst.msk [vmem:[#allocation8 + $0x38] sm:$0xff] %vm377_vm0, %v12928_v39 }
0x118e   :  { %12942 = vst.msk [vmem:[#allocation8 + $0x48] sm:$0xff] %vm377_vm0, %v12929_v58  ;;  %12944 = vst.msk [vmem:[#allocation8 + $0x58] sm:$0xff] %vm377_vm0, %v12930_v19 }
0x118f   :  { %12946 = vst.msk [vmem:[#allocation8 + $0x68] sm:$0xff] %vm377_vm0, %v12931_v21  ;;  %12948 = vst.msk [vmem:[#allocation8 + $0x78] sm:$0xff] %vm377_vm0, %v12932_v30 }
0x1190   :  { %14930 = shalt.err (!%p14927_p0)
}
0x1191   :  { %s14931_s20 = scalar_lea.hbm %s18292_s14, 2048 }
0x1192   :  { %p14932_p1 = scmp.ne.s32.totalorder %s18292_s14, %s14931_s20  ;;  %p14935_p2 = scmp.lt.u32.totalorder %s14931_s20, %s18292_s14 }
0x1194   :  { %p14937_p3 = pnand %p14935_p2, %p14932_p1 }
0x1196   :  { %14940 = shalt.err (!%p14937_p3)
}
0x1197   :  { %12960 = dma.vmem_to_hbm [thread:$0]  %s12955_s16, 2048, %s18292_s14, [#allocation4], %s14948_s23, %s14948_s23, %s14949_s24  }
0x1198   :  { %14945 = dma.done.wait [#allocation4], 2048  }
0x1199   :  { %14946 = vsyncadd [#allocation4], 4294965248 }
0x119a   :  { %12964 = vsyncpa [#allocation3], 1 }
0x119b   :  { %12965 = vsyncpa [#allocation6], 1 }
0x119c   :  { %12966 = vsyncpa [#allocation4], 1 }

</bundles_post_ra>
